<compile_context>
chip_gen: v7x
topology: tpu7x:2x2x1
jax: 0.10.0
libtpu: 0.0.40
codegen_flags: <defaults>
</compile_context>

<pallas_src>
import functools
import numpy as np
import jax
import jax.numpy as jnp
from jax.experimental import pallas as pl
from jax.experimental.pallas import tpu as pltpu

TINY = 1e-6
LN2 = float(np.log(2.0))

BRDF_BLOCK_ROWS = 1024
CS_BLOCK_ROWS = 1024
SG_BLOCK_ROWS = 256
VIS_BLOCK_PTS = 32
VIS_GROUP = 8


# ----------------------------------------------------------------------------
# helpers
# ----------------------------------------------------------------------------
def _ceil_to(x, m):
    return int(int(np.ceil(x / m)) * m)


def _row_tile(n, cap):
    # keep >=2 grid steps when the batch allows (v7x: 2 TensorCores share the
    # "parallel" grid axis), otherwise use the largest tile up to `cap`.
    half = _ceil_to(max(-(-n // 2), 1), 8)
    return max(8, min(cap, half))


def _pad_rows(x, rows, value=0.0):
    if x.shape[0] == rows:
        return x
    pad = [(0, rows - x.shape[0])] + [(0, 0)] * (x.ndim - 1)
    return jnp.pad(x, pad, constant_values=value)


# ----------------------------------------------------------------------------
# Pallas kernel 1: fused BRDF encoder + decoder (single call).
# Output slab (Tb, 128): cols [0:32] = pre-sigmoid latent, [32:36] = brdf,
# [36:128] = harmless padding from the zero-padded final decoder weight.
# ----------------------------------------------------------------------------
def _brdf_mlp_kernel(x_ref, *refs, n_enc, n_dec):
    out_ref = refs[-1]
    wrefs = refs[:-1]
    h = x_ref[...]                                       # (Tb, 128) f32
    for li in range(n_enc):
        w = wrefs[2 * li][...]
        b = wrefs[2 * li + 1][...]
        if li == 0:                                      # first layer f32 (precision)
            h = jnp.dot(h, w, preferred_element_type=jnp.float32) + b
        else:
            h = jnp.dot(h.astype(jnp.bfloat16), w,
                        preferred_element_type=jnp.float32) + b
        if li < n_enc - 1:
            h = jnp.where(h >= 0.0, h, 0.2 * h)          # LeakyReLU(0.2)
    values = h                                           # (Tb, 32) pre-sigmoid latent
    g = jax.nn.sigmoid(values)
    off = 2 * n_enc
    for li in range(n_dec):
        w = wrefs[off + 2 * li][...]
        b = wrefs[off + 2 * li + 1][...]
        g = jnp.dot(g.astype(jnp.bfloat16), w, preferred_element_type=jnp.float32) + b
        if li < n_dec - 1:
            g = jnp.where(g >= 0.0, g, 0.2 * g)
    brdf = jax.nn.sigmoid(g)                             # (Tb, 96): cols 0:4 real
    out_ref[...] = jnp.concatenate([values, brdf], axis=1)   # (Tb, 128), lane-dense


def brdf_mlp(points_enc, enc_layers, dec_layers, block_rows=BRDF_BLOCK_ROWS):
    n = points_enc.shape[0]
    din = enc_layers[0][0].shape[0]                      # 128 (padded)
    x = points_enc
    if x.shape[1] < din:
        x = jnp.pad(x, ((0, 0), (0, din - x.shape[1])))
    tb = _row_tile(n, block_rows)
    bp = _ceil_to(n, tb)
    xp = _pad_rows(x, bp)                                # f32
    args = []
    specs = [pl.BlockSpec((tb, din), lambda i: (i, 0))]
    for w, b in list(enc_layers) + list(dec_layers):
        args += [w, b]
        specs += [pl.BlockSpec(w.shape, lambda i: (0, 0)),
                  pl.BlockSpec(b.shape, lambda i: (0, 0))]
    out = pl.pallas_call(
        functools.partial(_brdf_mlp_kernel, n_enc=len(enc_layers), n_dec=len(dec_layers)),
        out_shape=jax.ShapeDtypeStruct((bp, 128), jnp.float32),
        grid=(bp // tb,),
        in_specs=specs,
        out_specs=pl.BlockSpec((tb, 128), lambda i: (i, 0)),
        compiler_params=pltpu.CompilerParams(dimension_semantics=("parallel",)),
    )(xp, *args)
    return out[:n, :32], out[:n, 32:36]                  # values (pre-sigmoid), brdf


# ----------------------------------------------------------------------------
# Pallas kernel 2: generic fused MLP (used for net_cs).  The final layer is
# zero-padded to 128 output lanes at pack time so the HBM store is lane-dense.
# ----------------------------------------------------------------------------
def _fused_mlp_kernel(x_ref, *refs, acts):
    out_ref = refs[-1]
    wrefs = refs[:-1]
    h = x_ref[...]                                       # f32
    for li, act in enumerate(acts):
        w = wrefs[2 * li][...]
        b = wrefs[2 * li + 1][...]
        hh = h if li == 0 else h.astype(jnp.bfloat16)
        h = jnp.dot(hh, w, preferred_element_type=jnp.float32) + b
        if act == "leaky":
            h = jnp.where(h >= 0.0, h, 0.2 * h)
        elif act == "sigmoid":
            h = jax.nn.sigmoid(h)
    out_ref[...] = h


def fused_mlp(x, layers, acts, dout, block_rows=CS_BLOCK_ROWS):
    n = x.shape[0]
    din = layers[0][0].shape[0]                          # padded input width
    if x.shape[1] < din:
        x = jnp.pad(x, ((0, 0), (0, din - x.shape[1])))
    dpad = layers[-1][0].shape[1]                        # padded output width (128)
    tb = _row_tile(n, block_rows)
    bp = _ceil_to(n, tb)
    xp = _pad_rows(x, bp)
    args = []
    specs = [pl.BlockSpec((tb, din), lambda i: (i, 0))]
    for w, b in layers:
        args += [w, b]
        specs += [pl.BlockSpec(w.shape, lambda i: (0, 0)),
                  pl.BlockSpec(b.shape, lambda i: (0, 0))]
    out = pl.pallas_call(
        functools.partial(_fused_mlp_kernel, acts=tuple(acts)),
        out_shape=jax.ShapeDtypeStruct((bp, dpad), jnp.float32),
        grid=(bp // tb,),
        in_specs=specs,
        out_specs=pl.BlockSpec((tb, dpad), lambda i: (i, 0)),
        compiler_params=pltpu.CompilerParams(dimension_semantics=("parallel",)),
    )(xp, *args)
    return out[:n, :dout]


# ----------------------------------------------------------------------------
# Pallas kernel 3: fused visibility kernel (row-batched).
# Per point tile, for groups of 8 points: build the (8, M, nsamp, 64)
# first-layer pre-activation in VMEM (no (n_points, M*nsamp, 6) HBM array),
# run the remaining MLP layers with ONE (8*M*nsamp,64)@(64,64) bf16 matmul per
# group, mask back-facing samples, and do the SG-weighted mean over samples
# with a VPU multiply + last-axis sum.  Output: (n_points, M_pad) lane-dense.
# ----------------------------------------------------------------------------
def _vis_pair_kernel(p_ref, n_ref, d0_ref, sd3_ref, wn_ref, w0p_ref, w1_ref, b1_ref,
                     w2t_ref, b2_ref, out_ref, *, tp, g, m, nsamp, m_pad):
    # point contribution of the first layer (K=3 -> VPU, kept f32)
    A = (p_ref[:, 0:1] * w0p_ref[0:1, :]
         + p_ref[:, 1:2] * w0p_ref[1:2, :]
         + p_ref[:, 2:3] * w0p_ref[2:3, :])              # (tp, 64) f32
    d0 = d0_ref[...]                                     # (m, nsamp, 64) = dirs@W0d + b0
    w1 = w1_ref[...]                                     # (64, 64) bf16
    b1 = b1_ref[...]                                     # (1, 64) f32
    w2 = w2t_ref[...]                                    # (1, 64) f32
    b2 = b2_ref[...]                                     # (1, 1) f32
    wn = wn_ref[...]                                     # (m, nsamp) f32
    sdx = sd3_ref[0]                                     # (m, nsamp)
    sdy = sd3_ref[1]
    sdz = sd3_ref[2]
    zero_pad = None
    if m_pad > m:
        zero_pad = jnp.zeros((g, m_pad - m), jnp.float32)

    # TODO(synk): for very large M*nsamp, additionally chunk the lobe axis so
    #             the per-group (g, M, nsamp, 64) transient stays ~1-2 MB.
    for gi in range(tp // g):
        r0, r1 = gi * g, (gi + 1) * g
        a_g = A[r0:r1, :]                                # (g, 64)
        n_g = n_ref[r0:r1, :]                            # (g, 3)
        h0 = a_g[:, None, None, :] + d0[None, :, :, :]   # (g, m, nsamp, 64) f32
        h0 = jnp.where(h0 >= 0.0, h0, 0.2 * h0)
        h0f = h0.reshape(g * m * nsamp, 64).astype(jnp.bfloat16)
        h1 = jnp.dot(h0f, w1, preferred_element_type=jnp.float32) + b1
        h1 = jnp.where(h1 >= 0.0, h1, 0.2 * h1)          # (g*m*nsamp, 64)
        logit = jnp.sum(h1.reshape(g, m, nsamp, 64) * w2[None, None], axis=-1) + b2
        v = jax.nn.sigmoid(logit)                        # (g, m, nsamp)
        cos = (n_g[:, 0:1][:, :, None] * sdx[None]
               + n_g[:, 1:2][:, :, None] * sdy[None]
               + n_g[:, 2:3][:, :, None] * sdz[None])    # (g, m, nsamp)
        v = jnp.where(cos > TINY, v, 0.0)
        vred = jnp.sum(v * wn[None], axis=-1)            # (g, m) weighted mean
        if zero_pad is not None:
            vred = jnp.concatenate([vred, zero_pad], axis=1)
        out_ref[r0:r1, :] = vred                         # lane-dense (g, m_pad) store


def vis_pair_call(points, normals, d0, sd3, wnorm, vis_packed, m_pad, nsamp,
                  block_pts=VIS_BLOCK_PTS):
    np_ = points.shape[0]
    m = d0.shape[0]
    g = VIS_GROUP
    tp = min(block_pts, _ceil_to(np_, g))
    tp = _ceil_to(tp, g)
    npp = _ceil_to(np_, tp)
    pts = _pad_rows(points, npp)                         # f32 (precision)
    nrm = _pad_rows(normals, npp)
    out = pl.pallas_call(
        functools.partial(_vis_pair_kernel, tp=tp, g=g, m=m, nsamp=nsamp, m_pad=m_pad),
        out_shape=jax.ShapeDtypeStruct((npp, m_pad), jnp.float32),
        grid=(npp // tp,),
        in_specs=[
            pl.BlockSpec((tp, 3), lambda i: (i, 0)),
            pl.BlockSpec((tp, 3), lambda i: (i, 0)),
            pl.BlockSpec((m, nsamp, 64), lambda i: (0, 0, 0)),
            pl.BlockSpec((3, m, nsamp), lambda i: (0, 0, 0)),
            pl.BlockSpec((m, nsamp), lambda i: (0, 0)),
            pl.BlockSpec((3, 64), lambda i: (0, 0)),
            pl.BlockSpec((64, 64), lambda i: (0, 0)),
            pl.BlockSpec((1, 64), lambda i: (0, 0)),
            pl.BlockSpec((1, 64), lambda i: (0, 0)),
            pl.BlockSpec((1, 1), lambda i: (0, 0)),
        ],
        out_specs=pl.BlockSpec((tp, m_pad), lambda i: (i, 0)),
        compiler_params=pltpu.CompilerParams(dimension_semantics=("parallel",)),
    )(pts, nrm, d0, sd3, wnorm, vis_packed["w0p"], vis_packed["w1"],
      vis_packed["b1"], vis_packed["w2t"], vis_packed["b2"])
    return out[:np_]                                     # (n_points, m_pad)


# ----------------------------------------------------------------------------
# Pallas kernel 4: spherical-gaussian renderer, tiled over the batch.
# Lights arrive pre-normalized / pre-abs'd and padded to M_pad>=128 lanes
# (padded lobes have mu=0 so they contribute exactly 0).
# ----------------------------------------------------------------------------
def _normalize3(lobe):
    inv_n = pl.reciprocal(
        jnp.sqrt(lobe[0] * lobe[0] + lobe[1] * lobe[1] + lobe[2] * lobe[2]) + TINY,
        approx=True)
    return [lobe[c] * inv_n for c in range(3)]


def _hemisphere_int(lam, cos_beta):
    lam = jnp.maximum(lam, TINY)
    inv_l = pl.reciprocal(lam + TINY, approx=True)
    t = jnp.sqrt(lam + TINY) * (1.6988 + 10.8438 * inv_l) * pl.reciprocal(
        1.0 + 6.2201 * inv_l + 10.2415 * inv_l * inv_l + TINY, approx=True)
    inv_a = jnp.exp(-t)
    # exp(-t*max(c,0)) and exp(t*min(c,0)) are both exp(-t*|c|) on their
    # selected branch -> one transcendental instead of two.
    e_c = jnp.exp(-t * jnp.abs(cos_beta))
    s1 = (1.0 - inv_a * e_c) * pl.reciprocal(
        1.0 - inv_a + e_c - inv_a * e_c + TINY, approx=True)
    s2 = (e_c - inv_a) * pl.reciprocal((1.0 - inv_a) * (e_c + 1.0) + TINY, approx=True)
    s = jnp.where(cos_beta >= 0.0, s1, s2)
    inv_lam = pl.reciprocal(lam, approx=True)
    e_l = jnp.exp(-lam)                                  # exp(-2*lam) == e_l*e_l
    A_b = 2.0 * np.pi * inv_lam * (e_l - e_l * e_l)
    A_u = 2.0 * np.pi * inv_lam * (1.0 - e_l)
    return A_b * (1.0 - s) + A_u * s


def _lambda_trick_geo(lobe1, lam1, lobe2, lam2, norm1=True, norm2=True):
    ratio = lam1 * pl.reciprocal(lam2 + TINY, approx=True)
    l1 = _normalize3(lobe1) if norm1 else lobe1
    l2 = _normalize3(lobe2) if norm2 else lobe2
    dot = l1[0] * l2[0] + l1[1] * l2[1] + l1[2] * l2[2]
    tmp = jnp.sqrt(ratio * ratio + 1.0 + 2.0 * ratio * dot + TINY)
    tmp = jnp.minimum(tmp, ratio + 1.0)
    lam3 = lam2 * tmp
    inv_tmp = pl.reciprocal(tmp + TINY, approx=True)
    diff = lam2 * (tmp - ratio - 1.0)
    flobes = [ratio * inv_tmp * l1[c] + inv_tmp * l2[c] for c in range(3)]
    return flobes, lam3, diff


def _integrate_rgb(n, flobes, flam, fmus, lobes_unit=False):
    mu_cos, lambda_cos, alpha_cos = 32.708, 0.0315, 31.7003
    plobes, plam, pdiff = _lambda_trick_geo(n, lambda_cos, flobes, flam,
                                            norm1=False, norm2=not lobes_unit)
    dot1 = jnp.maximum(plobes[0] * n[0] + plobes[1] * n[1] + plobes[2] * n[2], 0.0)
    dot2 = jnp.maximum(flobes[0] * n[0] + flobes[1] * n[1] + flobes[2] * n[2], 0.0)
    H1 = _hemisphere_int(plam, dot1)
    H2 = _hemisphere_int(flam, dot2)
    epd = jnp.exp(pdiff)
    out = []
    for c in range(3):
        rc = mu_cos * fmus[c] * epd * H1 - fmus[c] * alpha_cos * H2
        rc = jnp.sum(rc, axis=1, keepdims=True)          # sum over the lobe lanes
        out.append(jnp.clip(rc, 0.0, 1.0))
    return out


def _sg_render_kernel(lgt_ref, vis_ref, n_ref, v_ref, rough_ref, dalb_ref, salb_ref,
                      out_ref, *, spec_reflectance):
    # lgt_ref: (7, 1|Tb, M_pad) pre-normalized lobes / |lambda| / |mu|
    lobes = [lgt_ref[0], lgt_ref[1], lgt_ref[2]]
    lam = lgt_ref[3]
    origin_mu = [lgt_ref[4], lgt_ref[5], lgt_ref[6]]
    vis = vis_ref[...]                                   # (1|Tb, M_pad)

    n = [n_ref[:, c:c + 1] for c in range(3)]
    v = [v_ref[:, c:c + 1] for c in range(3)]
    dalb = [dalb_ref[:, c:c + 1] for c in range(3)]
    salb = [salb_ref[:, c:c + 1] for c in range(3)]
    r = rough_ref[:, 0:1]

    r2 = r * r
    inv_r4 = 2.0 * pl.reciprocal(r2 * r2, approx=True)
    brdf_mu = inv_r4 * (1.0 / np.pi)
    v_dot_lobe = jnp.maximum(n[0] * v[0] + n[1] * v[1] + n[2] * v[2], 0.0)
    warp = [2.0 * v_dot_lobe * n[c] - v[c] for c in range(3)]
    warp = _normalize3(warp)
    warp_lam = inv_r4 * pl.reciprocal(4.0 * v_dot_lobe + TINY, approx=True)
    half = [warp[c] + v[c] for c in range(3)]
    half = _normalize3(half)
    v_dot_h = jnp.maximum(v[0] * half[0] + v[1] * half[1] + v[2] * half[2], 0.0)
    # 2 ** x == exp(x * ln 2)
    F = spec_reflectance + (1.0 - spec_reflectance) * jnp.exp(
        -(5.55473 * v_dot_h + 6.8316) * v_dot_h * LN2)
    dot1 = jnp.maximum(warp[0] * n[0] + warp[1] * n[1] + warp[2] * n[2], 0.0)
    dot2 = jnp.maximum(v[0] * n[0] + v[1] * n[1] + v[2] * n[2], 0.0)
    k = (r + 1.0) * (r + 1.0) * 0.125
    G1 = dot1 * pl.reciprocal(dot1 * (1.0 - k) + k + TINY, approx=True)
    G2 = dot2 * pl.reciprocal(dot2 * (1.0 - k) + k + TINY, approx=True)
    G = G1 * G2
    Moi = F * G * pl.reciprocal(4.0 * dot1 * dot2 + TINY, approx=True)
    warp_mu = [salb[c] * brdf_mu * Moi for c in range(3)]
    lgt_mu = [origin_mu[c] * vis for c in range(3)]

    # specular branch (light lobes and warp lobes are already unit)
    flobes, flam, dif_l = _lambda_trick_geo(lobes, lam, warp, warp_lam,
                                            norm1=False, norm2=False)
    edif = jnp.exp(dif_l)
    fmus = [lgt_mu[c] * warp_mu[c] * edif for c in range(3)]
    spec = _integrate_rgb(n, flobes, flam, fmus, lobes_unit=False)

    # diffuse branch
    dmus = [lgt_mu[c] * (dalb[c] * (1.0 / np.pi)) for c in range(3)]
    dif = _integrate_rgb(n, lobes, lam, dmus, lobes_unit=True)

    rows = spec[0].shape[0]
    pad = jnp.zeros((rows, 128 - 6), jnp.float32)
    out_ref[...] = jnp.concatenate(spec + dif + [pad], axis=1)   # (Tb, 128) slab


def sg_render(lgt_7xm, vis, n, v, rough, dalb, salb, spec_reflectance=0.02,
              block_rows=SG_BLOCK_ROWS):
    B = n.shape[0]
    _, BL, Mp = lgt_7xm.shape
    BV = vis.shape[0]
    tb = _row_tile(B, block_rows)
    bp = _ceil_to(B, tb)

    n_p = _pad_rows(n, bp)
    v_p = _pad_rows(v, bp)
    rough_p = _pad_rows(rough, bp, value=1.0)
    dalb_p = _pad_rows(dalb, bp)
    salb_p = _pad_rows(salb, bp)

    if BL == 1:
        lgt_in = lgt_7xm
        lgt_spec = pl.BlockSpec((7, 1, Mp), lambda i: (0, 0, 0))
    else:
        lgt_in = jnp.pad(lgt_7xm, ((0, 0), (0, bp - BL), (0, 0)))
        lgt_spec = pl.BlockSpec((7, tb, Mp), lambda i: (0, i, 0))
    if BV == 1:
        vis_in = vis
        vis_spec = pl.BlockSpec((1, Mp), lambda i: (0, 0))
    else:
        vis_in = _pad_rows(vis, bp)
        vis_spec = pl.BlockSpec((tb, Mp), lambda i: (i, 0))

    row3 = pl.BlockSpec((tb, 3), lambda i: (i, 0))
    row1 = pl.BlockSpec((tb, 1), lambda i: (i, 0))

    out = pl.pallas_call(
        functools.partial(_sg_render_kernel, spec_reflectance=float(spec_reflectance)),
        out_shape=jax.ShapeDtypeStruct((bp, 128), jnp.float32),
        grid=(bp // tb,),
        in_specs=[lgt_spec, vis_spec, row3, row3, row1, row3, row3],
        out_specs=pl.BlockSpec((tb, 128), lambda i: (i, 0)),
        compiler_params=pltpu.CompilerParams(dimension_semantics=("parallel",)),
    )(lgt_in, vis_in, n_p, v_p, rough_p, dalb_p, salb_p)
    return out[:B, 0:3], out[:B, 3:6]                    # specular, diffuse


# ----------------------------------------------------------------------------
# Plain-JAX glue (embedders, parameter init / packing, light prep, wrappers).
# ----------------------------------------------------------------------------
def tonemap_img(x):
    return jnp.power(x, 1.0 / 2.2)


def norm_axis(x):
    return x / (jnp.linalg.norm(x, axis=-1, keepdims=True) + TINY)


def make_embedder(multires, input_dims=3):
    freqs = 2.0 ** np.arange(multires)

    def embed(x):
        out = [x]
        for f in freqs:
            out.append(jnp.sin(x * f))
            out.append(jnp.cos(x * f))
        return jnp.concatenate(out, axis=-1)

    return embed, input_dims * (1 + 2 * multires)


embed_view, VIEW_DIM = make_embedder(4)     # 27
embed_pts, PTS_DIM = make_embedder(10)      # 63
CS_ACTS = ("leaky", "leaky", "leaky", "leaky", "sigmoid")


def compute_energy(lgt):
    lam = jnp.abs(lgt[:, 3:4])
    mu = jnp.abs(lgt[:, 4:])
    return mu * 2.0 * np.pi / lam * (1.0 - jnp.exp(-2.0 * lam))


def fibonacci_sphere(samples=1):
    points = []
    phi = np.pi * (3.0 - np.sqrt(5.0))
    for i in range(samples):
        y = 1 - i / float(samples - 1) * 2
        radius = np.sqrt(1 - y * y)
        theta = phi * i
        points.append([np.cos(theta) * radius, y, np.sin(theta) * radius])
    return np.array(points)


def init_linear(key, din, dout):
    kw, kb = jax.random.split(key)
    bound = 1.0 / np.sqrt(din)
    w = jax.random.uniform(kw, (din, dout), minval=-bound, maxval=bound, dtype=jnp.float32)
    b = jax.random.uniform(kb, (dout,), minval=-bound, maxval=bound, dtype=jnp.float32)
    return w, b


def init_params(key, num_lgt_sgs=16):
    keys = list(jax.random.split(key, 20))
    ki = iter(keys)
    params = {}
    enc_dims = [PTS_DIM, 512, 512, 512, 512, 32]
    params["brdf_encoder"] = [init_linear(next(ki), enc_dims[i], enc_dims[i + 1]) for i in range(5)]
    dec_dims = [32, 128, 128, 4]
    params["brdf_decoder"] = [init_linear(next(ki), dec_dims[i], dec_dims[i + 1]) for i in range(3)]
    cs_dims = [PTS_DIM + VIEW_DIM, 256, 256, 256, 256, 1]
    params["net_cs"] = [init_linear(next(ki), cs_dims[i], cs_dims[i + 1]) for i in range(5)]
    # lgtSGs parameter init (mirrors the module __init__)
    lgt = jax.random.normal(next(ki), (num_lgt_sgs, 7), dtype=jnp.float32)
    lgt = lgt.at[:, 5:7].set(jnp.broadcast_to(lgt[:, 4:5], (num_lgt_sgs, 2)))
    lgt = lgt.at[:, 3:4].set(10.0 + jnp.abs(lgt[:, 3:4] * 20.0))
    energy = compute_energy(lgt)
    lgt = lgt.at[:, 4:].set(jnp.abs(lgt[:, 4:]) / jnp.sum(energy, axis=0, keepdims=True)
                            * 2.0 * np.pi * 0.8)
    lobes = jnp.asarray(fibonacci_sphere(num_lgt_sgs // 2).astype(np.float32))
    lgt = lgt.at[:num_lgt_sgs // 2, :3].set(lobes)
    lgt = lgt.at[num_lgt_sgs // 2:, :3].set(lobes)
    params["lgtSGs"] = lgt
    return params


def init_vis_params(key):
    k0, k1, k2 = jax.random.split(key, 3)
    w0, b0 = init_linear(k0, 6, 64)
    w1, b1 = init_linear(k1, 64, 64)
    w2, b2 = init_linear(k2, 64, 1)
    return {"w0": w0, "b0": b0, "w1": w1, "b1": b1, "w2": w2, "b2": b2}


def _pack_mlp(layers, pad_in=None, pad_out=None, first_f32=True):
    ws = [jnp.asarray(w, jnp.float32) for w, _ in layers]
    bs = [jnp.asarray(b, jnp.float32) for _, b in layers]
    if pad_in is not None and ws[0].shape[0] < pad_in:
        ws[0] = jnp.pad(ws[0], ((0, pad_in - ws[0].shape[0]), (0, 0)))
    if pad_out is not None and ws[-1].shape[1] < pad_out:
        extra = pad_out - ws[-1].shape[1]
        ws[-1] = jnp.pad(ws[-1], ((0, 0), (0, extra)))
        bs[-1] = jnp.pad(bs[-1], (0, extra))
    packed = []
    for li, (w, b) in enumerate(zip(ws, bs)):
        wd = w if (first_f32 and li == 0) else w.astype(jnp.bfloat16)
        packed.append((wd, b.reshape(1, -1)))
    return packed


PAD_LOBE = np.array([0.0, 0.0, 1.0, 1.0, 0.0, 0.0, 0.0], np.float32)  # mu=0 -> contributes 0


def prep_lights_global(lgt_m7, m_pad):
    lobes = norm_axis(lgt_m7[:, :3])
    lam = jnp.abs(lgt_m7[:, 3:4])
    mu = jnp.abs(lgt_m7[:, 4:7])
    full = jnp.concatenate([lobes, lam, mu], axis=1)                 # (M, 7)
    M = full.shape[0]
    if M < m_pad:
        pad = jnp.broadcast_to(jnp.asarray(PAD_LOBE), (m_pad - M, 7))
        full = jnp.concatenate([full, pad], axis=0)
    return jnp.transpose(full)[:, None, :]                           # (7, 1, M_pad)


def prep_lights_per_point(lgt_bm7, m_pad):
    lobes = norm_axis(lgt_bm7[..., :3])
    lam = jnp.abs(lgt_bm7[..., 3:4])
    mu = jnp.abs(lgt_bm7[..., 4:7])
    full = jnp.concatenate([lobes, lam, mu], axis=-1)                # (B, Mi, 7)
    B, Mi, _ = full.shape
    if Mi < m_pad:
        pad = jnp.broadcast_to(jnp.asarray(PAD_LOBE), (B, m_pad - Mi, 7))
        full = jnp.concatenate([full, pad], axis=1)
    return jnp.transpose(full, (2, 0, 1))                            # (7, B, M_pad)


def pack_params(params, vis_params):
    """One-time packing: pad + pre-cast weights (no per-forward astype/pad ops)."""
    packed = {}
    packed["brdf_enc"] = _pack_mlp(params["brdf_encoder"], pad_in=128, first_f32=True)
    packed["brdf_dec"] = _pack_mlp(params["brdf_decoder"], pad_out=96, first_f32=False)
    packed["net_cs"] = _pack_mlp(params["net_cs"], pad_in=128, pad_out=128, first_f32=True)
    w0 = jnp.asarray(vis_params["w0"], jnp.float32)
    packed["vis"] = {
        "w0p": w0[:3],                                               # (3, 64) point rows
        "w0d": w0[3:],                                               # (3, 64) dir rows
        "b0": jnp.asarray(vis_params["b0"], jnp.float32),
        "w1": jnp.asarray(vis_params["w1"]).astype(jnp.bfloat16),
        "b1": jnp.asarray(vis_params["b1"], jnp.float32).reshape(1, -1),
        "w2t": jnp.asarray(vis_params["w2"], jnp.float32).reshape(1, -1),
        "b2": jnp.asarray(vis_params["b2"], jnp.float32).reshape(1, 1),
    }
    M = params["lgtSGs"].shape[0]
    m_pad = max(128, _ceil_to(M, 128))
    packed["lgt_global"] = prep_lights_global(params["lgtSGs"], m_pad)
    packed["num_lgt"] = M
    packed["m_pad"] = m_pad
    return packed


def get_diffuse_visibility(points, normals, vis_packed, lobes, lambdas, key, m_pad,
                           nsamp=32):
    """Returns SG-weighted visibility per (point, lobe): shape (n_points, m_pad)."""
    M = lobes.shape[0]
    light_dirs = norm_axis(lobes)                                    # (M,3)
    sharpness = lambdas[:, 0]                                        # (M,)
    sg_range = jnp.min(sharpness)
    r_phi_range = jnp.arccos(-1.95 * sg_range / sharpness + 1.0)     # (M,)
    z_axis = jnp.zeros_like(light_dirs).at[:, 2].set(1.0)
    U = norm_axis(jnp.cross(z_axis, light_dirs))
    V = norm_axis(jnp.cross(light_dirs, U))
    k1, k2 = jax.random.split(key)
    r_theta = jax.random.uniform(k1, (M, nsamp)) * 2.0 * np.pi
    r_phi = jax.random.uniform(k2, (M, nsamp)) * r_phi_range[:, None]
    sample_dir = (U[:, None, :] * (jnp.cos(r_theta) * jnp.sin(r_phi))[..., None]
                  + V[:, None, :] * (jnp.sin(r_theta) * jnp.sin(r_phi))[..., None]
                  + light_dirs[:, None, :] * jnp.cos(r_phi)[..., None])   # (M,nsamp,3)

    # SG weights (depend only on the sampled directions / lobes)
    wdot = jnp.sum(sample_dir * light_dirs[:, None, :], axis=-1)     # (M,nsamp)
    weight = jnp.exp(lambdas * (wdot - 1.0))                         # (M,nsamp)
    wnorm = weight / (jnp.sum(weight, axis=1, keepdims=True) + TINY)

    sd_flat = sample_dir.reshape(M * nsamp, 3)
    d0 = (sd_flat @ vis_packed["w0d"] + vis_packed["b0"]).reshape(M, nsamp, 64)
    sd3 = jnp.transpose(sample_dir, (2, 0, 1))                       # (3, M, nsamp)
    return vis_pair_call(points, normals, d0, sd3, wnorm, vis_packed, m_pad, nsamp)


def render_with_sg(points, normal, viewdirs, lgt_7xm, spec_refl, specular_albedo,
                   roughness, diffuse_albedo, num_real_lobes, comp_vis=True,
                   vis_packed=None, vis_key=None):
    B = normal.shape[0]
    Mp = lgt_7xm.shape[2]
    if comp_vis:
        lobes0 = jnp.transpose(lgt_7xm[0:3, 0, :num_real_lobes])     # (M, 3), unit
        lambdas0 = jnp.transpose(lgt_7xm[3:4, 0, :num_real_lobes])   # (M, 1), abs
        light_vis = get_diffuse_visibility(points, normal, vis_packed, lobes0, lambdas0,
                                           vis_key, Mp, nsamp=32)    # (B, Mp)
        vis_in = light_vis
        vis_shadow = jnp.broadcast_to(
            jnp.mean(light_vis[:, :num_real_lobes], axis=1, keepdims=True), (B, 3))
    else:
        vis_in = jnp.ones((1, Mp), jnp.float32)                      # broadcast in-kernel
        vis_shadow = jnp.zeros((B, 3), jnp.float32)
    spec_lin, diff_lin = sg_render(lgt_7xm, vis_in, normal, viewdirs, roughness,
                                   diffuse_albedo, specular_albedo, spec_refl)
    rgb = jnp.clip(spec_lin + diff_lin, 0.0, 1.0)
    return {"specular_loss": 0.0, "diffuse_loss": 0.0, "env_rgb": rgb,
            "diffuse_rgb": jnp.clip(tonemap_img(diff_lin), 0.0, 1.0),
            "specular_rgb": jnp.clip(tonemap_img(spec_lin), 0.0, 1.0),
            "lvis_mean": vis_shadow}


def render_with_all_sg(points, normal, viewdirs, packed, spec_refl, specular_albedo,
                       roughness, diffuse_albedo, vis_key, indir_lgtSGs=None):
    ret = render_with_sg(points, normal, viewdirs, packed["lgt_global"], spec_refl,
                         specular_albedo, roughness, diffuse_albedo, packed["num_lgt"],
                         comp_vis=True, vis_packed=packed["vis"], vis_key=vis_key)
    indir_rgb = jnp.zeros_like(points)
    if indir_lgtSGs is not None:
        mi = indir_lgtSGs.shape[1]
        mi_pad = max(128, _ceil_to(mi, 128))
        lgt_i = prep_lights_per_point(indir_lgtSGs, mi_pad)          # (7, B, Mi_pad)
        indir_rgb = render_with_sg(points, normal, viewdirs, lgt_i, spec_refl,
                                   specular_albedo, roughness, diffuse_albedo, mi,
                                   comp_vis=False)["env_rgb"]
    env_rgb = ret["env_rgb"]
    rgb = jnp.clip(tonemap_img(env_rgb + indir_rgb), 0.0, 1.0)
    ret.update({"rgb": rgb,
                "indir_rgb": jnp.clip(tonemap_img(indir_rgb), 0.0, 1.0),
                "env_rgb": jnp.clip(tonemap_img(env_rgb), 0.0, 1.0)})
    return ret


def kl_divergence(rho, values):
    rho_hat = jnp.mean(jax.nn.sigmoid(values), axis=0)
    rho_hat = jnp.clip(rho_hat, TINY, 1.0 - TINY)   # guard against log(0)
    return jnp.mean(rho * jnp.log(rho / rho_hat)
                    + (1.0 - rho) * jnp.log((1.0 - rho) / (1.0 - rho_hat)))


def envmap_material_forward(packed, points, ray_dirs, n, f, gt_specular_linear,
                            indiLgt, vis_key):
    del f, gt_specular_linear  # unused in the reference forward as well
    n = n / (jnp.linalg.norm(n, axis=-1, keepdims=True) + TINY)
    ray_dirs = ray_dirs / (jnp.linalg.norm(ray_dirs, axis=-1, keepdims=True) + TINY)
    view_dirs = -ray_dirs
    # utils.reflect(view_dirs, n) = 2*(v.n)*n - v
    ref_dirs = 2.0 * jnp.sum(view_dirs * n, axis=-1, keepdims=True) * n - view_dirs
    ref_dirs_enc = embed_view(ref_dirs)          # (B, 27)
    pts_enc = embed_pts(points)                  # (B, 63); reused (brdf_embed_fn == embed_pts_fn)

    # fused BRDF encoder + decoder (single pallas_call)
    values, brdf = brdf_mlp(pts_enc, packed["brdf_enc"], packed["brdf_dec"])
    roughness = brdf[:, 3:4] * 0.9 + 0.09
    diffuse_albedo = brdf[:, :3]
    loss = 0.01 * kl_divergence(0.05, values)

    # fused specular-albedo network (net_cs)
    z = jnp.concatenate([pts_enc, ref_dirs_enc], axis=-1)            # (B, 90)
    specular_albedo = fused_mlp(z, packed["net_cs"], CS_ACTS, dout=1)  # (B, 1)
    specular_albedo = jnp.tile(specular_albedo, (1, 3))              # repeat(1, 3)

    ret = render_with_all_sg(points, n, view_dirs, packed, 0.02, specular_albedo,
                             roughness, diffuse_albedo, vis_key, indir_lgtSGs=indiLgt)
    ret.update({"roughness": roughness,
                "diffuse_albedo": jnp.clip(tonemap_img(diffuse_albedo), 0.0, 1.0),
                "specular_albedo": jnp.clip(tonemap_img(specular_albedo), 0.0, 1.0),
                "encoder_loss": loss,
                "smooth_loss": 0.0})
    return ret


# ----------------------------------------------------------------------------
if __name__ == "__main__":
    B = 8            # batch of surface points
    M = 16           # num_lgt_sgs (small; module default is 128)
    M_IND = 8        # indirect-illumination SGs per point

    key = jax.random.PRNGKey(0)
    k_par, k_vis, k_in, k_samp = jax.random.split(key, 4)
    params = init_params(k_par, num_lgt_sgs=M)
    vis_params = init_vis_params(k_vis)
    packed = pack_params(params, vis_params)     # one-time pad + bf16 pre-cast

    kp, kr, kn, kg, kl = jax.random.split(k_in, 5)
    points = jax.random.normal(kp, (B, 3), dtype=jnp.float32)
    ray_dirs = jax.random.normal(kr, (B, 3), dtype=jnp.float32)
    normals = jax.random.normal(kn, (B, 3), dtype=jnp.float32)
    f = jnp.zeros((B, 1), jnp.float32)                               # unused (as in source)
    gt_specular_linear = jax.random.uniform(kg, (B, 3), dtype=jnp.float32)  # unused
    indiLgt = jax.random.normal(kl, (B, M_IND, 7), dtype=jnp.float32)
    indiLgt = indiLgt.at[:, :, 3:4].set(10.0 + jnp.abs(indiLgt[:, :, 3:4]))

    ret = envmap_material_forward(packed, points, ray_dirs, normals, f,
                                  gt_specular_linear, indiLgt, k_samp)
    jax.block_until_ready((ret["rgb"], ret["env_rgb"], ret["indir_rgb"],
                           ret["diffuse_rgb"], ret["specular_rgb"], ret["lvis_mean"],
                           ret["roughness"], ret["diffuse_albedo"],
                           ret["specular_albedo"], ret["encoder_loss"]))
    print("KERNEL_OK")
</pallas_src>

<mosaic_0001>
module attributes {stable_mosaic.version = 11 : i64} {
  func.func @_brdf_mlp_kernel(%arg0: i32, %arg1: memref<8x128xf32, #tpu.memory_space<vmem>>, %arg2: memref<128x512xf32, #tpu.memory_space<vmem>>, %arg3: memref<1x512xf32, #tpu.memory_space<vmem>>, %arg4: memref<512x512xbf16, #tpu.memory_space<vmem>>, %arg5: memref<1x512xf32, #tpu.memory_space<vmem>>, %arg6: memref<512x512xbf16, #tpu.memory_space<vmem>>, %arg7: memref<1x512xf32, #tpu.memory_space<vmem>>, %arg8: memref<512x512xbf16, #tpu.memory_space<vmem>>, %arg9: memref<1x512xf32, #tpu.memory_space<vmem>>, %arg10: memref<512x32xbf16, #tpu.memory_space<vmem>>, %arg11: memref<1x32xf32, #tpu.memory_space<vmem>>, %arg12: memref<32x128xbf16, #tpu.memory_space<vmem>>, %arg13: memref<1x128xf32, #tpu.memory_space<vmem>>, %arg14: memref<128x128xbf16, #tpu.memory_space<vmem>>, %arg15: memref<1x128xf32, #tpu.memory_space<vmem>>, %arg16: memref<128x96xbf16, #tpu.memory_space<vmem>>, %arg17: memref<1x96xf32, #tpu.memory_space<vmem>>, %arg18: memref<8x128xf32, #tpu.memory_space<vmem>>) attributes {dimension_semantics = [#tpu.dimension_semantics<parallel>], iteration_bounds = array<i64: 1>, scalar_prefetch = 0 : i64, scratch_operands = 0 : i64, tpu.core_type = #tpu.core_type<tc>, window_params = [{transform_indices = @transform_0, window_bounds = array<i64: 8, 128>}, {pipeline_mode = #tpu.pipeline_mode<synchronous>, transform_indices = @transform_1, window_bounds = array<i64: 128, 512>}, {pipeline_mode = #tpu.pipeline_mode<synchronous>, transform_indices = @transform_2, window_bounds = array<i64: 1, 512>}, {pipeline_mode = #tpu.pipeline_mode<synchronous>, transform_indices = @transform_3, window_bounds = array<i64: 512, 512>}, {pipeline_mode = #tpu.pipeline_mode<synchronous>, transform_indices = @transform_4, window_bounds = array<i64: 1, 512>}, {pipeline_mode = #tpu.pipeline_mode<synchronous>, transform_indices = @transform_5, window_bounds = array<i64: 512, 512>}, {pipeline_mode = #tpu.pipeline_mode<synchronous>, transform_indices = @transform_6, window_bounds = array<i64: 1, 512>}, {pipeline_mode = #tpu.pipeline_mode<synchronous>, transform_indices = @transform_7, window_bounds = array<i64: 512, 512>}, {pipeline_mode = #tpu.pipeline_mode<synchronous>, transform_indices = @transform_8, window_bounds = array<i64: 1, 512>}, {pipeline_mode = #tpu.pipeline_mode<synchronous>, transform_indices = @transform_9, window_bounds = array<i64: 512, 32>}, {pipeline_mode = #tpu.pipeline_mode<synchronous>, transform_indices = @transform_10, window_bounds = array<i64: 1, 32>}, {pipeline_mode = #tpu.pipeline_mode<synchronous>, transform_indices = @transform_11, window_bounds = array<i64: 32, 128>}, {pipeline_mode = #tpu.pipeline_mode<synchronous>, transform_indices = @transform_12, window_bounds = array<i64: 1, 128>}, {pipeline_mode = #tpu.pipeline_mode<synchronous>, transform_indices = @transform_13, window_bounds = array<i64: 128, 128>}, {pipeline_mode = #tpu.pipeline_mode<synchronous>, transform_indices = @transform_14, window_bounds = array<i64: 1, 128>}, {pipeline_mode = #tpu.pipeline_mode<synchronous>, transform_indices = @transform_15, window_bounds = array<i64: 128, 96>}, {pipeline_mode = #tpu.pipeline_mode<synchronous>, transform_indices = @transform_16, window_bounds = array<i64: 1, 96>}, {transform_indices = @transform_17, window_bounds = array<i64: 8, 128>}]} {
    %c0 = arith.constant 0 : index
    %c0_0 = arith.constant 0 : index
    %0 = vector.load %arg1[%c0, %c0_0] : memref<8x128xf32, #tpu.memory_space<vmem>>, vector<8x128xf32>
    %c0_1 = arith.constant 0 : index
    %c0_2 = arith.constant 0 : index
    %1 = vector.load %arg2[%c0_1, %c0_2] : memref<128x512xf32, #tpu.memory_space<vmem>>, vector<128x512xf32>
    %c0_3 = arith.constant 0 : index
    %c0_4 = arith.constant 0 : index
    %2 = vector.load %arg3[%c0_3, %c0_4] : memref<1x512xf32, #tpu.memory_space<vmem>>, vector<1x512xf32>
    %cst = arith.constant dense<0.000000e+00> : vector<8x512xf32>
    %3 = tpu.matmul %0, %1, %cst {dimension_numbers = #tpu.dot_dimension_numbers<[1], [0], [0], [1], [0, 0, 1, 1], [], []>} : vector<8x128xf32>, vector<128x512xf32>, vector<8x512xf32> -> vector<8x512xf32>
    %4 = vector.broadcast %2 : vector<1x512xf32> to vector<8x512xf32>
    %5 = arith.addf %3, %4 : vector<8x512xf32>
    %cst_5 = arith.constant 0.000000e+00 : f32
    %6 = vector.broadcast %cst_5 : f32 to vector<8x512xf32>
    %7 = arith.cmpf oge, %5, %6 : vector<8x512xf32>
    %cst_6 = arith.constant 2.000000e-01 : f32
    %8 = vector.broadcast %cst_6 : f32 to vector<8x512xf32>
    %9 = arith.mulf %8, %5 : vector<8x512xf32>
    %10 = arith.select %7, %5, %9 : vector<8x512xi1>, vector<8x512xf32>
    %c0_7 = arith.constant 0 : index
    %c0_8 = arith.constant 0 : index
    %11 = vector.load %arg4[%c0_7, %c0_8] : memref<512x512xbf16, #tpu.memory_space<vmem>>, vector<512x512xbf16>
    %c0_9 = arith.constant 0 : index
    %c0_10 = arith.constant 0 : index
    %12 = vector.load %arg5[%c0_9, %c0_10] : memref<1x512xf32, #tpu.memory_space<vmem>>, vector<1x512xf32>
    %13 = arith.truncf %10 : vector<8x512xf32> to vector<8x512xbf16>
    %cst_11 = arith.constant dense<0.000000e+00> : vector<8x512xf32>
    %14 = tpu.matmul %13, %11, %cst_11 {dimension_numbers = #tpu.dot_dimension_numbers<[1], [0], [0], [1], [0, 0, 1, 1], [], []>} : vector<8x512xbf16>, vector<512x512xbf16>, vector<8x512xf32> -> vector<8x512xf32>
    %15 = vector.broadcast %12 : vector<1x512xf32> to vector<8x512xf32>
    %16 = arith.addf %14, %15 : vector<8x512xf32>
    %cst_12 = arith.constant 0.000000e+00 : f32
    %17 = vector.broadcast %cst_12 : f32 to vector<8x512xf32>
    %18 = arith.cmpf oge, %16, %17 : vector<8x512xf32>
    %cst_13 = arith.constant 2.000000e-01 : f32
    %19 = vector.broadcast %cst_13 : f32 to vector<8x512xf32>
    %20 = arith.mulf %19, %16 : vector<8x512xf32>
    %21 = arith.select %18, %16, %20 : vector<8x512xi1>, vector<8x512xf32>
    %c0_14 = arith.constant 0 : index
    %c0_15 = arith.constant 0 : index
    %22 = vector.load %arg6[%c0_14, %c0_15] : memref<512x512xbf16, #tpu.memory_space<vmem>>, vector<512x512xbf16>
    %c0_16 = arith.constant 0 : index
    %c0_17 = arith.constant 0 : index
    %23 = vector.load %arg7[%c0_16, %c0_17] : memref<1x512xf32, #tpu.memory_space<vmem>>, vector<1x512xf32>
    %24 = arith.truncf %21 : vector<8x512xf32> to vector<8x512xbf16>
    %cst_18 = arith.constant dense<0.000000e+00> : vector<8x512xf32>
    %25 = tpu.matmul %24, %22, %cst_18 {dimension_numbers = #tpu.dot_dimension_numbers<[1], [0], [0], [1], [0, 0, 1, 1], [], []>} : vector<8x512xbf16>, vector<512x512xbf16>, vector<8x512xf32> -> vector<8x512xf32>
    %26 = vector.broadcast %23 : vector<1x512xf32> to vector<8x512xf32>
    %27 = arith.addf %25, %26 : vector<8x512xf32>
    %cst_19 = arith.constant 0.000000e+00 : f32
    %28 = vector.broadcast %cst_19 : f32 to vector<8x512xf32>
    %29 = arith.cmpf oge, %27, %28 : vector<8x512xf32>
    %cst_20 = arith.constant 2.000000e-01 : f32
    %30 = vector.broadcast %cst_20 : f32 to vector<8x512xf32>
    %31 = arith.mulf %30, %27 : vector<8x512xf32>
    %32 = arith.select %29, %27, %31 : vector<8x512xi1>, vector<8x512xf32>
    %c0_21 = arith.constant 0 : index
    %c0_22 = arith.constant 0 : index
    %33 = vector.load %arg8[%c0_21, %c0_22] : memref<512x512xbf16, #tpu.memory_space<vmem>>, vector<512x512xbf16>
    %c0_23 = arith.constant 0 : index
    %c0_24 = arith.constant 0 : index
    %34 = vector.load %arg9[%c0_23, %c0_24] : memref<1x512xf32, #tpu.memory_space<vmem>>, vector<1x512xf32>
    %35 = arith.truncf %32 : vector<8x512xf32> to vector<8x512xbf16>
    %cst_25 = arith.constant dense<0.000000e+00> : vector<8x512xf32>
    %36 = tpu.matmul %35, %33, %cst_25 {dimension_numbers = #tpu.dot_dimension_numbers<[1], [0], [0], [1], [0, 0, 1, 1], [], []>} : vector<8x512xbf16>, vector<512x512xbf16>, vector<8x512xf32> -> vector<8x512xf32>
    %37 = vector.broadcast %34 : vector<1x512xf32> to vector<8x512xf32>
    %38 = arith.addf %36, %37 : vector<8x512xf32>
    %cst_26 = arith.constant 0.000000e+00 : f32
    %39 = vector.broadcast %cst_26 : f32 to vector<8x512xf32>
    %40 = arith.cmpf oge, %38, %39 : vector<8x512xf32>
    %cst_27 = arith.constant 2.000000e-01 : f32
    %41 = vector.broadcast %cst_27 : f32 to vector<8x512xf32>
    %42 = arith.mulf %41, %38 : vector<8x512xf32>
    %43 = arith.select %40, %38, %42 : vector<8x512xi1>, vector<8x512xf32>
    %c0_28 = arith.constant 0 : index
    %c0_29 = arith.constant 0 : index
    %44 = vector.load %arg10[%c0_28, %c0_29] : memref<512x32xbf16, #tpu.memory_space<vmem>>, vector<512x32xbf16>
    %c0_30 = arith.constant 0 : index
    %c0_31 = arith.constant 0 : index
    %45 = vector.load %arg11[%c0_30, %c0_31] : memref<1x32xf32, #tpu.memory_space<vmem>>, vector<1x32xf32>
    %46 = arith.truncf %43 : vector<8x512xf32> to vector<8x512xbf16>
    %cst_32 = arith.constant dense<0.000000e+00> : vector<8x32xf32>
    %47 = tpu.matmul %46, %44, %cst_32 {dimension_numbers = #tpu.dot_dimension_numbers<[1], [0], [0], [1], [0, 0, 1, 1], [], []>} : vector<8x512xbf16>, vector<512x32xbf16>, vector<8x32xf32> -> vector<8x32xf32>
    %48 = vector.broadcast %45 : vector<1x32xf32> to vector<8x32xf32>
    %49 = arith.addf %47, %48 : vector<8x32xf32>
    %50 = arith.negf %49 : vector<8x32xf32>
    %51 = math.exp %50 : vector<8x32xf32>
    %cst_33 = arith.constant 1.000000e+00 : f32
    %52 = vector.broadcast %cst_33 : f32 to vector<8x32xf32>
    %53 = arith.addf %52, %51 : vector<8x32xf32>
    %54 = arith.divf %52, %53 : vector<8x32xf32>
    %c0_34 = arith.constant 0 : index
    %c0_35 = arith.constant 0 : index
    %55 = vector.load %arg12[%c0_34, %c0_35] : memref<32x128xbf16, #tpu.memory_space<vmem>>, vector<32x128xbf16>
    %c0_36 = arith.constant 0 : index
    %c0_37 = arith.constant 0 : index
    %56 = vector.load %arg13[%c0_36, %c0_37] : memref<1x128xf32, #tpu.memory_space<vmem>>, vector<1x128xf32>
    %57 = arith.truncf %54 : vector<8x32xf32> to vector<8x32xbf16>
    %cst_38 = arith.constant dense<0.000000e+00> : vector<8x128xf32>
    %58 = tpu.matmul %57, %55, %cst_38 {dimension_numbers = #tpu.dot_dimension_numbers<[1], [0], [0], [1], [0, 0, 1, 1], [], []>} : vector<8x32xbf16>, vector<32x128xbf16>, vector<8x128xf32> -> vector<8x128xf32>
    %59 = vector.broadcast %56 : vector<1x128xf32> to vector<8x128xf32>
    %60 = arith.addf %58, %59 : vector<8x128xf32>
    %cst_39 = arith.constant 0.000000e+00 : f32
    %61 = vector.broadcast %cst_39 : f32 to vector<8x128xf32>
    %62 = arith.cmpf oge, %60, %61 : vector<8x128xf32>
    %cst_40 = arith.constant 2.000000e-01 : f32
    %63 = vector.broadcast %cst_40 : f32 to vector<8x128xf32>
    %64 = arith.mulf %63, %60 : vector<8x128xf32>
    %65 = arith.select %62, %60, %64 : vector<8x128xi1>, vector<8x128xf32>
    %c0_41 = arith.constant 0 : index
    %c0_42 = arith.constant 0 : index
    %66 = vector.load %arg14[%c0_41, %c0_42] : memref<128x128xbf16, #tpu.memory_space<vmem>>, vector<128x128xbf16>
    %c0_43 = arith.constant 0 : index
    %c0_44 = arith.constant 0 : index
    %67 = vector.load %arg15[%c0_43, %c0_44] : memref<1x128xf32, #tpu.memory_space<vmem>>, vector<1x128xf32>
    %68 = arith.truncf %65 : vector<8x128xf32> to vector<8x128xbf16>
    %cst_45 = arith.constant dense<0.000000e+00> : vector<8x128xf32>
    %69 = tpu.matmul %68, %66, %cst_45 {dimension_numbers = #tpu.dot_dimension_numbers<[1], [0], [0], [1], [0, 0, 1, 1], [], []>} : vector<8x128xbf16>, vector<128x128xbf16>, vector<8x128xf32> -> vector<8x128xf32>
    %70 = vector.broadcast %67 : vector<1x128xf32> to vector<8x128xf32>
    %71 = arith.addf %69, %70 : vector<8x128xf32>
    %cst_46 = arith.constant 0.000000e+00 : f32
    %72 = vector.broadcast %cst_46 : f32 to vector<8x128xf32>
    %73 = arith.cmpf oge, %71, %72 : vector<8x128xf32>
    %cst_47 = arith.constant 2.000000e-01 : f32
    %74 = vector.broadcast %cst_47 : f32 to vector<8x128xf32>
    %75 = arith.mulf %74, %71 : vector<8x128xf32>
    %76 = arith.select %73, %71, %75 : vector<8x128xi1>, vector<8x128xf32>
    %c0_48 = arith.constant 0 : index
    %c0_49 = arith.constant 0 : index
    %77 = vector.load %arg16[%c0_48, %c0_49] : memref<128x96xbf16, #tpu.memory_space<vmem>>, vector<128x96xbf16>
    %c0_50 = arith.constant 0 : index
    %c0_51 = arith.constant 0 : index
    %78 = vector.load %arg17[%c0_50, %c0_51] : memref<1x96xf32, #tpu.memory_space<vmem>>, vector<1x96xf32>
    %79 = arith.truncf %76 : vector<8x128xf32> to vector<8x128xbf16>
    %cst_52 = arith.constant dense<0.000000e+00> : vector<8x96xf32>
    %80 = tpu.matmul %79, %77, %cst_52 {dimension_numbers = #tpu.dot_dimension_numbers<[1], [0], [0], [1], [0, 0, 1, 1], [], []>} : vector<8x128xbf16>, vector<128x96xbf16>, vector<8x96xf32> -> vector<8x96xf32>
    %81 = vector.broadcast %78 : vector<1x96xf32> to vector<8x96xf32>
    %82 = arith.addf %80, %81 : vector<8x96xf32>
    %83 = arith.negf %82 : vector<8x96xf32>
    %84 = math.exp %83 : vector<8x96xf32>
    %cst_53 = arith.constant 1.000000e+00 : f32
    %85 = vector.broadcast %cst_53 : f32 to vector<8x96xf32>
    %86 = arith.addf %85, %84 : vector<8x96xf32>
    %87 = arith.divf %85, %86 : vector<8x96xf32>
    %88 = tpu.concatenate %49, %87 in 1 : vector<8x32xf32>, vector<8x96xf32> -> vector<8x128xf32>
    %c0_54 = arith.constant 0 : index
    %c0_55 = arith.constant 0 : index
    %89 = vector.load %arg18[%c0_54, %c0_55] : memref<8x128xf32, #tpu.memory_space<vmem>>, vector<8x128xf32>
    tpu.vector_store %arg18[%c0_54, %c0_55], %88 {strides = array<i32>} : memref<8x128xf32, #tpu.memory_space<vmem>>, vector<8x128xf32>,
    return
  }
  func.func @transform_0(%arg0: i32) -> (i32, i32) {
    %c0_i32 = arith.constant 0 : i32
    %c0_i32_0 = arith.constant 0 : i32
    return %arg0, %c0_i32 : i32, i32
  }
  func.func @transform_1(%arg0: i32) -> (i32, i32) {
    %c0_i32 = arith.constant 0 : i32
    %c0_i32_0 = arith.constant 0 : i32
    %c0_i32_1 = arith.constant 0 : i32
    return %c0_i32, %c0_i32_0 : i32, i32
  }
  func.func @transform_2(%arg0: i32) -> (i32, i32) {
    %c0_i32 = arith.constant 0 : i32
    %c0_i32_0 = arith.constant 0 : i32
    %c0_i32_1 = arith.constant 0 : i32
    return %c0_i32, %c0_i32_0 : i32, i32
  }
  func.func @transform_3(%arg0: i32) -> (i32, i32) {
    %c0_i32 = arith.constant 0 : i32
    %c0_i32_0 = arith.constant 0 : i32
    %c0_i32_1 = arith.constant 0 : i32
    return %c0_i32, %c0_i32_0 : i32, i32
  }
  func.func @transform_4(%arg0: i32) -> (i32, i32) {
    %c0_i32 = arith.constant 0 : i32
    %c0_i32_0 = arith.constant 0 : i32
    %c0_i32_1 = arith.constant 0 : i32
    return %c0_i32, %c0_i32_0 : i32, i32
  }
  func.func @transform_5(%arg0: i32) -> (i32, i32) {
    %c0_i32 = arith.constant 0 : i32
    %c0_i32_0 = arith.constant 0 : i32
    %c0_i32_1 = arith.constant 0 : i32
    return %c0_i32, %c0_i32_0 : i32, i32
  }
  func.func @transform_6(%arg0: i32) -> (i32, i32) {
    %c0_i32 = arith.constant 0 : i32
    %c0_i32_0 = arith.constant 0 : i32
    %c0_i32_1 = arith.constant 0 : i32
    return %c0_i32, %c0_i32_0 : i32, i32
  }
  func.func @transform_7(%arg0: i32) -> (i32, i32) {
    %c0_i32 = arith.constant 0 : i32
    %c0_i32_0 = arith.constant 0 : i32
    %c0_i32_1 = arith.constant 0 : i32
    return %c0_i32, %c0_i32_0 : i32, i32
  }
  func.func @transform_8(%arg0: i32) -> (i32, i32) {
    %c0_i32 = arith.constant 0 : i32
    %c0_i32_0 = arith.constant 0 : i32
    %c0_i32_1 = arith.constant 0 : i32
    return %c0_i32, %c0_i32_0 : i32, i32
  }
  func.func @transform_9(%arg0: i32) -> (i32, i32) {
    %c0_i32 = arith.constant 0 : i32
    %c0_i32_0 = arith.constant 0 : i32
    %c0_i32_1 = arith.constant 0 : i32
    return %c0_i32, %c0_i32_0 : i32, i32
  }
  func.func @transform_10(%arg0: i32) -> (i32, i32) {
    %c0_i32 = arith.constant 0 : i32
    %c0_i32_0 = arith.constant 0 : i32
    %c0_i32_1 = arith.constant 0 : i32
    return %c0_i32, %c0_i32_0 : i32, i32
  }
  func.func @transform_11(%arg0: i32) -> (i32, i32) {
    %c0_i32 = arith.constant 0 : i32
    %c0_i32_0 = arith.constant 0 : i32
    %c0_i32_1 = arith.constant 0 : i32
    return %c0_i32, %c0_i32_0 : i32, i32
  }
  func.func @transform_12(%arg0: i32) -> (i32, i32) {
    %c0_i32 = arith.constant 0 : i32
    %c0_i32_0 = arith.constant 0 : i32
    %c0_i32_1 = arith.constant 0 : i32
    return %c0_i32, %c0_i32_0 : i32, i32
  }
  func.func @transform_13(%arg0: i32) -> (i32, i32) {
    %c0_i32 = arith.constant 0 : i32
    %c0_i32_0 = arith.constant 0 : i32
    %c0_i32_1 = arith.constant 0 : i32
    return %c0_i32, %c0_i32_0 : i32, i32
  }
  func.func @transform_14(%arg0: i32) -> (i32, i32) {
    %c0_i32 = arith.constant 0 : i32
    %c0_i32_0 = arith.constant 0 : i32
    %c0_i32_1 = arith.constant 0 : i32
    return %c0_i32, %c0_i32_0 : i32, i32
  }
  func.func @transform_15(%arg0: i32) -> (i32, i32) {
    %c0_i32 = arith.constant 0 : i32
    %c0_i32_0 = arith.constant 0 : i32
    %c0_i32_1 = arith.constant 0 : i32
    return %c0_i32, %c0_i32_0 : i32, i32
  }
  func.func @transform_16(%arg0: i32) -> (i32, i32) {
    %c0_i32 = arith.constant 0 : i32
    %c0_i32_0 = arith.constant 0 : i32
    %c0_i32_1 = arith.constant 0 : i32
    return %c0_i32, %c0_i32_0 : i32, i32
  }
  func.func @transform_17(%arg0: i32) -> (i32, i32) {
    %c0_i32 = arith.constant 0 : i32
    %c0_i32_0 = arith.constant 0 : i32
    return %arg0, %c0_i32 : i32, i32
  }
}

</mosaic_0001>

<bundles_post_ra>
// kernel: tpu_custom_call.1
= control target key start
LH: loop header
LB: loop body
LE: loop exit
PB: predicated region body
PF: predicated region fallthrough
CT: control target
= control target key end

     0   :  { %s5806_s0 = inlined_call_operand.vmem [shape: f32[8,128], index: 0, kind: input, shape index: {}]   ;;  %s5807_s1 = inlined_call_operand.hbm [shape: f32[128,512], index: 1, kind: input, shape index: {}]   ;;  %s5808_s2 = inlined_call_operand.vmem [shape: f32[1,512], index: 2, kind: input, shape index: {}]   ;;  %s5809_s3 = inlined_call_operand.hbm [shape: bf16[512,512], index: 3, kind: input, shape index: {}]   ;;  %s5810_s4 = inlined_call_operand.vmem [shape: f32[1,512], index: 4, kind: input, shape index: {}]   ;;  %s5811_s5 = inlined_call_operand.hbm [shape: bf16[512,512], index: 5, kind: input, shape index: {}]   ;;  %s5812_s6 = inlined_call_operand.vmem [shape: f32[1,512], index: 6, kind: input, shape index: {}]   ;;  %s5813_s7 = inlined_call_operand.hbm [shape: bf16[512,512], index: 7, kind: input, shape index: {}]   ;;  %s5814_s8 = inlined_call_operand.vmem [shape: f32[1,512], index: 8, kind: input, shape index: {}]   ;;  %s5815_s9 = inlined_call_operand.vmem [shape: bf16[512,32], index: 9, kind: input, shape index: {}]   ;;  %s5816_s10 = inlined_call_operand.vmem [shape: f32[1,32], index: 10, kind: input, shape index: {}]   ;;  %s5817_s11 = inlined_call_operand.vmem [shape: bf16[32,128], index: 11, kind: input, shape index: {}]   ;;  %s5818_s12 = inlined_call_operand.vmem [shape: f32[1,128], index: 12, kind: input, shape index: {}]   ;;  %s5819_s13 = inlined_call_operand.vmem [shape: bf16[128,128], index: 13, kind: input, shape index: {}]   ;;  %s5820_s14 = inlined_call_operand.vmem [shape: f32[1,128], index: 14, kind: input, shape index: {}]   ;;  %s5821_s15 = inlined_call_operand.vmem [shape: bf16[128,96], index: 15, kind: input, shape index: {}]   ;;  %s5822_s16 = inlined_call_operand.vmem [shape: f32[1,96], index: 16, kind: input, shape index: {}]   ;;  %s5823_s17 = inlined_call_operand.hbm [shape: f32[8,128], index: 17, kind: output, shape index: {}]  }
   0x1   :  { %5830 = sst [smem:[#allocation15_spill]] %s5806_s0 }
   0x2   :  { %5831 = sst [smem:[#allocation16_spill]] %s5807_s1 }
   0x3   :  { %5832 = sst [smem:[#allocation17_spill]] %s5823_s17 }
   0x4   :  { %22 = vsyncpa [#allocation3], 0 }
   0x5   :  { %23 = vsyncpa [#allocation6], 0 }
   0x6   :  { %24 = vsyncpa [#allocation9], 0 }
   0x7   :  { %25 = vsyncpa [#allocation4], 0  ;;  %s5361_s24 = smov [#allocation5]   ;;  %s5243_s28 = scalar_lea.hbm %s5809_s3, 16384 }
   0x8   :  { %s47_s25 = sshll.u32 %s5361_s24, 4  ;;  %p5244_p0 = scmp.ne.s32.totalorder %s5809_s3, %s5243_s28  ;;  %s48_s25 = int_to_ptr.vmem [resolvable:$true] %s47_s25 }
   0x9   :  { %p5247_p1 = scmp.lt.u32.totalorder %s5243_s28, %s5809_s3 }
   0xb   :  { %p5249_p2 = pnand %p5247_p1, %p5244_p0 }
   0xd   :  { %5252 = shalt.err (!%p5249_p2)
}
   0xe   :  { %s5253_s19 = scalar_lea.vmem %s48_s25, 16384  ;;  %p5258_p4 = scmp.lt.s32.totalorder %s48_s25, %s48_s25 }
   0xf   :  { %p5254_p3 = scmp.ne.s32.totalorder %s48_s25, %s5253_s19  ;;  %p5259_p5 = scmp.lt.s32.totalorder %s5253_s19, %s5253_s19 }
  0x11   :  { %p5260_p6 = por %p5259_p5, %p5258_p4 }
  0x13   :  { %p5261_p7 = pnand %p5260_p6, %p5254_p3 }
  0x15   :  { %5264 = shalt.err (!%p5261_p7)
}
  0x16   :  { %s5826_s1 = smov 256   ;;  %s5828_s20 = smov 16  }
  0x17   :  { %53 = dma.hbm_to_vmem [thread:$0]  %s5809_s3, 16384, %s48_s25, [#allocation6], %s5826_s1, %s5826_s1, %s5828_s20  }
  0x18   :  { %s5364_s23 = smov [#allocation2]   ;;  %s5833_s28 = sld [smem:[#allocation16_spill]] }
  0x19   :  { %s33_s24 = sshll.u32 %s5364_s23, 4  ;;  %s34_s24 = int_to_ptr.vmem [resolvable:$true] %s33_s24 }
  0x1e   :  { %s5265_s29 = scalar_lea.hbm %s5833_s28, 8192 }
  0x1f   :  { %p5266_p8 = scmp.ne.s32.totalorder %s5833_s28, %s5265_s29  ;;  %p5269_p9 = scmp.lt.u32.totalorder %s5265_s29, %s5833_s28 }
  0x21   :  { %p5271_p10 = pnand %p5269_p9, %p5266_p8 }
  0x23   :  { %5274 = shalt.err (!%p5271_p10)
}
  0x24   :  { %s5275_s17 = scalar_lea.vmem %s34_s24, 8192  ;;  %p5280_p12 = scmp.lt.s32.totalorder %s34_s24, %s34_s24 }
  0x25   :  { %p5276_p11 = scmp.ne.s32.totalorder %s34_s24, %s5275_s17  ;;  %p5281_p13 = scmp.lt.s32.totalorder %s5275_s17, %s5275_s17 }
  0x27   :  { %p5282_p0 = por %p5281_p13, %p5280_p12 }
  0x29   :  { %p5283_p1 = pnand %p5282_p0, %p5276_p11 }
  0x2b   :  { %5286 = shalt.err (!%p5283_p1)
}
  0x2c   :  { %s5365_s3 = smov 512   ;;  %s5366_s25 = smov 32  }
  0x2d   :  { %39 = dma.hbm_to_vmem [thread:$0]  %s5833_s28, 8192, %s34_s24, [#allocation3], %s5365_s3, %s5365_s3, %s5366_s25  }
  0x2e   :  { %s5367_s23 = smov [#allocation7]   ;;  %s5368_s27 = smov [#allocation8]  }
  0x2f   :  { %s61_s26 = sshll.u32 %s5367_s23, 4  ;;  %s75_s29 = sshll.u32 %s5368_s27, 4  ;;  %s62_s26 = int_to_ptr.vmem [resolvable:$true] %s61_s26  ;;  %s5490_s29 = int_to_ptr.vmem [resolvable:$true] %s75_s29 }
  0x30   :  { %s5287_s17 = scalar_lea.hbm %s5811_s5, 16384 }
  0x31   :  { %p5288_p2 = scmp.ne.s32.totalorder %s5811_s5, %s5287_s17  ;;  %p5291_p3 = scmp.lt.u32.totalorder %s5287_s17, %s5811_s5 }
  0x33   :  { %p5293_p4 = pnand %p5291_p3, %p5288_p2 }
  0x35   :  { %5296 = shalt.err (!%p5293_p4)
}
  0x36   :  { %s5297_s24 = scalar_lea.vmem %s62_s26, 16384  ;;  %p5302_p6 = scmp.lt.s32.totalorder %s62_s26, %s62_s26 }
  0x37   :  { %p5298_p5 = scmp.ne.s32.totalorder %s62_s26, %s5297_s24  ;;  %p5303_p7 = scmp.lt.s32.totalorder %s5297_s24, %s5297_s24 }
  0x39   :  { %p5304_p8 = por %p5303_p7, %p5302_p6 }
  0x3b   :  { %p5305_p9 = pnand %p5304_p8, %p5298_p5 }
  0x3d   :  { %5308 = shalt.err (!%p5305_p9)
}
  0x3e   :  { %s5834_s28 = smov 16   ;;  %s5835_s3 = smov 256  }
  0x3f   :  { %67 = dma.hbm_to_vmem [thread:$0]  %s5811_s5, 16384, %s62_s26, [#allocation6], %s5835_s3, %s5835_s3, %s5834_s28  }
  0x40   :  { %s5309_s1 = scalar_lea.hbm %s5813_s7, 16384 }
  0x41   :  { %p5310_p10 = scmp.ne.s32.totalorder %s5813_s7, %s5309_s1  ;;  %p5313_p11 = scmp.lt.u32.totalorder %s5309_s1, %s5813_s7 }
  0x43   :  { %p5315_p12 = pnand %p5313_p11, %p5310_p10 }
  0x45   :  { %5318 = shalt.err (!%p5315_p12)
}
  0x46   :  { %s5319_s18 = scalar_lea.vmem %s5490_s29, 16384  ;;  %p5324_p0 = scmp.lt.s32.totalorder %s5490_s29, %s5490_s29 }
  0x47   :  { %p5320_p13 = scmp.ne.s32.totalorder %s5490_s29, %s5319_s18  ;;  %p5325_p1 = scmp.lt.s32.totalorder %s5319_s18, %s5319_s18 }
  0x49   :  { %p5326_p2 = por %p5325_p1, %p5324_p0 }
  0x4b   :  { %p5327_p3 = pnand %p5326_p2, %p5320_p13 }
  0x4d   :  { %5330 = shalt.err (!%p5327_p3)
}
  0x4e   :  { %81 = dma.hbm_to_vmem [thread:$0]  %s5813_s7, 16384, %s5490_s29, [#allocation9], %s5835_s3, %s5835_s3, %s5834_s28  }
  0x4f   :  { %5353 = dma.done.wait [#allocation3], 8192  }
  0x50   :  { %5354 = vsyncadd [#allocation3], 4294959104 }
  0x51   :  { %5355 = dma.done.wait [#allocation6], 32768  }
  0x52   :  { %5356 = vsyncadd [#allocation6], 4294934528 }
  0x53   :  { %5357 = dma.done.wait [#allocation9], 16384  }
  0x54   :  { %5358 = vsyncadd [#allocation9], 4294950912  ;;  %v5369_v0 = vmov 0.0   ;;  %v115_v1 = vld [vmem:[#allocation2 + $0x8] sm:$0xff]  ;;  %v114_v3 = vld [vmem:[#allocation2] sm:$0xff]  ;;  %s5836_s19 = sld [smem:[#allocation15_spill]] }
  0x55   :  { %264 = vmatprep.mubr.f32.mxu0 %v5369_v0  ;;  %335 = vmatprep.mubr.f32.mxu1 %v5369_v0  ;;  %v119_v2 = vld [vmem:[#allocation2 + $0x28] sm:$0xff]  ;;  %v118_v5 = vld [vmem:[#allocation2 + $0x20] sm:$0xff]  ;;  %v117_v28 = vld [vmem:[#allocation2 + $0x18] sm:$0xff] }
  0x56   :  { %v4498_v4 = vpack.c.bf16 %v119_v2, %v115_v1  ;;  %v123_v6 = vld [vmem:[#allocation2 + $0x48] sm:$0xff]  ;;  %v4500_v8 = vpack.c.bf16 %v118_v5, %v114_v3  ;;  %v122_v10 = vld [vmem:[#allocation2 + $0x40] sm:$0xff]  ;;  %v121_v29 = vld [vmem:[#allocation2 + $0x38] sm:$0xff] }
  0x57   :  { %v127_v7 = vld [vmem:[#allocation2 + $0x68] sm:$0xff]  ;;  %v126_v11 = vld [vmem:[#allocation2 + $0x60] sm:$0xff]  ;;  %v116_v30 = vld [vmem:[#allocation2 + $0x10] sm:$0xff]  ;;  %v4530_v32 = vpack.c.bf16 %v121_v29, %v117_v28 }
  0x58   :  { %v4502_v9 = vpack.c.bf16 %v127_v7, %v123_v6  ;;  %v131_v12 = vld [vmem:[#allocation2 + $0x88] sm:$0xff]  ;;  %4499 = vmatprep.subr.bf16.mxu0 %v4498_v4  ;;  %v4504_v14 = vpack.c.bf16 %v126_v11, %v122_v10  ;;  %v130_v16 = vld [vmem:[#allocation2 + $0x80] sm:$0xff]  ;;  %v120_v33 = vld [vmem:[#allocation2 + $0x30] sm:$0xff] }
  0x59   :  { %v135_v13 = vld [vmem:[#allocation2 + $0xa8] sm:$0xff]  ;;  %4501 = vmatpush1.bf16.msra.mxu0 %v4500_v8  ;;  %v134_v17 = vld [vmem:[#allocation2 + $0xa0] sm:$0xff]  ;;  %v125_v34 = vld [vmem:[#allocation2 + $0x58] sm:$0xff]  ;;  %v4532_v37 = vpack.c.bf16 %v120_v33, %v116_v30  ;;  %4531 = vmatprep.subr.bf16.mxu1 %v4530_v32 }
  0x5a   :  { %4503 = vmatprep.subr.bf16.mxu0 %v4502_v9  ;;  %v4506_v15 = vpack.c.bf16 %v135_v13, %v131_v12  ;;  %v139_v18 = vld [vmem:[#allocation2 + $0xc8] sm:$0xff]  ;;  %v4508_v20 = vpack.c.bf16 %v134_v17, %v130_v16  ;;  %v138_v22 = vld [vmem:[#allocation2 + $0xc0] sm:$0xff]  ;;  %v129_v35 = vld [vmem:[#allocation2 + $0x78] sm:$0xff] }
  0x5b   :  { %v143_v19 = vld [vmem:[#allocation2 + $0xe8] sm:$0xff]  ;;  %v142_v23 = vld [vmem:[#allocation2 + $0xe0] sm:$0xff]  ;;  %v4534_v38 = vpack.c.bf16 %v129_v35, %v125_v34  ;;  %v124_v39 = vld [vmem:[#allocation2 + $0x50] sm:$0xff]  ;;  %4533 = vmatpush1.bf16.msra.mxu1 %v4532_v37 }
  0x5c   :  { %v4510_v21 = vpack.c.bf16 %v143_v19, %v139_v18  ;;  %v147_v24 = vld [vmem:[#allocation2 + $0x108] sm:$0xff]  ;;  %v146_v26 = vld [vmem:[#allocation2 + $0x100] sm:$0xff]  ;;  %v4512_v31 = vpack.c.bf16 %v142_v23, %v138_v22  ;;  %v128_v40 = vld [vmem:[#allocation2 + $0x70] sm:$0xff] }
  0x5d   :  { %4505 = vmatpush1.bf16.msra.mxu0 %v4504_v14  ;;  %v151_v25 = vld [vmem:[#allocation2 + $0x128] sm:$0xff]  ;;  %v150_v27 = vld [vmem:[#allocation2 + $0x120] sm:$0xff]  ;;  %v133_v41 = vld [vmem:[#allocation2 + $0x98] sm:$0xff]  ;;  %v4536_v45 = vpack.c.bf16 %v128_v40, %v124_v39  ;;  %4535 = vmatprep.subr.bf16.mxu1 %v4534_v38 }
  0x5e   :  { %4507 = vmatprep.subr.bf16.mxu0 %v4506_v15  ;;  %v4514_v36 = vpack.c.bf16 %v151_v25, %v147_v24  ;;  %v155_v42 = vld [vmem:[#allocation2 + $0x148] sm:$0xff]  ;;  %v137_v44 = vld [vmem:[#allocation2 + $0xb8] sm:$0xff]  ;;  %v4516_v46 = vpack.c.bf16 %v150_v27, %v146_v26  ;;  %v154_v47 = vld [vmem:[#allocation2 + $0x140] sm:$0xff] }
  0x5f   :  { %v159_v43 = vld [vmem:[#allocation2 + $0x168] sm:$0xff]  ;;  %v4538_v48 = vpack.c.bf16 %v137_v44, %v133_v41  ;;  %v132_v49 = vld [vmem:[#allocation2 + $0x90] sm:$0xff]  ;;  %v158_v52 = vld [vmem:[#allocation2 + $0x160] sm:$0xff]  ;;  %4537 = vmatpush1.bf16.msra.mxu1 %v4536_v45 }
  0x60   :  { %v136_v50 = vld [vmem:[#allocation2 + $0xb0] sm:$0xff]  ;;  %v4518_v51 = vpack.c.bf16 %v159_v43, %v155_v42  ;;  %v141_v53 = vld [vmem:[#allocation2 + $0xd8] sm:$0xff]  ;;  %v163_v55 = vld [vmem:[#allocation2 + $0x188] sm:$0xff]  ;;  %v4520_v59 = vpack.c.bf16 %v158_v52, %v154_v47 }
  0x61   :  { %4509 = vmatpush1.bf16.msra.mxu0 %v4508_v20  ;;  %v145_v54 = vld [vmem:[#allocation2 + $0xf8] sm:$0xff]  ;;  %v167_v56 = vld [vmem:[#allocation2 + $0x1a8] sm:$0xff]  ;;  %v162_v57 = vld [vmem:[#allocation2 + $0x180] sm:$0xff]  ;;  %v4540_v58 = vpack.c.bf16 %v136_v50, %v132_v49  ;;  %4539 = vmatprep.subr.bf16.mxu1 %v4538_v48 }
  0x62   :  { %4511 = vmatprep.subr.bf16.mxu0 %v4510_v21  ;;  %v166_v60 = vld [vmem:[#allocation2 + $0x1a0] sm:$0xff]  ;;  %v4542_v61 = vpack.c.bf16 %v145_v54, %v141_v53  ;;  %v140_v62 = vld [vmem:[#allocation2 + $0xd0] sm:$0xff]  ;;  %v4522_v1 = vpack.c.bf16 %v167_v56, %v163_v55  ;;  %v149_v2 = vld [vmem:[#allocation2 + $0x118] sm:$0xff] }
  0x63   :  { %v144_v63 = vld [vmem:[#allocation2 + $0xf0] sm:$0xff]  ;;  %v153_v3 = vld [vmem:[#allocation2 + $0x138] sm:$0xff]  ;;  %v171_v4 = vld [vmem:[#allocation2 + $0x1c8] sm:$0xff]  ;;  %4541 = vmatpush1.bf16.msra.mxu1 %v4540_v58  ;;  %v4524_v10 = vpack.c.bf16 %v166_v60, %v162_v57 }
  0x64   :  { %v175_v5 = vld [vmem:[#allocation2 + $0x1e8] sm:$0xff]  ;;  %v170_v6 = vld [vmem:[#allocation2 + $0x1c0] sm:$0xff]  ;;  %v4544_v8 = vpack.c.bf16 %v144_v63, %v140_v62  ;;  %v148_v9 = vld [vmem:[#allocation2 + $0x110] sm:$0xff]  ;;  %4543 = vmatprep.subr.bf16.mxu1 %v4542_v61  ;;  %v4546_v11 = vpack.c.bf16 %v153_v3, %v149_v2 }
  0x65   :  { %4513 = vmatpush1.bf16.msra.mxu0 %v4512_v31  ;;  %v174_v7 = vld [vmem:[#allocation2 + $0x1e0] sm:$0xff]  ;;  %v152_v12 = vld [vmem:[#allocation2 + $0x130] sm:$0xff]  ;;  %v4526_v13 = vpack.c.bf16 %v175_v5, %v171_v4  ;;  %v157_v14 = vld [vmem:[#allocation2 + $0x158] sm:$0xff] }
  0x66   :  { %4515 = vmatprep.subr.bf16.mxu0 %v4514_v36  ;;  %v161_v15 = vld [vmem:[#allocation2 + $0x178] sm:$0xff]  ;;  %v156_v16 = vld [vmem:[#allocation2 + $0x150] sm:$0xff]  ;;  %v4548_v17 = vpack.c.bf16 %v152_v12, %v148_v9  ;;  %v4528_v19 = vpack.c.bf16 %v174_v7, %v170_v6  ;;  %v113_v24 = vld [vmem:[%s5836_s19] sm:$0xff] }
  0x67   :  { %4545 = vmatpush1.bf16.msra.mxu1 %v4544_v8  ;;  %v160_v18 = vld [vmem:[#allocation2 + $0x170] sm:$0xff]  ;;  %v4550_v20 = vpack.c.bf16 %v161_v15, %v157_v14  ;;  %v165_v21 = vld [vmem:[#allocation2 + $0x198] sm:$0xff] }
  0x68   :  { %4547 = vmatprep.subr.bf16.mxu1 %v4546_v11  ;;  %v169_v22 = vld [vmem:[#allocation2 + $0x1b8] sm:$0xff]  ;;  %v4611_v23 = vld [vmem:[#allocation5 + $0x4] ss:$16 sps:$4 sm:$0xff]   ;;  %v4552_v27 = vpack.c.bf16 %v160_v18, %v156_v16  ;;  %v4609_v30 = vld [vmem:[#allocation5] ss:$16 sps:$4 sm:$0xff]  }
  0x69   :  { %4517 = vmatpush1.bf16.msra.mxu0 %v4516_v46  ;;  %v164_v25 = vld [vmem:[#allocation2 + $0x190] sm:$0xff]  ;;  %v173_v28 = vld [vmem:[#allocation2 + $0x1d8] sm:$0xff]  ;;  %v4554_v29 = vpack.c.bf16 %v169_v22, %v165_v21 }
  0x6a   :  { %4519 = vmatprep.subr.bf16.mxu0 %v4518_v51  ;;  %v168_v26 = vld [vmem:[#allocation2 + $0x1b0] sm:$0xff]  ;;  %v177_v31 = vld [vmem:[#allocation2 + $0x1f8] sm:$0xff] }
  0x6b   :  { %4549 = vmatpush1.bf16.msra.mxu1 %v4548_v17  ;;  %v4617_v32 = vld [vmem:[#allocation5 + $0x24] ss:$16 sps:$4 sm:$0xff]   ;;  %v4556_v34 = vpack.c.bf16 %v168_v26, %v164_v25  ;;  %v4558_v36 = vpack.c.bf16 %v177_v31, %v173_v28  ;;  %v4615_v37 = vld [vmem:[#allocation5 + $0x20] ss:$16 sps:$4 sm:$0xff]   ;;  %v4614_v40 = vld [vmem:[#allocation5 + $0xc] ss:$16 sps:$4 sm:$0xff]  }
  0x6c   :  { %4551 = vmatprep.subr.bf16.mxu1 %v4550_v20  ;;  %v172_v33 = vld [vmem:[#allocation2 + $0x1d0] sm:$0xff]  ;;  %v4612_v43 = vld [vmem:[#allocation5 + $0x8] ss:$16 sps:$4 sm:$0xff]   ;;  %v4620_v44 = vld [vmem:[#allocation5 + $0x2c] ss:$16 sps:$4 sm:$0xff]  }
  0x6d   :  { %4521 = vmatpush1.bf16.msra.mxu0 %v4520_v59  ;;  %v176_v35 = vld [vmem:[#allocation2 + $0x1f0] sm:$0xff]  ;;  %v4618_v47 = vld [vmem:[#allocation5 + $0x28] ss:$16 sps:$4 sm:$0xff]   ;;  %v4626_v48 = vld [vmem:[#allocation5 + $0x4c] ss:$16 sps:$4 sm:$0xff]  }
  0x6e   :  { %4523 = vmatprep.subr.bf16.mxu0 %v4522_v1  ;;  %v4623_v38 = vld [vmem:[#allocation5 + $0x44] ss:$16 sps:$4 sm:$0xff]   ;;  %v4560_v39 = vpack.c.bf16 %v176_v35, %v172_v33  ;;  %v4621_v41 = vld [vmem:[#allocation5 + $0x40] ss:$16 sps:$4 sm:$0xff]   ;;  %v4624_v51 = vld [vmem:[#allocation5 + $0x48] ss:$16 sps:$4 sm:$0xff]  }
  0x6f   :  { %4553 = vmatpush1.bf16.msra.mxu1 %v4552_v27  ;;  %v4629_v42 = vld [vmem:[#allocation5 + $0x64] ss:$16 sps:$4 sm:$0xff]   ;;  %v4627_v45 = vld [vmem:[#allocation5 + $0x60] ss:$16 sps:$4 sm:$0xff]   ;;  %v4632_v52 = vld [vmem:[#allocation5 + $0x6c] ss:$16 sps:$4 sm:$0xff]  }
  0x70   :  { %4555 = vmatprep.subr.bf16.mxu1 %v4554_v29  ;;  %v4635_v46 = vld [vmem:[#allocation5 + $0x84] ss:$16 sps:$4 sm:$0xff]   ;;  %v4633_v49 = vld [vmem:[#allocation5 + $0x80] ss:$16 sps:$4 sm:$0xff]   ;;  %v4630_v55 = vld [vmem:[#allocation5 + $0x68] ss:$16 sps:$4 sm:$0xff]  }
  0x71   :  { %4525 = vmatpush1.bf16.msra.mxu0 %v4524_v10  ;;  %v4641_v50 = vld [vmem:[#allocation5 + $0xa4] ss:$16 sps:$4 sm:$0xff]   ;;  %v4639_v53 = vld [vmem:[#allocation5 + $0xa0] ss:$16 sps:$4 sm:$0xff]   ;;  %v4638_v56 = vld [vmem:[#allocation5 + $0x8c] ss:$16 sps:$4 sm:$0xff]  }
  0x72   :  { %4527 = vmatprep.subr.bf16.mxu0 %v4526_v13  ;;  %v4647_v54 = vld [vmem:[#allocation5 + $0xc4] ss:$16 sps:$4 sm:$0xff]   ;;  %v4645_v57 = vld [vmem:[#allocation5 + $0xc0] ss:$16 sps:$4 sm:$0xff]   ;;  %v4636_v58 = vld [vmem:[#allocation5 + $0x88] ss:$16 sps:$4 sm:$0xff]  }
  0x73   :  { %4557 = vmatpush1.bf16.msra.mxu1 %v4556_v34  ;;  %v4653_v59 = vld [vmem:[#allocation5 + $0xe4] ss:$16 sps:$4 sm:$0xff]   ;;  %v4644_v60 = vld [vmem:[#allocation5 + $0xac] ss:$16 sps:$4 sm:$0xff]   ;;  %v4651_v61 = vld [vmem:[#allocation5 + $0xe0] ss:$16 sps:$4 sm:$0xff]  }
  0x74   :  { %4559 = vmatprep.subr.bf16.mxu1 %v4558_v36  ;;  %v4659_v62 = vld [vmem:[#allocation5 + $0x104] ss:$16 sps:$4 sm:$0xff]   ;;  %v4642_v63 = vld [vmem:[#allocation5 + $0xa8] ss:$16 sps:$4 sm:$0xff]   ;;  %v4650_v1 = vld [vmem:[#allocation5 + $0xcc] ss:$16 sps:$4 sm:$0xff]  }
  0x75   :  { %4529 = vmatpush1.bf16.msra.mxu0 %v4528_v19  ;;  %v4657_v2 = vld [vmem:[#allocation5 + $0x100] ss:$16 sps:$4 sm:$0xff]   ;;  %v4665_v3 = vld [vmem:[#allocation5 + $0x124] ss:$16 sps:$4 sm:$0xff]   ;;  %v4648_v4 = vld [vmem:[#allocation5 + $0xc8] ss:$16 sps:$4 sm:$0xff]  }
  0x76   :  { %1148 = vmatprep.subr.bf16.mxu0 %v4611_v23  ;;  %v4656_v5 = vld [vmem:[#allocation5 + $0xec] ss:$16 sps:$4 sm:$0xff]   ;;  %v4663_v6 = vld [vmem:[#allocation5 + $0x120] ss:$16 sps:$4 sm:$0xff]   ;;  %v4671_v7 = vld [vmem:[#allocation5 + $0x144] ss:$16 sps:$4 sm:$0xff]  }
  0x77   :  { %4561 = vmatpush1.bf16.msra.mxu1 %v4560_v39  ;;  %v4654_v8 = vld [vmem:[#allocation5 + $0xe8] ss:$16 sps:$4 sm:$0xff]   ;;  %v4662_v9 = vld [vmem:[#allocation5 + $0x10c] ss:$16 sps:$4 sm:$0xff]   ;;  %v4669_v10 = vld [vmem:[#allocation5 + $0x140] ss:$16 sps:$4 sm:$0xff]  }
  0x78   :  { %265 = vmatmul.mubr.f32.vlgmr.msra.gmra.mrb[0].mxu0 %v113_v24  ;;  %1230 = vmatprep.subr.bf16.mxu1 %v4614_v40  ;;  %v4677_v11 = vld [vmem:[#allocation5 + $0x164] ss:$16 sps:$4 sm:$0xff]   ;;  %v4660_v12 = vld [vmem:[#allocation5 + $0x108] ss:$16 sps:$4 sm:$0xff]   ;;  %v4668_v13 = vld [vmem:[#allocation5 + $0x12c] ss:$16 sps:$4 sm:$0xff]  }
  0x79   :  { %1149 = vmatpush1.bf16.msra.mxu0 %v4609_v30  ;;  %v4675_v14 = vld [vmem:[#allocation5 + $0x160] ss:$16 sps:$4 sm:$0xff]   ;;  %v4683_v15 = vld [vmem:[#allocation5 + $0x184] ss:$16 sps:$4 sm:$0xff]   ;;  %v4666_v16 = vld [vmem:[#allocation5 + $0x128] ss:$16 sps:$4 sm:$0xff]  }
  0x7a   :  { %1150 = vmatprep.subr.bf16.mxu0 %v4617_v32  ;;  %336 = vmatmul.mubr.f32.vlgmr.msra.gmra.mrb[0].mxu1 %v113_v24  ;;  %v4674_v17 = vld [vmem:[#allocation5 + $0x14c] ss:$16 sps:$4 sm:$0xff]   ;;  %v4681_v18 = vld [vmem:[#allocation5 + $0x180] ss:$16 sps:$4 sm:$0xff]   ;;  %v4689_v19 = vld [vmem:[#allocation5 + $0x1a4] ss:$16 sps:$4 sm:$0xff]  }
  0x7b   :  { %1231 = vmatpush1.bf16.msra.mxu1 %v4612_v43  ;;  %v4672_v20 = vld [vmem:[#allocation5 + $0x148] ss:$16 sps:$4 sm:$0xff]   ;;  %v4680_v21 = vld [vmem:[#allocation5 + $0x16c] ss:$16 sps:$4 sm:$0xff]   ;;  %v4687_v22 = vld [vmem:[#allocation5 + $0x1a0] ss:$16 sps:$4 sm:$0xff]  }
  0x7c   :  { %1232 = vmatprep.subr.bf16.mxu1 %v4620_v44  ;;  %v4678_v23 = vld [vmem:[#allocation5 + $0x168] ss:$16 sps:$4 sm:$0xff]   ;;  %v4686_v24 = vld [vmem:[#allocation5 + $0x18c] ss:$16 sps:$4 sm:$0xff]   ;;  %v4695_v28 = vld [vmem:[#allocation5 + $0x1c4] ss:$16 sps:$4 sm:$0xff]  }
  0x7d   :  { %1151 = vmatpush1.bf16.msra.mxu0 %v4615_v37  ;;  %v4684_v25 = vld [vmem:[#allocation5 + $0x188] ss:$16 sps:$4 sm:$0xff]   ;;  %v4692_v26 = vld [vmem:[#allocation5 + $0x1ac] ss:$16 sps:$4 sm:$0xff]   ;;  %v4693_v30 = vld [vmem:[#allocation5 + $0x1c0] ss:$16 sps:$4 sm:$0xff]  }
  0x7e   :  { %1152 = vmatprep.subr.bf16.mxu0 %v4623_v38  ;;  %v4690_v27 = vld [vmem:[#allocation5 + $0x1a8] ss:$16 sps:$4 sm:$0xff]   ;;  %v4698_v29 = vld [vmem:[#allocation5 + $0x1cc] ss:$16 sps:$4 sm:$0xff]   ;;  %v4701_v32 = vld [vmem:[#allocation5 + $0x1e4] ss:$16 sps:$4 sm:$0xff]   ;;  %v180_v38 = vlaneseq }
  0x7f   :  { %1233 = vmatpush1.bf16.msra.mxu1 %v4618_v47  ;;  %v4696_v31 = vld [vmem:[#allocation5 + $0x1c8] ss:$16 sps:$4 sm:$0xff]   ;;  %v4704_v33 = vld [vmem:[#allocation5 + $0x1ec] ss:$16 sps:$4 sm:$0xff]   ;;  %v4699_v34 = vld [vmem:[#allocation5 + $0x1e0] ss:$16 sps:$4 sm:$0xff]  }
  0x80   :  { %1234 = vmatprep.subr.bf16.mxu1 %v4626_v48  ;;  %v4702_v35 = vld [vmem:[#allocation5 + $0x1e8] ss:$16 sps:$4 sm:$0xff]   ;;  %v4707_v36 = vld [vmem:[#allocation5 + $0x204] ss:$16 sps:$4 sm:$0xff]   ;;  %v4710_v37 = vld [vmem:[#allocation5 + $0x20c] ss:$16 sps:$4 sm:$0xff]  }
  0x81   :  { %1153 = vmatpush1.bf16.msra.mxu0 %v4621_v41  ;;  %v5532_v39 = vshrl.u32 %v180_v38, 7  ;;  %v5537_v40 = vld [vmem:[%s5808_s2] sm:$0xf]  ;;  %v4767_v38 = vld [vmem:[#allocation5 + $0x344] ss:$16 sps:$4 sm:$0xff]  }
  0x82   :  { %1154 = vmatprep.subr.bf16.mxu0 %v4629_v42 }
  0x83   :  { %1235 = vmatpush1.bf16.msra.mxu1 %v4624_v51  ;;  %v5540_v41 = vsub.s32 0, %v5532_v39  ;;  %v5543_v42 = vsub.s32 1, %v5532_v39 }
  0x84   :  { %1236 = vmatprep.subr.bf16.mxu1 %v4632_v52  ;;  %v5550_v52 = vsub.s32 3, %v5532_v39 }
  0x85   :  { %1155 = vmatpush1.bf16.msra.mxu0 %v4627_v45  ;;  %v183_v43 = vrot.slane %v5537_v40, %v5540_v41  ;;  %v187_v44 = vrot.slane %v5537_v40, %v5543_v42 }
  0x86   :  { %1156 = vmatprep.subr.bf16.mxu0 %v4635_v46 }
  0x87   :  { %1237 = vmatpush1.bf16.msra.mxu1 %v4630_v55  ;;  %v4705_v55 = vld [vmem:[#allocation5 + $0x200] ss:$16 sps:$4 sm:$0xff]  }
  0x88   :  { %1238 = vmatprep.subr.bf16.mxu1 %v4638_v56  ;;  %v4708_v56 = vld [vmem:[#allocation5 + $0x208] ss:$16 sps:$4 sm:$0xff]  }
  0x89   :  { %1157 = vmatpush1.bf16.msra.mxu0 %v4633_v49 }
  0x8a   :  { %1158 = vmatprep.subr.bf16.mxu0 %v4641_v50 }
  0x8b   :  { %1239 = vmatpush1.bf16.msra.mxu1 %v4636_v58  ;;  %v4713_v58 = vld [vmem:[#allocation5 + $0x224] ss:$16 sps:$4 sm:$0xff]  }
  0x8c   :  { %1240 = vmatprep.subr.bf16.mxu1 %v4644_v60  ;;  %v195_v60 = vrot.slane %v5537_v40, %v5550_v52 }
  0x8d   :  { %1159 = vmatpush1.bf16.msra.mxu0 %v4639_v53 }
  0x8e   :  { %1160 = vmatprep.subr.bf16.mxu0 %v4647_v54 }
  0x8f   :  { %1241 = vmatpush1.bf16.msra.mxu1 %v4642_v63 }
  0x90   :  { %1242 = vmatprep.subr.bf16.mxu1 %v4650_v1  ;;  %v4719_v1 = vld [vmem:[#allocation5 + $0x244] ss:$16 sps:$4 sm:$0xff]  }
  0x91   :  { %1161 = vmatpush1.bf16.msra.mxu0 %v4645_v57 }
  0x92   :  { %1162 = vmatprep.subr.bf16.mxu0 %v4653_v59  ;;  %v4716_v59 = vld [vmem:[#allocation5 + $0x22c] ss:$16 sps:$4 sm:$0xff]  }
  0x93   :  { %1243 = vmatpush1.bf16.msra.mxu1 %v4648_v4 }
  0x94   :  { %1244 = vmatprep.subr.bf16.mxu1 %v4656_v5  ;;  %v4717_v5 = vld [vmem:[#allocation5 + $0x240] ss:$16 sps:$4 sm:$0xff]  }
  0x95   :  { %1163 = vmatpush1.bf16.msra.mxu0 %v4651_v61  ;;  %v4711_v61 = vld [vmem:[#allocation5 + $0x220] ss:$16 sps:$4 sm:$0xff]  }
  0x96   :  { %1164 = vmatprep.subr.bf16.mxu0 %v4659_v62  ;;  %v4714_v62 = vld [vmem:[#allocation5 + $0x228] ss:$16 sps:$4 sm:$0xff]  }
  0x97   :  { %1245 = vmatpush1.bf16.msra.mxu1 %v4654_v8  ;;  %v4725_v8 = vld [vmem:[#allocation5 + $0x264] ss:$16 sps:$4 sm:$0xff]  }
  0x98   :  { %1246 = vmatprep.subr.bf16.mxu1 %v4662_v9  ;;  %v4728_v9 = vld [vmem:[#allocation5 + $0x26c] ss:$16 sps:$4 sm:$0xff]  }
  0x99   :  { %1165 = vmatpush1.bf16.msra.mxu0 %v4657_v2  ;;  %v4722_v2 = vld [vmem:[#allocation5 + $0x24c] ss:$16 sps:$4 sm:$0xff]  }
  0x9a   :  { %1166 = vmatprep.subr.bf16.mxu0 %v4665_v3 }
  0x9b   :  { %1247 = vmatpush1.bf16.msra.mxu1 %v4660_v12  ;;  %v4723_v12 = vld [vmem:[#allocation5 + $0x260] ss:$16 sps:$4 sm:$0xff]  }
  0x9c   :  { %1248 = vmatprep.subr.bf16.mxu1 %v4668_v13  ;;  %v4726_v13 = vld [vmem:[#allocation5 + $0x268] ss:$16 sps:$4 sm:$0xff]  }
  0x9d   :  { %1167 = vmatpush1.bf16.msra.mxu0 %v4663_v6  ;;  %v4720_v6 = vld [vmem:[#allocation5 + $0x248] ss:$16 sps:$4 sm:$0xff]  }
  0x9e   :  { %1168 = vmatprep.subr.bf16.mxu0 %v4671_v7 }
  0x9f   :  { %1249 = vmatpush1.bf16.msra.mxu1 %v4666_v16  ;;  %v4729_v16 = vld [vmem:[#allocation5 + $0x280] ss:$16 sps:$4 sm:$0xff]  }
  0xa0   :  { %1250 = vmatprep.subr.bf16.mxu1 %v4674_v17  ;;  %v4732_v17 = vld [vmem:[#allocation5 + $0x288] ss:$16 sps:$4 sm:$0xff]  }
  0xa1   :  { %1169 = vmatpush1.bf16.msra.mxu0 %v4669_v10 }
  0xa2   :  { %1170 = vmatprep.subr.bf16.mxu0 %v4677_v11 }
  0xa3   :  { %1251 = vmatpush1.bf16.msra.mxu1 %v4672_v20  ;;  %v4735_v20 = vld [vmem:[#allocation5 + $0x2a0] ss:$16 sps:$4 sm:$0xff]  }
  0xa4   :  { %1252 = vmatprep.subr.bf16.mxu1 %v4680_v21  ;;  %v4738_v21 = vld [vmem:[#allocation5 + $0x2a8] ss:$16 sps:$4 sm:$0xff]  }
  0xa5   :  { %1171 = vmatpush1.bf16.msra.mxu0 %v4675_v14  ;;  %v4731_v14 = vld [vmem:[#allocation5 + $0x284] ss:$16 sps:$4 sm:$0xff]  }
  0xa6   :  { %1172 = vmatprep.subr.bf16.mxu0 %v4683_v15  ;;  %v4734_v15 = vld [vmem:[#allocation5 + $0x28c] ss:$16 sps:$4 sm:$0xff]  }
  0xa7   :  { %1253 = vmatpush1.bf16.msra.mxu1 %v4678_v23  ;;  %v4746_v23 = vld [vmem:[#allocation5 + $0x2cc] ss:$16 sps:$4 sm:$0xff]  }
  0xa8   :  { %1254 = vmatprep.subr.bf16.mxu1 %v4686_v24  ;;  %v4741_v24 = vld [vmem:[#allocation5 + $0x2c0] ss:$16 sps:$4 sm:$0xff]  }
  0xa9   :  { %1173 = vmatpush1.bf16.msra.mxu0 %v4681_v18  ;;  %v4737_v18 = vld [vmem:[#allocation5 + $0x2a4] ss:$16 sps:$4 sm:$0xff]  }
  0xaa   :  { %1174 = vmatprep.subr.bf16.mxu0 %v4689_v19  ;;  %v4740_v19 = vld [vmem:[#allocation5 + $0x2ac] ss:$16 sps:$4 sm:$0xff]  }
  0xab   :  { %1255 = vmatpush1.bf16.msra.mxu1 %v4684_v25  ;;  %v4744_v25 = vld [vmem:[#allocation5 + $0x2c8] ss:$16 sps:$4 sm:$0xff]  }
  0xac   :  { %1256 = vmatprep.subr.bf16.mxu1 %v4692_v26  ;;  %v4749_v26 = vld [vmem:[#allocation5 + $0x2e4] ss:$16 sps:$4 sm:$0xff]  }
  0xad   :  { %1175 = vmatpush1.bf16.msra.mxu0 %v4687_v22  ;;  %v4743_v22 = vld [vmem:[#allocation5 + $0x2c4] ss:$16 sps:$4 sm:$0xff]  }
  0xae   :  { %1176 = vmatprep.subr.bf16.mxu0 %v4695_v28  ;;  %v4747_v28 = vld [vmem:[#allocation5 + $0x2e0] ss:$16 sps:$4 sm:$0xff]  }
  0xaf   :  { %1257 = vmatpush1.bf16.msra.mxu1 %v4690_v27  ;;  %v4752_v27 = vld [vmem:[#allocation5 + $0x2ec] ss:$16 sps:$4 sm:$0xff]  }
  0xb0   :  { %1258 = vmatprep.subr.bf16.mxu1 %v4698_v29  ;;  %v4750_v29 = vld [vmem:[#allocation5 + $0x2e8] ss:$16 sps:$4 sm:$0xff]  }
  0xb1   :  { %1177 = vmatpush1.bf16.msra.mxu0 %v4693_v30  ;;  %v4755_v30 = vld [vmem:[#allocation5 + $0x304] ss:$16 sps:$4 sm:$0xff]  }
  0xb2   :  { %1178 = vmatprep.subr.bf16.mxu0 %v4701_v32  ;;  %v4753_v32 = vld [vmem:[#allocation5 + $0x300] ss:$16 sps:$4 sm:$0xff]  }
  0xb3   :  { %1259 = vmatpush1.bf16.msra.mxu1 %v4696_v31  ;;  %v4758_v31 = vld [vmem:[#allocation5 + $0x30c] ss:$16 sps:$4 sm:$0xff]  }
  0xb4   :  { %1260 = vmatprep.subr.bf16.mxu1 %v4704_v33  ;;  %v4756_v33 = vld [vmem:[#allocation5 + $0x308] ss:$16 sps:$4 sm:$0xff]  }
  0xb5   :  { %1179 = vmatpush1.bf16.msra.mxu0 %v4699_v34  ;;  %v4761_v34 = vld [vmem:[#allocation5 + $0x324] ss:$16 sps:$4 sm:$0xff]  }
  0xb6   :  { %1189 = vmatprep.subr.bf16.mxu0 %v4707_v36  ;;  %v4759_v36 = vld [vmem:[#allocation5 + $0x320] ss:$16 sps:$4 sm:$0xff]  }
  0xb7   :  { %1261 = vmatpush1.bf16.msra.mxu1 %v4702_v35  ;;  %v4764_v35 = vld [vmem:[#allocation5 + $0x32c] ss:$16 sps:$4 sm:$0xff]  }
  0xb8   :  { %1271 = vmatprep.subr.bf16.mxu1 %v4710_v37  ;;  %v4762_v37 = vld [vmem:[#allocation5 + $0x328] ss:$16 sps:$4 sm:$0xff]  }
 0x14b   :  { %v266_v45 = vpop.f32.mrb[0].mxu0 }
 0x14c   :  { %v267_v46 = vadd.f32 %v266_v45, %v183_v43  ;;  %v268_v47 = vpop.f32.mrb[1].mxu0  ;;  %v4770_v43 = vld [vmem:[#allocation5 + $0x34c] ss:$16 sps:$4 sm:$0xff]   ;;  %v4768_v45 = vld [vmem:[#allocation5 + $0x348] ss:$16 sps:$4 sm:$0xff]  }
 0x14d   :  { %v269_v48 = vadd.f32 %v268_v47, %v187_v44  ;;  %v5554_v63 = vpop.f32.mrb[0].mxu1  ;;  %v4765_v44 = vld [vmem:[#allocation5 + $0x340] ss:$16 sps:$4 sm:$0xff]   ;;  %v4776_v47 = vld [vmem:[#allocation5 + $0x36c] ss:$16 sps:$4 sm:$0xff]  }
 0x14e   :  { %vm342_vm0 = vcmp.ge.f32.partialorder %v267_v46, 0.0  ;;  %v346_v49 = vmul.f32 0.2, %v267_v46  ;;  %v339_v3 = vpop.f32.mrb[1].mxu1 }
 0x14f   :  { %vm343_vm1 = vcmp.ge.f32.partialorder %v269_v48, 0.0  ;;  %v347_v50 = vmul.f32 0.2, %v269_v48  ;;  %v340_v4 = vadd.f32 %v339_v3, %v195_v60  ;;  %v4786_v60 = vld [vmem:[#allocation5 + $0x3a8] ss:$16 sps:$4 sm:$0xff]  }
 0x150   :  { %v350_v51 = vsel %vm342_vm0, %v267_v46, %v346_v49  ;;  %v4773_v46 = vld [vmem:[#allocation5 + $0x364] ss:$16 sps:$4 sm:$0xff]   ;;  %v4774_v49 = vld [vmem:[#allocation5 + $0x368] ss:$16 sps:$4 sm:$0xff]   ;;  %vm5370_vm0 = vmmov 0  }
 0x151   :  { %v351_v53 = vsel %vm343_vm1, %v269_v48, %v347_v50  ;;  %v483_v57 = vpack.c.bf16 %v350_v51, %v350_v51  ;;  %vm345_vm2 = vcmp.ge.f32.partialorder %v340_v4, 0.0  ;;  %v349_v7 = vmul.f32 0.2, %v340_v4  ;;  %v4771_v48 = vld [vmem:[#allocation5 + $0x360] ss:$16 sps:$4 sm:$0xff]  }
 0x152   :  { %v484_v54 = vpack.c.bf16 %v351_v53, %v351_v53  ;;  %v4779_v50 = vld [vmem:[#allocation5 + $0x384] ss:$16 sps:$4 sm:$0xff]   ;;  %v4782_v51 = vld [vmem:[#allocation5 + $0x38c] ss:$16 sps:$4 sm:$0xff]   ;;  %v5557_v53 = vsub.s32 2, %v5532_v39  ;;  %vm3641_vm1 = vcmask 261120  }
 0x153   :  { %v353_v10 = vsel %vm345_vm2, %v340_v4, %v349_v7  ;;  %v4794_v39 = vld [vmem:[#allocation5 + $0x3cc] ss:$16 sps:$4 sm:$0xff]   ;;  %v4797_v3 = vld [vmem:[#allocation5 + $0x3e4] ss:$16 sps:$4 sm:$0xff]  }
 0x154   :  { %1180 = vmatprep.mubr.bf16.mxu0 %v484_v54  ;;  %1262 = vmatprep.mubr.bf16.mxu1 %v484_v54  ;;  %v486_v11 = vpack.c.bf16 %v353_v10, %v353_v10  ;;  %v4777_v54 = vld [vmem:[#allocation5 + $0x380] ss:$16 sps:$4 sm:$0xff]   ;;  %v4800_v4 = vld [vmem:[#allocation5 + $0x3ec] ss:$16 sps:$4 sm:$0xff]   ;;  %v4803_v7 = vld [vmem:[#allocation7 + $0x4] ss:$16 sps:$4 sm:$0xff]  }
 0x155   :  { %1181 = vmatmul.mubr.bf16.vlgmr.msra.gmra.mrb[4].mxu0 %v483_v57  ;;  %1263 = vmatmul.mubr.bf16.vlgmr.msra.gmra.mrb[4].mxu1 %v483_v57  ;;  %v4788_v57 = vld [vmem:[#allocation5 + $0x3ac] ss:$16 sps:$4 sm:$0xff]   ;;  %v4804_v10 = vld [vmem:[#allocation7 + $0x8] ss:$16 sps:$4 sm:$0xff]  }
 0x156   :  { %1190 = vmatpush1.bf16.msra.mxu0 %v4705_v55  ;;  %1272 = vmatpush1.bf16.msra.mxu1 %v4708_v56  ;;  %v4780_v55 = vld [vmem:[#allocation5 + $0x388] ss:$16 sps:$4 sm:$0xff]   ;;  %v4785_v56 = vld [vmem:[#allocation5 + $0x3a4] ss:$16 sps:$4 sm:$0xff]  }
 0x157   :  { %1191 = vmatprep.subr.bf16.mxu0 %v4713_v58  ;;  %1273 = vmatprep.subr.bf16.mxu1 %v4716_v59  ;;  %v191_v58 = vrot.slane %v5537_v40, %v5557_v53  ;;  %v4783_v59 = vld [vmem:[#allocation5 + $0x3a0] ss:$16 sps:$4 sm:$0xff]  }
 0x158   :  { %1221 = vmatprep.mubr.bf16.mxu0 %v486_v11  ;;  %1303 = vmatprep.mubr.bf16.mxu1 %v486_v11  ;;  %v4795_v40 = vld [vmem:[#allocation5 + $0x3e0] ss:$16 sps:$4 sm:$0xff]  }
 0x15a   :  { %1192 = vmatpush1.bf16.msra.mxu0 %v4711_v61  ;;  %1274 = vmatpush1.bf16.msra.mxu1 %v4714_v62  ;;  %v4791_v61 = vld [vmem:[#allocation5 + $0x3c4] ss:$16 sps:$4 sm:$0xff]   ;;  %v338_v62 = vadd.f32 %v5554_v63, %v191_v58  ;;  %v4801_v63 = vld [vmem:[#allocation7] ss:$16 sps:$4 sm:$0xff]  }
 0x15b   :  { %1193 = vmatprep.subr.bf16.mxu0 %v4719_v1  ;;  %1275 = vmatprep.subr.bf16.mxu1 %v4722_v2  ;;  %v4789_v1 = vld [vmem:[#allocation5 + $0x3c0] ss:$16 sps:$4 sm:$0xff]   ;;  %v4792_v2 = vld [vmem:[#allocation5 + $0x3c8] ss:$16 sps:$4 sm:$0xff]   ;;  %v4869_v58 = vld [vmem:[#allocation7 + $0x164] ss:$16 sps:$4 sm:$0xff]  }
 0x15c   :  { %vm344_vm3 = vcmp.ge.f32.partialorder %v338_v62, 0.0 }
 0x15e   :  { %1194 = vmatpush1.bf16.msra.mxu0 %v4717_v5  ;;  %1276 = vmatpush1.bf16.msra.mxu1 %v4720_v6  ;;  %v348_v5 = vmul.f32 0.2, %v338_v62  ;;  %v4798_v6 = vld [vmem:[#allocation5 + $0x3e8] ss:$16 sps:$4 sm:$0xff]  }
 0x15f   :  { %1195 = vmatprep.subr.bf16.mxu0 %v4725_v8  ;;  %1277 = vmatprep.subr.bf16.mxu1 %v4728_v9  ;;  %v4806_v8 = vld [vmem:[#allocation7 + $0xc] ss:$16 sps:$4 sm:$0xff]  }
 0x160   :  { %v352_v9 = vsel %vm344_vm3, %v338_v62, %v348_v5  ;;  %v4878_v62 = vld [vmem:[#allocation7 + $0x18c] ss:$16 sps:$4 sm:$0xff]   ;;  %v4879_v5 = vld [vmem:[#allocation7 + $0x1a0] ss:$16 sps:$4 sm:$0xff]  }
 0x161   :  { %v485_v11 = vpack.c.bf16 %v352_v9, %v352_v9  ;;  %v4888_v9 = vld [vmem:[#allocation7 + $0x1c8] ss:$16 sps:$4 sm:$0xff]  }
 0x162   :  { %1196 = vmatpush1.bf16.msra.mxu0 %v4723_v12  ;;  %1278 = vmatpush1.bf16.msra.mxu1 %v4726_v13  ;;  %v4809_v12 = vld [vmem:[#allocation7 + $0x24] ss:$16 sps:$4 sm:$0xff]   ;;  %v4812_v13 = vld [vmem:[#allocation7 + $0x2c] ss:$16 sps:$4 sm:$0xff]  }
 0x163   :  { %1197 = vmatprep.subr.bf16.mxu0 %v4731_v14  ;;  %1279 = vmatprep.subr.bf16.mxu1 %v4734_v15  ;;  %v4807_v14 = vld [vmem:[#allocation7 + $0x20] ss:$16 sps:$4 sm:$0xff]   ;;  %v4810_v15 = vld [vmem:[#allocation7 + $0x28] ss:$16 sps:$4 sm:$0xff]  }
 0x166   :  { %1198 = vmatpush1.bf16.msra.mxu0 %v4729_v16  ;;  %1280 = vmatpush1.bf16.msra.mxu1 %v4732_v17  ;;  %v4815_v16 = vld [vmem:[#allocation7 + $0x44] ss:$16 sps:$4 sm:$0xff]   ;;  %v4818_v17 = vld [vmem:[#allocation7 + $0x4c] ss:$16 sps:$4 sm:$0xff]  }
 0x167   :  { %1199 = vmatprep.subr.bf16.mxu0 %v4737_v18  ;;  %1281 = vmatprep.subr.bf16.mxu1 %v4740_v19  ;;  %v4813_v18 = vld [vmem:[#allocation7 + $0x40] ss:$16 sps:$4 sm:$0xff]   ;;  %v4816_v19 = vld [vmem:[#allocation7 + $0x48] ss:$16 sps:$4 sm:$0xff]  }
 0x16a   :  { %1200 = vmatpush1.bf16.msra.mxu0 %v4735_v20  ;;  %1282 = vmatpush1.bf16.msra.mxu1 %v4738_v21  ;;  %v4821_v20 = vld [vmem:[#allocation7 + $0x64] ss:$16 sps:$4 sm:$0xff]   ;;  %v4824_v21 = vld [vmem:[#allocation7 + $0x6c] ss:$16 sps:$4 sm:$0xff]  }
 0x16b   :  { %1201 = vmatprep.subr.bf16.mxu0 %v4743_v22  ;;  %1283 = vmatprep.subr.bf16.mxu1 %v4746_v23  ;;  %v4819_v22 = vld [vmem:[#allocation7 + $0x60] ss:$16 sps:$4 sm:$0xff]   ;;  %v4822_v23 = vld [vmem:[#allocation7 + $0x68] ss:$16 sps:$4 sm:$0xff]  }
 0x16e   :  { %1202 = vmatpush1.bf16.msra.mxu0 %v4741_v24  ;;  %1284 = vmatpush1.bf16.msra.mxu1 %v4744_v25  ;;  %v4827_v24 = vld [vmem:[#allocation7 + $0x84] ss:$16 sps:$4 sm:$0xff]   ;;  %v4830_v25 = vld [vmem:[#allocation7 + $0x8c] ss:$16 sps:$4 sm:$0xff]  }
 0x16f   :  { %1203 = vmatprep.subr.bf16.mxu0 %v4749_v26  ;;  %1285 = vmatprep.subr.bf16.mxu1 %v4752_v27  ;;  %v4825_v26 = vld [vmem:[#allocation7 + $0x80] ss:$16 sps:$4 sm:$0xff]   ;;  %v4828_v27 = vld [vmem:[#allocation7 + $0x88] ss:$16 sps:$4 sm:$0xff]  }
 0x172   :  { %1204 = vmatpush1.bf16.msra.mxu0 %v4747_v28  ;;  %1286 = vmatpush1.bf16.msra.mxu1 %v4750_v29  ;;  %v4833_v28 = vld [vmem:[#allocation7 + $0xa4] ss:$16 sps:$4 sm:$0xff]   ;;  %v4836_v29 = vld [vmem:[#allocation7 + $0xac] ss:$16 sps:$4 sm:$0xff]  }
 0x173   :  { %1205 = vmatprep.subr.bf16.mxu0 %v4755_v30  ;;  %1287 = vmatprep.subr.bf16.mxu1 %v4758_v31  ;;  %v4831_v30 = vld [vmem:[#allocation7 + $0xa0] ss:$16 sps:$4 sm:$0xff]   ;;  %v4834_v31 = vld [vmem:[#allocation7 + $0xa8] ss:$16 sps:$4 sm:$0xff]  }
 0x176   :  { %1206 = vmatpush1.bf16.msra.mxu0 %v4753_v32  ;;  %1288 = vmatpush1.bf16.msra.mxu1 %v4756_v33  ;;  %v4839_v32 = vld [vmem:[#allocation7 + $0xc4] ss:$16 sps:$4 sm:$0xff]   ;;  %v4842_v33 = vld [vmem:[#allocation7 + $0xcc] ss:$16 sps:$4 sm:$0xff]  }
 0x177   :  { %1207 = vmatprep.subr.bf16.mxu0 %v4761_v34  ;;  %1289 = vmatprep.subr.bf16.mxu1 %v4764_v35  ;;  %v4837_v34 = vld [vmem:[#allocation7 + $0xc0] ss:$16 sps:$4 sm:$0xff]   ;;  %v4840_v35 = vld [vmem:[#allocation7 + $0xc8] ss:$16 sps:$4 sm:$0xff]  }
 0x17a   :  { %1208 = vmatpush1.bf16.msra.mxu0 %v4759_v36  ;;  %1290 = vmatpush1.bf16.msra.mxu1 %v4762_v37  ;;  %v4845_v36 = vld [vmem:[#allocation7 + $0xe4] ss:$16 sps:$4 sm:$0xff]   ;;  %v4848_v37 = vld [vmem:[#allocation7 + $0xec] ss:$16 sps:$4 sm:$0xff]  }
 0x17b   :  { %1209 = vmatprep.subr.bf16.mxu0 %v4767_v38  ;;  %1291 = vmatprep.subr.bf16.mxu1 %v4770_v43  ;;  %v4843_v38 = vld [vmem:[#allocation7 + $0xe0] ss:$16 sps:$4 sm:$0xff]   ;;  %v4846_v43 = vld [vmem:[#allocation7 + $0xe8] ss:$16 sps:$4 sm:$0xff]  }
 0x17e   :  { %1210 = vmatpush1.bf16.msra.mxu0 %v4765_v44  ;;  %1292 = vmatpush1.bf16.msra.mxu1 %v4768_v45  ;;  %v4851_v44 = vld [vmem:[#allocation7 + $0x104] ss:$16 sps:$4 sm:$0xff]   ;;  %v4854_v45 = vld [vmem:[#allocation7 + $0x10c] ss:$16 sps:$4 sm:$0xff]  }
 0x17f   :  { %1211 = vmatprep.subr.bf16.mxu0 %v4773_v46  ;;  %1293 = vmatprep.subr.bf16.mxu1 %v4776_v47  ;;  %v4849_v46 = vld [vmem:[#allocation7 + $0x100] ss:$16 sps:$4 sm:$0xff]   ;;  %v4852_v47 = vld [vmem:[#allocation7 + $0x108] ss:$16 sps:$4 sm:$0xff]  }
 0x182   :  { %1212 = vmatpush1.bf16.msra.mxu0 %v4771_v48  ;;  %1294 = vmatpush1.bf16.msra.mxu1 %v4774_v49  ;;  %v4857_v48 = vld [vmem:[#allocation7 + $0x124] ss:$16 sps:$4 sm:$0xff]   ;;  %v4860_v49 = vld [vmem:[#allocation7 + $0x12c] ss:$16 sps:$4 sm:$0xff]  }
 0x183   :  { %1213 = vmatprep.subr.bf16.mxu0 %v4779_v50  ;;  %1295 = vmatprep.subr.bf16.mxu1 %v4782_v51  ;;  %v4855_v50 = vld [vmem:[#allocation7 + $0x120] ss:$16 sps:$4 sm:$0xff]   ;;  %v4858_v51 = vld [vmem:[#allocation7 + $0x128] ss:$16 sps:$4 sm:$0xff]  }
 0x186   :  { %1214 = vmatpush1.bf16.msra.mxu0 %v4777_v54  ;;  %1296 = vmatpush1.bf16.msra.mxu1 %v4780_v55  ;;  %v4863_v54 = vld [vmem:[#allocation7 + $0x144] ss:$16 sps:$4 sm:$0xff]   ;;  %v4866_v55 = vld [vmem:[#allocation7 + $0x14c] ss:$16 sps:$4 sm:$0xff]  }
 0x187   :  { %1215 = vmatprep.subr.bf16.mxu0 %v4785_v56  ;;  %1297 = vmatprep.subr.bf16.mxu1 %v4788_v57  ;;  %v4861_v56 = vld [vmem:[#allocation7 + $0x140] ss:$16 sps:$4 sm:$0xff]   ;;  %v4864_v57 = vld [vmem:[#allocation7 + $0x148] ss:$16 sps:$4 sm:$0xff]  }
 0x18a   :  { %1216 = vmatpush1.bf16.msra.mxu0 %v4783_v59  ;;  %1298 = vmatpush1.bf16.msra.mxu1 %v4786_v60  ;;  %v4872_v59 = vld [vmem:[#allocation7 + $0x16c] ss:$16 sps:$4 sm:$0xff]   ;;  %v4867_v60 = vld [vmem:[#allocation7 + $0x160] ss:$16 sps:$4 sm:$0xff]  }
 0x18b   :  { %1217 = vmatprep.subr.bf16.mxu0 %v4791_v61  ;;  %1299 = vmatprep.subr.bf16.mxu1 %v4794_v39  ;;  %v4870_v61 = vld [vmem:[#allocation7 + $0x168] ss:$16 sps:$4 sm:$0xff]   ;;  %v4875_v39 = vld [vmem:[#allocation7 + $0x184] ss:$16 sps:$4 sm:$0xff]  }
 0x18e   :  { %1218 = vmatpush1.bf16.msra.mxu0 %v4789_v1  ;;  %1300 = vmatpush1.bf16.msra.mxu1 %v4792_v2  ;;  %v4873_v1 = vld [vmem:[#allocation7 + $0x180] ss:$16 sps:$4 sm:$0xff]   ;;  %v4876_v2 = vld [vmem:[#allocation7 + $0x188] ss:$16 sps:$4 sm:$0xff]  }
 0x18f   :  { %1219 = vmatprep.subr.bf16.mxu0 %v4797_v3  ;;  %1301 = vmatprep.subr.bf16.mxu1 %v4800_v4  ;;  %v4881_v3 = vld [vmem:[#allocation7 + $0x1a4] ss:$16 sps:$4 sm:$0xff]   ;;  %v4884_v4 = vld [vmem:[#allocation7 + $0x1ac] ss:$16 sps:$4 sm:$0xff]  }
 0x192   :  { %1220 = vmatpush1.bf16.msra.mxu0 %v4795_v40  ;;  %1302 = vmatpush1.bf16.msra.mxu1 %v4798_v6  ;;  %v4882_v40 = vld [vmem:[#allocation7 + $0x1a8] ss:$16 sps:$4 sm:$0xff]   ;;  %v4887_v6 = vld [vmem:[#allocation7 + $0x1c4] ss:$16 sps:$4 sm:$0xff]  }
 0x193   :  { %2118 = vmatprep.subr.bf16.mxu0 %v4803_v7  ;;  %2200 = vmatprep.subr.bf16.mxu1 %v4806_v8  ;;  %v4890_v7 = vld [vmem:[#allocation7 + $0x1cc] ss:$16 sps:$4 sm:$0xff]   ;;  %v4885_v8 = vld [vmem:[#allocation7 + $0x1c0] ss:$16 sps:$4 sm:$0xff]  }
 0x195   :  { %1222 = vmatmul.mubr.bf16.vlgmr.msra.gmra.mrb[4].mxu0 %v485_v11  ;;  %1304 = vmatmul.mubr.bf16.vlgmr.msra.gmra.mrb[4].mxu1 %v485_v11  ;;  %v4891_v11 = vld [vmem:[#allocation7 + $0x1e0] ss:$16 sps:$4 sm:$0xff]  }
 0x196   :  { %2119 = vmatpush1.bf16.msra.mxu0 %v4801_v63  ;;  %2201 = vmatpush1.bf16.msra.mxu1 %v4804_v10  ;;  %v4893_v63 = vld [vmem:[#allocation7 + $0x1e4] ss:$16 sps:$4 sm:$0xff]   ;;  %v4896_v10 = vld [vmem:[#allocation7 + $0x1ec] ss:$16 sps:$4 sm:$0xff]  }
 0x197   :  { %2120 = vmatprep.subr.bf16.mxu0 %v4809_v12  ;;  %2202 = vmatprep.subr.bf16.mxu1 %v4812_v13  ;;  %v4894_v12 = vld [vmem:[#allocation7 + $0x1e8] ss:$16 sps:$4 sm:$0xff]   ;;  %v4899_v13 = vld [vmem:[#allocation7 + $0x204] ss:$16 sps:$4 sm:$0xff]  }
 0x19a   :  { %2121 = vmatpush1.bf16.msra.mxu0 %v4807_v14  ;;  %2203 = vmatpush1.bf16.msra.mxu1 %v4810_v15  ;;  %v4902_v14 = vld [vmem:[#allocation7 + $0x20c] ss:$16 sps:$4 sm:$0xff]   ;;  %v5565_v15 = vld [vmem:[%s5810_s4] sm:$0xf] }
 0x19b   :  { %2122 = vmatprep.subr.bf16.mxu0 %v4815_v16  ;;  %2204 = vmatprep.subr.bf16.mxu1 %v4818_v17  ;;  %v491_v16 = vrot.slane %v5565_v15, %v5540_v41  ;;  %v495_v17 = vrot.slane %v5565_v15, %v5543_v42 }
 0x19e   :  { %2123 = vmatpush1.bf16.msra.mxu0 %v4813_v18  ;;  %2205 = vmatpush1.bf16.msra.mxu1 %v4816_v19  ;;  %v503_v18 = vrot.slane %v5565_v15, %v5550_v52 }
 0x19f   :  { %2124 = vmatprep.subr.bf16.mxu0 %v4821_v20  ;;  %2206 = vmatprep.subr.bf16.mxu1 %v4824_v21 }
 0x1a2   :  { %2125 = vmatpush1.bf16.msra.mxu0 %v4819_v22  ;;  %2207 = vmatpush1.bf16.msra.mxu1 %v4822_v23 }
 0x1a3   :  { %2126 = vmatprep.subr.bf16.mxu0 %v4827_v24  ;;  %2208 = vmatprep.subr.bf16.mxu1 %v4830_v25 }
 0x1a6   :  { %2127 = vmatpush1.bf16.msra.mxu0 %v4825_v26  ;;  %2209 = vmatpush1.bf16.msra.mxu1 %v4828_v27 }
 0x1a7   :  { %2128 = vmatprep.subr.bf16.mxu0 %v4833_v28  ;;  %2210 = vmatprep.subr.bf16.mxu1 %v4836_v29 }
 0x1aa   :  { %2129 = vmatpush1.bf16.msra.mxu0 %v4831_v30  ;;  %2211 = vmatpush1.bf16.msra.mxu1 %v4834_v31 }
 0x1ab   :  { %2130 = vmatprep.subr.bf16.mxu0 %v4839_v32  ;;  %2212 = vmatprep.subr.bf16.mxu1 %v4842_v33 }
 0x1ae   :  { %2131 = vmatpush1.bf16.msra.mxu0 %v4837_v34  ;;  %2213 = vmatpush1.bf16.msra.mxu1 %v4840_v35 }
 0x1af   :  { %2132 = vmatprep.subr.bf16.mxu0 %v4845_v36  ;;  %2214 = vmatprep.subr.bf16.mxu1 %v4848_v37  ;;  %v4897_v36 = vld [vmem:[#allocation7 + $0x200] ss:$16 sps:$4 sm:$0xff]   ;;  %v4900_v37 = vld [vmem:[#allocation7 + $0x208] ss:$16 sps:$4 sm:$0xff]  }
 0x1b2   :  { %2133 = vmatpush1.bf16.msra.mxu0 %v4843_v38  ;;  %2215 = vmatpush1.bf16.msra.mxu1 %v4846_v43 }
 0x1b3   :  { %2134 = vmatprep.subr.bf16.mxu0 %v4851_v44  ;;  %2216 = vmatprep.subr.bf16.mxu1 %v4854_v45  ;;  %v4905_v44 = vld [vmem:[#allocation7 + $0x224] ss:$16 sps:$4 sm:$0xff]   ;;  %v4908_v45 = vld [vmem:[#allocation7 + $0x22c] ss:$16 sps:$4 sm:$0xff]  }
 0x1b6   :  { %2135 = vmatpush1.bf16.msra.mxu0 %v4849_v46  ;;  %2217 = vmatpush1.bf16.msra.mxu1 %v4852_v47  ;;  %v4903_v47 = vld [vmem:[#allocation7 + $0x220] ss:$16 sps:$4 sm:$0xff]  }
 0x1b7   :  { %2136 = vmatprep.subr.bf16.mxu0 %v4857_v48  ;;  %2218 = vmatprep.subr.bf16.mxu1 %v4860_v49  ;;  %v4906_v48 = vld [vmem:[#allocation7 + $0x228] ss:$16 sps:$4 sm:$0xff]   ;;  %v4911_v49 = vld [vmem:[#allocation7 + $0x244] ss:$16 sps:$4 sm:$0xff]  }
 0x1ba   :  { %2137 = vmatpush1.bf16.msra.mxu0 %v4855_v50  ;;  %2219 = vmatpush1.bf16.msra.mxu1 %v4858_v51  ;;  %v4914_v50 = vld [vmem:[#allocation7 + $0x24c] ss:$16 sps:$4 sm:$0xff]   ;;  %v4909_v51 = vld [vmem:[#allocation7 + $0x240] ss:$16 sps:$4 sm:$0xff]  }
 0x1bb   :  { %2138 = vmatprep.subr.bf16.mxu0 %v4863_v54  ;;  %2220 = vmatprep.subr.bf16.mxu1 %v4866_v55  ;;  %v4912_v54 = vld [vmem:[#allocation7 + $0x248] ss:$16 sps:$4 sm:$0xff]   ;;  %v4917_v55 = vld [vmem:[#allocation7 + $0x264] ss:$16 sps:$4 sm:$0xff]  }
 0x1be   :  { %2139 = vmatpush1.bf16.msra.mxu0 %v4861_v56  ;;  %2221 = vmatpush1.bf16.msra.mxu1 %v4864_v57  ;;  %v4920_v56 = vld [vmem:[#allocation7 + $0x26c] ss:$16 sps:$4 sm:$0xff]   ;;  %v4915_v57 = vld [vmem:[#allocation7 + $0x260] ss:$16 sps:$4 sm:$0xff]  }
 0x1bf   :  { %2140 = vmatprep.subr.bf16.mxu0 %v4869_v58  ;;  %2222 = vmatprep.subr.bf16.mxu1 %v4872_v59  ;;  %v4918_v58 = vld [vmem:[#allocation7 + $0x268] ss:$16 sps:$4 sm:$0xff]   ;;  %v4923_v59 = vld [vmem:[#allocation7 + $0x284] ss:$16 sps:$4 sm:$0xff]  }
 0x1c2   :  { %2141 = vmatpush1.bf16.msra.mxu0 %v4867_v60  ;;  %2223 = vmatpush1.bf16.msra.mxu1 %v4870_v61  ;;  %v4926_v60 = vld [vmem:[#allocation7 + $0x28c] ss:$16 sps:$4 sm:$0xff]   ;;  %v4921_v61 = vld [vmem:[#allocation7 + $0x280] ss:$16 sps:$4 sm:$0xff]  }
 0x1c3   :  { %2142 = vmatprep.subr.bf16.mxu0 %v4875_v39  ;;  %2224 = vmatprep.subr.bf16.mxu1 %v4878_v62  ;;  %v4924_v39 = vld [vmem:[#allocation7 + $0x288] ss:$16 sps:$4 sm:$0xff]   ;;  %v4929_v62 = vld [vmem:[#allocation7 + $0x2a4] ss:$16 sps:$4 sm:$0xff]  }
 0x1c6   :  { %2143 = vmatpush1.bf16.msra.mxu0 %v4873_v1  ;;  %2225 = vmatpush1.bf16.msra.mxu1 %v4876_v2  ;;  %v4932_v1 = vld [vmem:[#allocation7 + $0x2ac] ss:$16 sps:$4 sm:$0xff]   ;;  %v4927_v2 = vld [vmem:[#allocation7 + $0x2a0] ss:$16 sps:$4 sm:$0xff]  }
 0x1c7   :  { %2144 = vmatprep.subr.bf16.mxu0 %v4881_v3  ;;  %2226 = vmatprep.subr.bf16.mxu1 %v4884_v4  ;;  %v4930_v3 = vld [vmem:[#allocation7 + $0x2a8] ss:$16 sps:$4 sm:$0xff]   ;;  %v4935_v4 = vld [vmem:[#allocation7 + $0x2c4] ss:$16 sps:$4 sm:$0xff]  }
 0x1ca   :  { %2145 = vmatpush1.bf16.msra.mxu0 %v4879_v5  ;;  %2227 = vmatpush1.bf16.msra.mxu1 %v4882_v40  ;;  %v4938_v5 = vld [vmem:[#allocation7 + $0x2cc] ss:$16 sps:$4 sm:$0xff]   ;;  %v4933_v40 = vld [vmem:[#allocation7 + $0x2c0] ss:$16 sps:$4 sm:$0xff]  }
 0x1cb   :  { %2146 = vmatprep.subr.bf16.mxu0 %v4887_v6  ;;  %2228 = vmatprep.subr.bf16.mxu1 %v4890_v7  ;;  %v4936_v6 = vld [vmem:[#allocation7 + $0x2c8] ss:$16 sps:$4 sm:$0xff]   ;;  %v4941_v7 = vld [vmem:[#allocation7 + $0x2e4] ss:$16 sps:$4 sm:$0xff]  }
 0x1ce   :  { %2147 = vmatpush1.bf16.msra.mxu0 %v4885_v8  ;;  %2229 = vmatpush1.bf16.msra.mxu1 %v4888_v9  ;;  %v4944_v8 = vld [vmem:[#allocation7 + $0x2ec] ss:$16 sps:$4 sm:$0xff]   ;;  %v4939_v9 = vld [vmem:[#allocation7 + $0x2e0] ss:$16 sps:$4 sm:$0xff]  }
 0x1cf   :  { %2148 = vmatprep.subr.bf16.mxu0 %v4893_v63  ;;  %2230 = vmatprep.subr.bf16.mxu1 %v4896_v10  ;;  %v4942_v63 = vld [vmem:[#allocation7 + $0x2e8] ss:$16 sps:$4 sm:$0xff]   ;;  %v4947_v10 = vld [vmem:[#allocation7 + $0x304] ss:$16 sps:$4 sm:$0xff]  }
 0x1d2   :  { %2149 = vmatpush1.bf16.msra.mxu0 %v4891_v11  ;;  %2231 = vmatpush1.bf16.msra.mxu1 %v4894_v12  ;;  %v4950_v11 = vld [vmem:[#allocation7 + $0x30c] ss:$16 sps:$4 sm:$0xff]   ;;  %v4945_v12 = vld [vmem:[#allocation7 + $0x300] ss:$16 sps:$4 sm:$0xff]  }
 0x1d3   :  { %2159 = vmatprep.subr.bf16.mxu0 %v4899_v13  ;;  %2241 = vmatprep.subr.bf16.mxu1 %v4902_v14  ;;  %v4948_v13 = vld [vmem:[#allocation7 + $0x308] ss:$16 sps:$4 sm:$0xff]   ;;  %v4953_v14 = vld [vmem:[#allocation7 + $0x324] ss:$16 sps:$4 sm:$0xff]  }
 0x268   :  { %v1223_v19 = vpop.f32.mrb[4].mxu0  ;;  %v5573_v20 = vpop.f32.mrb[4].mxu1 }
 0x269   :  { %v4562_v21 = vadd.f32 %v1223_v19, %v491_v16  ;;  %v1225_v22 = vpop.f32.mrb[5].mxu0  ;;  %v1307_v23 = vpop.f32.mrb[5].mxu1  ;;  %v4956_v16 = vld [vmem:[#allocation7 + $0x32c] ss:$16 sps:$4 sm:$0xff]   ;;  %v4959_v19 = vld [vmem:[#allocation7 + $0x344] ss:$16 sps:$4 sm:$0xff]  }
 0x26a   :  { %v4563_v24 = vadd.f32 %v1225_v22, %v495_v17  ;;  %v4565_v25 = vadd.f32 %v1307_v23, %v503_v18  ;;  %v1227_v26 = vpop.f32.mrb[6].mxu0  ;;  %v1309_v27 = vpop.f32.mrb[6].mxu1  ;;  %v4951_v17 = vld [vmem:[#allocation7 + $0x320] ss:$16 sps:$4 sm:$0xff]   ;;  %v4954_v18 = vld [vmem:[#allocation7 + $0x328] ss:$16 sps:$4 sm:$0xff]  }
 0x26b   :  { %vm1312_vm4 = vcmp.ge.f32.partialorder %v4562_v21, 0.0  ;;  %v1316_v28 = vmul.f32 0.2, %v4562_v21  ;;  %v1228_v32 = vpop.f32.mrb[7].mxu0  ;;  %v1310_v33 = vpop.f32.mrb[7].mxu1 }
 0x26c   :  { %vm1313_vm5 = vcmp.ge.f32.partialorder %v4563_v24, 0.0  ;;  %v1317_v29 = vmul.f32 0.2, %v4563_v24  ;;  %vm1315_vm6 = vcmp.ge.f32.partialorder %v4565_v25, 0.0  ;;  %v1319_v30 = vmul.f32 0.2, %v4565_v25 }
 0x26d   :  { %v1320_v31 = vsel %vm1312_vm4, %v4562_v21, %v1316_v28  ;;  %v4962_v21 = vld [vmem:[#allocation7 + $0x34c] ss:$16 sps:$4 sm:$0xff]   ;;  %v4957_v22 = vld [vmem:[#allocation7 + $0x340] ss:$16 sps:$4 sm:$0xff]   ;;  %v4960_v23 = vld [vmem:[#allocation7 + $0x348] ss:$16 sps:$4 sm:$0xff]  }
 0x26e   :  { %v1321_v34 = vsel %vm1313_vm5, %v4563_v24, %v1317_v29  ;;  %v1323_v38 = vsel %vm1315_vm6, %v4565_v25, %v1319_v30  ;;  %v1453_v43 = vpack.c.bf16 %v1320_v31, %v1320_v31  ;;  %v4965_v24 = vld [vmem:[#allocation7 + $0x364] ss:$16 sps:$4 sm:$0xff]   ;;  %v4968_v25 = vld [vmem:[#allocation7 + $0x36c] ss:$16 sps:$4 sm:$0xff]   ;;  %v4963_v26 = vld [vmem:[#allocation7 + $0x360] ss:$16 sps:$4 sm:$0xff]  }
 0x26f   :  { %v1454_v35 = vpack.c.bf16 %v1321_v34, %v1321_v34  ;;  %v1456_v46 = vpack.c.bf16 %v1323_v38, %v1323_v38  ;;  %v4966_v27 = vld [vmem:[#allocation7 + $0x368] ss:$16 sps:$4 sm:$0xff]   ;;  %v4971_v28 = vld [vmem:[#allocation7 + $0x384] ss:$16 sps:$4 sm:$0xff]   ;;  %v4974_v29 = vld [vmem:[#allocation7 + $0x38c] ss:$16 sps:$4 sm:$0xff]   ;;  %v499_v34 = vrot.slane %v5565_v15, %v5557_v53 }
 0x270   :  { %v4969_v30 = vld [vmem:[#allocation7 + $0x380] ss:$16 sps:$4 sm:$0xff]   ;;  %v4972_v31 = vld [vmem:[#allocation7 + $0x388] ss:$16 sps:$4 sm:$0xff]   ;;  %v4977_v32 = vld [vmem:[#allocation7 + $0x3a4] ss:$16 sps:$4 sm:$0xff]  }
 0x271   :  { %2150 = vmatprep.mubr.bf16.mxu0 %v1454_v35  ;;  %2232 = vmatprep.mubr.bf16.mxu1 %v1454_v35  ;;  %v4980_v33 = vld [vmem:[#allocation7 + $0x3ac] ss:$16 sps:$4 sm:$0xff]   ;;  %v4975_v35 = vld [vmem:[#allocation7 + $0x3a0] ss:$16 sps:$4 sm:$0xff]  }
 0x272   :  { %2151 = vmatmul.mubr.bf16.vlgmr.msra.gmra.mrb[8].mxu0 %v1453_v43  ;;  %2233 = vmatmul.mubr.bf16.vlgmr.msra.gmra.mrb[8].mxu1 %v1453_v43  ;;  %v4986_v38 = vld [vmem:[#allocation7 + $0x3cc] ss:$16 sps:$4 sm:$0xff]   ;;  %v4564_v43 = vadd.f32 %v5573_v20, %v499_v34  ;;  %v4987_v15 = vld [vmem:[#allocation7 + $0x3e0] ss:$16 sps:$4 sm:$0xff]   ;;  %v5061_v34 = vld [vmem:[#allocation8 + $0x164] ss:$16 sps:$4 sm:$0xff]  }
 0x273   :  { %2160 = vmatpush1.bf16.msra.mxu0 %v4897_v36  ;;  %2242 = vmatpush1.bf16.msra.mxu1 %v4900_v37  ;;  %v4978_v36 = vld [vmem:[#allocation7 + $0x3a8] ss:$16 sps:$4 sm:$0xff]   ;;  %v4983_v37 = vld [vmem:[#allocation7 + $0x3c4] ss:$16 sps:$4 sm:$0xff]   ;;  %v4993_v20 = vld [vmem:[#allocation8] ss:$16 sps:$4 sm:$0xff]  }
 0x274   :  { %2191 = vmatprep.mubr.bf16.mxu0 %v1456_v46  ;;  %2273 = vmatprep.mubr.bf16.mxu1 %v1456_v46  ;;  %v4989_v46 = vld [vmem:[#allocation7 + $0x3e4] ss:$16 sps:$4 sm:$0xff]   ;;  %vm1314_vm7 = vcmp.ge.f32.partialorder %v4564_v43, 0.0 }
 0x275   :  { %2161 = vmatprep.subr.bf16.mxu0 %v4905_v44  ;;  %2243 = vmatprep.subr.bf16.mxu1 %v4908_v45  ;;  %v4981_v44 = vld [vmem:[#allocation7 + $0x3c0] ss:$16 sps:$4 sm:$0xff]   ;;  %v4984_v45 = vld [vmem:[#allocation7 + $0x3c8] ss:$16 sps:$4 sm:$0xff]  }
 0x277   :  { %2162 = vmatpush1.bf16.msra.mxu0 %v4903_v47  ;;  %2244 = vmatpush1.bf16.msra.mxu1 %v4906_v48  ;;  %v4992_v47 = vld [vmem:[#allocation7 + $0x3ec] ss:$16 sps:$4 sm:$0xff]   ;;  %v1318_v48 = vmul.f32 0.2, %v4564_v43 }
 0x278   :  { %2163 = vmatprep.subr.bf16.mxu0 %v4911_v49  ;;  %2245 = vmatprep.subr.bf16.mxu1 %v4914_v50  ;;  %v4990_v49 = vld [vmem:[#allocation7 + $0x3e8] ss:$16 sps:$4 sm:$0xff]   ;;  %v4995_v50 = vld [vmem:[#allocation8 + $0x4] ss:$16 sps:$4 sm:$0xff]  }
 0x27b   :  { %2164 = vmatpush1.bf16.msra.mxu0 %v4909_v51  ;;  %2246 = vmatpush1.bf16.msra.mxu1 %v4912_v54  ;;  %v4998_v51 = vld [vmem:[#allocation8 + $0xc] ss:$16 sps:$4 sm:$0xff]   ;;  %v1322_v54 = vsel %vm1314_vm7, %v4564_v43, %v1318_v48  ;;  %v5071_v48 = vld [vmem:[#allocation8 + $0x1a0] ss:$16 sps:$4 sm:$0xff]  }
 0x27c   :  { %2165 = vmatprep.subr.bf16.mxu0 %v4917_v55  ;;  %2247 = vmatprep.subr.bf16.mxu1 %v4920_v56  ;;  %v4996_v55 = vld [vmem:[#allocation8 + $0x8] ss:$16 sps:$4 sm:$0xff]   ;;  %v1455_v56 = vpack.c.bf16 %v1322_v54, %v1322_v54  ;;  %v5070_v43 = vld [vmem:[#allocation8 + $0x18c] ss:$16 sps:$4 sm:$0xff]  }
 0x27d   :  { %v5080_v54 = vld [vmem:[#allocation8 + $0x1c8] ss:$16 sps:$4 sm:$0xff]  }
 0x27f   :  { %2166 = vmatpush1.bf16.msra.mxu0 %v4915_v57  ;;  %2248 = vmatpush1.bf16.msra.mxu1 %v4918_v58  ;;  %v5001_v57 = vld [vmem:[#allocation8 + $0x24] ss:$16 sps:$4 sm:$0xff]   ;;  %v5004_v58 = vld [vmem:[#allocation8 + $0x2c] ss:$16 sps:$4 sm:$0xff]  }
 0x280   :  { %2167 = vmatprep.subr.bf16.mxu0 %v4923_v59  ;;  %2249 = vmatprep.subr.bf16.mxu1 %v4926_v60  ;;  %v4999_v59 = vld [vmem:[#allocation8 + $0x20] ss:$16 sps:$4 sm:$0xff]   ;;  %v5002_v60 = vld [vmem:[#allocation8 + $0x28] ss:$16 sps:$4 sm:$0xff]  }
 0x283   :  { %2168 = vmatpush1.bf16.msra.mxu0 %v4921_v61  ;;  %2250 = vmatpush1.bf16.msra.mxu1 %v4924_v39  ;;  %v5007_v61 = vld [vmem:[#allocation8 + $0x44] ss:$16 sps:$4 sm:$0xff]   ;;  %v5010_v39 = vld [vmem:[#allocation8 + $0x4c] ss:$16 sps:$4 sm:$0xff]  }
 0x284   :  { %2169 = vmatprep.subr.bf16.mxu0 %v4929_v62  ;;  %2251 = vmatprep.subr.bf16.mxu1 %v4932_v1  ;;  %v5005_v62 = vld [vmem:[#allocation8 + $0x40] ss:$16 sps:$4 sm:$0xff]   ;;  %v5008_v1 = vld [vmem:[#allocation8 + $0x48] ss:$16 sps:$4 sm:$0xff]  }
 0x287   :  { %2170 = vmatpush1.bf16.msra.mxu0 %v4927_v2  ;;  %2252 = vmatpush1.bf16.msra.mxu1 %v4930_v3  ;;  %v5013_v2 = vld [vmem:[#allocation8 + $0x64] ss:$16 sps:$4 sm:$0xff]   ;;  %v5016_v3 = vld [vmem:[#allocation8 + $0x6c] ss:$16 sps:$4 sm:$0xff]  }
 0x288   :  { %2171 = vmatprep.subr.bf16.mxu0 %v4935_v4  ;;  %2253 = vmatprep.subr.bf16.mxu1 %v4938_v5  ;;  %v5011_v4 = vld [vmem:[#allocation8 + $0x60] ss:$16 sps:$4 sm:$0xff]   ;;  %v5014_v5 = vld [vmem:[#allocation8 + $0x68] ss:$16 sps:$4 sm:$0xff]  }
 0x28b   :  { %2172 = vmatpush1.bf16.msra.mxu0 %v4933_v40  ;;  %2254 = vmatpush1.bf16.msra.mxu1 %v4936_v6  ;;  %v5019_v40 = vld [vmem:[#allocation8 + $0x84] ss:$16 sps:$4 sm:$0xff]   ;;  %v5022_v6 = vld [vmem:[#allocation8 + $0x8c] ss:$16 sps:$4 sm:$0xff]  }
 0x28c   :  { %2173 = vmatprep.subr.bf16.mxu0 %v4941_v7  ;;  %2255 = vmatprep.subr.bf16.mxu1 %v4944_v8  ;;  %v5017_v7 = vld [vmem:[#allocation8 + $0x80] ss:$16 sps:$4 sm:$0xff]   ;;  %v5020_v8 = vld [vmem:[#allocation8 + $0x88] ss:$16 sps:$4 sm:$0xff]  }
 0x28f   :  { %2174 = vmatpush1.bf16.msra.mxu0 %v4939_v9  ;;  %2256 = vmatpush1.bf16.msra.mxu1 %v4942_v63  ;;  %v5025_v9 = vld [vmem:[#allocation8 + $0xa4] ss:$16 sps:$4 sm:$0xff]   ;;  %v5028_v63 = vld [vmem:[#allocation8 + $0xac] ss:$16 sps:$4 sm:$0xff]  }
 0x290   :  { %2175 = vmatprep.subr.bf16.mxu0 %v4947_v10  ;;  %2257 = vmatprep.subr.bf16.mxu1 %v4950_v11  ;;  %v5023_v10 = vld [vmem:[#allocation8 + $0xa0] ss:$16 sps:$4 sm:$0xff]   ;;  %v5026_v11 = vld [vmem:[#allocation8 + $0xa8] ss:$16 sps:$4 sm:$0xff]  }
 0x293   :  { %2176 = vmatpush1.bf16.msra.mxu0 %v4945_v12  ;;  %2258 = vmatpush1.bf16.msra.mxu1 %v4948_v13  ;;  %v5031_v12 = vld [vmem:[#allocation8 + $0xc4] ss:$16 sps:$4 sm:$0xff]   ;;  %v5034_v13 = vld [vmem:[#allocation8 + $0xcc] ss:$16 sps:$4 sm:$0xff]  }
 0x294   :  { %2177 = vmatprep.subr.bf16.mxu0 %v4953_v14  ;;  %2259 = vmatprep.subr.bf16.mxu1 %v4956_v16  ;;  %v5029_v14 = vld [vmem:[#allocation8 + $0xc0] ss:$16 sps:$4 sm:$0xff]   ;;  %v5032_v16 = vld [vmem:[#allocation8 + $0xc8] ss:$16 sps:$4 sm:$0xff]  }
 0x297   :  { %2178 = vmatpush1.bf16.msra.mxu0 %v4951_v17  ;;  %2260 = vmatpush1.bf16.msra.mxu1 %v4954_v18  ;;  %v5037_v17 = vld [vmem:[#allocation8 + $0xe4] ss:$16 sps:$4 sm:$0xff]   ;;  %v5040_v18 = vld [vmem:[#allocation8 + $0xec] ss:$16 sps:$4 sm:$0xff]  }
 0x298   :  { %2179 = vmatprep.subr.bf16.mxu0 %v4959_v19  ;;  %2261 = vmatprep.subr.bf16.mxu1 %v4962_v21  ;;  %v5035_v19 = vld [vmem:[#allocation8 + $0xe0] ss:$16 sps:$4 sm:$0xff]   ;;  %v5038_v21 = vld [vmem:[#allocation8 + $0xe8] ss:$16 sps:$4 sm:$0xff]  }
 0x29b   :  { %2180 = vmatpush1.bf16.msra.mxu0 %v4957_v22  ;;  %2262 = vmatpush1.bf16.msra.mxu1 %v4960_v23  ;;  %v5043_v22 = vld [vmem:[#allocation8 + $0x104] ss:$16 sps:$4 sm:$0xff]   ;;  %v5046_v23 = vld [vmem:[#allocation8 + $0x10c] ss:$16 sps:$4 sm:$0xff]  }
 0x29c   :  { %2181 = vmatprep.subr.bf16.mxu0 %v4965_v24  ;;  %2263 = vmatprep.subr.bf16.mxu1 %v4968_v25  ;;  %v5041_v24 = vld [vmem:[#allocation8 + $0x100] ss:$16 sps:$4 sm:$0xff]   ;;  %v5044_v25 = vld [vmem:[#allocation8 + $0x108] ss:$16 sps:$4 sm:$0xff]  }
 0x29f   :  { %2182 = vmatpush1.bf16.msra.mxu0 %v4963_v26  ;;  %2264 = vmatpush1.bf16.msra.mxu1 %v4966_v27  ;;  %v5049_v26 = vld [vmem:[#allocation8 + $0x124] ss:$16 sps:$4 sm:$0xff]   ;;  %v5052_v27 = vld [vmem:[#allocation8 + $0x12c] ss:$16 sps:$4 sm:$0xff]  }
 0x2a0   :  { %2183 = vmatprep.subr.bf16.mxu0 %v4971_v28  ;;  %2265 = vmatprep.subr.bf16.mxu1 %v4974_v29  ;;  %v5047_v28 = vld [vmem:[#allocation8 + $0x120] ss:$16 sps:$4 sm:$0xff]   ;;  %v5050_v29 = vld [vmem:[#allocation8 + $0x128] ss:$16 sps:$4 sm:$0xff]  }
 0x2a3   :  { %2184 = vmatpush1.bf16.msra.mxu0 %v4969_v30  ;;  %2266 = vmatpush1.bf16.msra.mxu1 %v4972_v31  ;;  %v5055_v30 = vld [vmem:[#allocation8 + $0x144] ss:$16 sps:$4 sm:$0xff]   ;;  %v5058_v31 = vld [vmem:[#allocation8 + $0x14c] ss:$16 sps:$4 sm:$0xff]  }
 0x2a4   :  { %2185 = vmatprep.subr.bf16.mxu0 %v4977_v32  ;;  %2267 = vmatprep.subr.bf16.mxu1 %v4980_v33  ;;  %v5053_v32 = vld [vmem:[#allocation8 + $0x140] ss:$16 sps:$4 sm:$0xff]   ;;  %v5056_v33 = vld [vmem:[#allocation8 + $0x148] ss:$16 sps:$4 sm:$0xff]  }
 0x2a7   :  { %2186 = vmatpush1.bf16.msra.mxu0 %v4975_v35  ;;  %2268 = vmatpush1.bf16.msra.mxu1 %v4978_v36  ;;  %v5064_v35 = vld [vmem:[#allocation8 + $0x16c] ss:$16 sps:$4 sm:$0xff]   ;;  %v5059_v36 = vld [vmem:[#allocation8 + $0x160] ss:$16 sps:$4 sm:$0xff]  }
 0x2a8   :  { %2187 = vmatprep.subr.bf16.mxu0 %v4983_v37  ;;  %2269 = vmatprep.subr.bf16.mxu1 %v4986_v38  ;;  %v5062_v37 = vld [vmem:[#allocation8 + $0x168] ss:$16 sps:$4 sm:$0xff]   ;;  %v5067_v38 = vld [vmem:[#allocation8 + $0x184] ss:$16 sps:$4 sm:$0xff]  }
 0x2ab   :  { %2188 = vmatpush1.bf16.msra.mxu0 %v4981_v44  ;;  %2270 = vmatpush1.bf16.msra.mxu1 %v4984_v45  ;;  %v5065_v44 = vld [vmem:[#allocation8 + $0x180] ss:$16 sps:$4 sm:$0xff]   ;;  %v5068_v45 = vld [vmem:[#allocation8 + $0x188] ss:$16 sps:$4 sm:$0xff]  }
 0x2ac   :  { %2189 = vmatprep.subr.bf16.mxu0 %v4989_v46  ;;  %2271 = vmatprep.subr.bf16.mxu1 %v4992_v47  ;;  %v5073_v46 = vld [vmem:[#allocation8 + $0x1a4] ss:$16 sps:$4 sm:$0xff]   ;;  %v5076_v47 = vld [vmem:[#allocation8 + $0x1ac] ss:$16 sps:$4 sm:$0xff]  }
 0x2af   :  { %2190 = vmatpush1.bf16.msra.mxu0 %v4987_v15  ;;  %2272 = vmatpush1.bf16.msra.mxu1 %v4990_v49  ;;  %v5074_v15 = vld [vmem:[#allocation8 + $0x1a8] ss:$16 sps:$4 sm:$0xff]   ;;  %v5079_v49 = vld [vmem:[#allocation8 + $0x1c4] ss:$16 sps:$4 sm:$0xff]  }
 0x2b0   :  { %3088 = vmatprep.subr.bf16.mxu0 %v4995_v50  ;;  %3170 = vmatprep.subr.bf16.mxu1 %v4998_v51  ;;  %v5082_v50 = vld [vmem:[#allocation8 + $0x1cc] ss:$16 sps:$4 sm:$0xff]   ;;  %v5077_v51 = vld [vmem:[#allocation8 + $0x1c0] ss:$16 sps:$4 sm:$0xff]  }
 0x2b2   :  { %2192 = vmatmul.mubr.bf16.vlgmr.msra.gmra.mrb[8].mxu0 %v1455_v56  ;;  %2274 = vmatmul.mubr.bf16.vlgmr.msra.gmra.mrb[8].mxu1 %v1455_v56  ;;  %v5083_v56 = vld [vmem:[#allocation8 + $0x1e0] ss:$16 sps:$4 sm:$0xff]  }
 0x2b3   :  { %3089 = vmatpush1.bf16.msra.mxu0 %v4993_v20  ;;  %3171 = vmatpush1.bf16.msra.mxu1 %v4996_v55  ;;  %v5085_v20 = vld [vmem:[#allocation8 + $0x1e4] ss:$16 sps:$4 sm:$0xff]   ;;  %v5088_v55 = vld [vmem:[#allocation8 + $0x1ec] ss:$16 sps:$4 sm:$0xff]  }
 0x2b4   :  { %3090 = vmatprep.subr.bf16.mxu0 %v5001_v57  ;;  %3172 = vmatprep.subr.bf16.mxu1 %v5004_v58  ;;  %v5086_v57 = vld [vmem:[#allocation8 + $0x1e8] ss:$16 sps:$4 sm:$0xff]   ;;  %v5091_v58 = vld [vmem:[#allocation8 + $0x204] ss:$16 sps:$4 sm:$0xff]  }
 0x2b7   :  { %3091 = vmatpush1.bf16.msra.mxu0 %v4999_v59  ;;  %3173 = vmatpush1.bf16.msra.mxu1 %v5002_v60  ;;  %v5094_v59 = vld [vmem:[#allocation8 + $0x20c] ss:$16 sps:$4 sm:$0xff]   ;;  %v5581_v60 = vld [vmem:[%s5812_s6] sm:$0xf] }
 0x2b8   :  { %3092 = vmatprep.subr.bf16.mxu0 %v5007_v61  ;;  %3174 = vmatprep.subr.bf16.mxu1 %v5010_v39  ;;  %v1461_v61 = vrot.slane %v5581_v60, %v5540_v41  ;;  %v1465_v39 = vrot.slane %v5581_v60, %v5543_v42 }
 0x2bb   :  { %3093 = vmatpush1.bf16.msra.mxu0 %v5005_v62  ;;  %3175 = vmatpush1.bf16.msra.mxu1 %v5008_v1  ;;  %v1473_v62 = vrot.slane %v5581_v60, %v5550_v52 }
 0x2bc   :  { %3094 = vmatprep.subr.bf16.mxu0 %v5013_v2  ;;  %3176 = vmatprep.subr.bf16.mxu1 %v5016_v3 }
 0x2bf   :  { %3095 = vmatpush1.bf16.msra.mxu0 %v5011_v4  ;;  %3177 = vmatpush1.bf16.msra.mxu1 %v5014_v5 }
 0x2c0   :  { %3096 = vmatprep.subr.bf16.mxu0 %v5019_v40  ;;  %3178 = vmatprep.subr.bf16.mxu1 %v5022_v6 }
 0x2c3   :  { %3097 = vmatpush1.bf16.msra.mxu0 %v5017_v7  ;;  %3179 = vmatpush1.bf16.msra.mxu1 %v5020_v8 }
 0x2c4   :  { %3098 = vmatprep.subr.bf16.mxu0 %v5025_v9  ;;  %3180 = vmatprep.subr.bf16.mxu1 %v5028_v63 }
 0x2c7   :  { %3099 = vmatpush1.bf16.msra.mxu0 %v5023_v10  ;;  %3181 = vmatpush1.bf16.msra.mxu1 %v5026_v11 }
 0x2c8   :  { %3100 = vmatprep.subr.bf16.mxu0 %v5031_v12  ;;  %3182 = vmatprep.subr.bf16.mxu1 %v5034_v13 }
 0x2cb   :  { %3101 = vmatpush1.bf16.msra.mxu0 %v5029_v14  ;;  %3183 = vmatpush1.bf16.msra.mxu1 %v5032_v16 }
 0x2cc   :  { %3102 = vmatprep.subr.bf16.mxu0 %v5037_v17  ;;  %3184 = vmatprep.subr.bf16.mxu1 %v5040_v18  ;;  %v5089_v17 = vld [vmem:[#allocation8 + $0x200] ss:$16 sps:$4 sm:$0xff]   ;;  %v5092_v18 = vld [vmem:[#allocation8 + $0x208] ss:$16 sps:$4 sm:$0xff]  }
 0x2cf   :  { %3103 = vmatpush1.bf16.msra.mxu0 %v5035_v19  ;;  %3185 = vmatpush1.bf16.msra.mxu1 %v5038_v21 }
 0x2d0   :  { %3104 = vmatprep.subr.bf16.mxu0 %v5043_v22  ;;  %3186 = vmatprep.subr.bf16.mxu1 %v5046_v23  ;;  %v5097_v22 = vld [vmem:[#allocation8 + $0x224] ss:$16 sps:$4 sm:$0xff]   ;;  %v5100_v23 = vld [vmem:[#allocation8 + $0x22c] ss:$16 sps:$4 sm:$0xff]  }
 0x2d3   :  { %3105 = vmatpush1.bf16.msra.mxu0 %v5041_v24  ;;  %3187 = vmatpush1.bf16.msra.mxu1 %v5044_v25  ;;  %v5095_v25 = vld [vmem:[#allocation8 + $0x220] ss:$16 sps:$4 sm:$0xff]  }
 0x2d4   :  { %3106 = vmatprep.subr.bf16.mxu0 %v5049_v26  ;;  %3188 = vmatprep.subr.bf16.mxu1 %v5052_v27  ;;  %v5098_v26 = vld [vmem:[#allocation8 + $0x228] ss:$16 sps:$4 sm:$0xff]   ;;  %v5103_v27 = vld [vmem:[#allocation8 + $0x244] ss:$16 sps:$4 sm:$0xff]  }
 0x2d7   :  { %3107 = vmatpush1.bf16.msra.mxu0 %v5047_v28  ;;  %3189 = vmatpush1.bf16.msra.mxu1 %v5050_v29  ;;  %v5106_v28 = vld [vmem:[#allocation8 + $0x24c] ss:$16 sps:$4 sm:$0xff]   ;;  %v5101_v29 = vld [vmem:[#allocation8 + $0x240] ss:$16 sps:$4 sm:$0xff]  }
 0x2d8   :  { %3108 = vmatprep.subr.bf16.mxu0 %v5055_v30  ;;  %3190 = vmatprep.subr.bf16.mxu1 %v5058_v31  ;;  %v5104_v30 = vld [vmem:[#allocation8 + $0x248] ss:$16 sps:$4 sm:$0xff]   ;;  %v5109_v31 = vld [vmem:[#allocation8 + $0x264] ss:$16 sps:$4 sm:$0xff]  }
 0x2db   :  { %3109 = vmatpush1.bf16.msra.mxu0 %v5053_v32  ;;  %3191 = vmatpush1.bf16.msra.mxu1 %v5056_v33  ;;  %v5112_v32 = vld [vmem:[#allocation8 + $0x26c] ss:$16 sps:$4 sm:$0xff]   ;;  %v5107_v33 = vld [vmem:[#allocation8 + $0x260] ss:$16 sps:$4 sm:$0xff]  }
 0x2dc   :  { %3110 = vmatprep.subr.bf16.mxu0 %v5061_v34  ;;  %3192 = vmatprep.subr.bf16.mxu1 %v5064_v35  ;;  %v5110_v34 = vld [vmem:[#allocation8 + $0x268] ss:$16 sps:$4 sm:$0xff]   ;;  %v5115_v35 = vld [vmem:[#allocation8 + $0x284] ss:$16 sps:$4 sm:$0xff]  }
 0x2df   :  { %3111 = vmatpush1.bf16.msra.mxu0 %v5059_v36  ;;  %3193 = vmatpush1.bf16.msra.mxu1 %v5062_v37  ;;  %v5118_v36 = vld [vmem:[#allocation8 + $0x28c] ss:$16 sps:$4 sm:$0xff]   ;;  %v5113_v37 = vld [vmem:[#allocation8 + $0x280] ss:$16 sps:$4 sm:$0xff]  }
 0x2e0   :  { %3112 = vmatprep.subr.bf16.mxu0 %v5067_v38  ;;  %3194 = vmatprep.subr.bf16.mxu1 %v5070_v43  ;;  %v5116_v38 = vld [vmem:[#allocation8 + $0x288] ss:$16 sps:$4 sm:$0xff]   ;;  %v5121_v43 = vld [vmem:[#allocation8 + $0x2a4] ss:$16 sps:$4 sm:$0xff]  }
 0x2e3   :  { %3113 = vmatpush1.bf16.msra.mxu0 %v5065_v44  ;;  %3195 = vmatpush1.bf16.msra.mxu1 %v5068_v45  ;;  %v5124_v44 = vld [vmem:[#allocation8 + $0x2ac] ss:$16 sps:$4 sm:$0xff]   ;;  %v5119_v45 = vld [vmem:[#allocation8 + $0x2a0] ss:$16 sps:$4 sm:$0xff]  }
 0x2e4   :  { %3114 = vmatprep.subr.bf16.mxu0 %v5073_v46  ;;  %3196 = vmatprep.subr.bf16.mxu1 %v5076_v47  ;;  %v5122_v46 = vld [vmem:[#allocation8 + $0x2a8] ss:$16 sps:$4 sm:$0xff]   ;;  %v5127_v47 = vld [vmem:[#allocation8 + $0x2c4] ss:$16 sps:$4 sm:$0xff]  }
 0x2e7   :  { %3115 = vmatpush1.bf16.msra.mxu0 %v5071_v48  ;;  %3197 = vmatpush1.bf16.msra.mxu1 %v5074_v15  ;;  %v5130_v48 = vld [vmem:[#allocation8 + $0x2cc] ss:$16 sps:$4 sm:$0xff]   ;;  %v5125_v15 = vld [vmem:[#allocation8 + $0x2c0] ss:$16 sps:$4 sm:$0xff]  }
 0x2e8   :  { %3116 = vmatprep.subr.bf16.mxu0 %v5079_v49  ;;  %3198 = vmatprep.subr.bf16.mxu1 %v5082_v50  ;;  %v5128_v49 = vld [vmem:[#allocation8 + $0x2c8] ss:$16 sps:$4 sm:$0xff]   ;;  %v5133_v50 = vld [vmem:[#allocation8 + $0x2e4] ss:$16 sps:$4 sm:$0xff]  }
 0x2eb   :  { %3117 = vmatpush1.bf16.msra.mxu0 %v5077_v51  ;;  %3199 = vmatpush1.bf16.msra.mxu1 %v5080_v54  ;;  %v5136_v51 = vld [vmem:[#allocation8 + $0x2ec] ss:$16 sps:$4 sm:$0xff]   ;;  %v5131_v54 = vld [vmem:[#allocation8 + $0x2e0] ss:$16 sps:$4 sm:$0xff]  }
 0x2ec   :  { %3118 = vmatprep.subr.bf16.mxu0 %v5085_v20  ;;  %3200 = vmatprep.subr.bf16.mxu1 %v5088_v55  ;;  %v5134_v20 = vld [vmem:[#allocation8 + $0x2e8] ss:$16 sps:$4 sm:$0xff]   ;;  %v5139_v55 = vld [vmem:[#allocation8 + $0x304] ss:$16 sps:$4 sm:$0xff]  }
 0x2ef   :  { %3119 = vmatpush1.bf16.msra.mxu0 %v5083_v56  ;;  %3201 = vmatpush1.bf16.msra.mxu1 %v5086_v57  ;;  %v5142_v56 = vld [vmem:[#allocation8 + $0x30c] ss:$16 sps:$4 sm:$0xff]   ;;  %v5137_v57 = vld [vmem:[#allocation8 + $0x300] ss:$16 sps:$4 sm:$0xff]  }
 0x2f0   :  { %3129 = vmatprep.subr.bf16.mxu0 %v5091_v58  ;;  %3211 = vmatprep.subr.bf16.mxu1 %v5094_v59  ;;  %v5140_v58 = vld [vmem:[#allocation8 + $0x308] ss:$16 sps:$4 sm:$0xff]   ;;  %v5145_v59 = vld [vmem:[#allocation8 + $0x324] ss:$16 sps:$4 sm:$0xff]  }
 0x385   :  { %v2193_v1 = vpop.f32.mrb[8].mxu0  ;;  %v5589_v2 = vpop.f32.mrb[8].mxu1 }
 0x386   :  { %v4566_v3 = vadd.f32 %v2193_v1, %v1461_v61  ;;  %v2195_v4 = vpop.f32.mrb[9].mxu0  ;;  %v2277_v5 = vpop.f32.mrb[9].mxu1  ;;  %v5148_v61 = vld [vmem:[#allocation8 + $0x32c] ss:$16 sps:$4 sm:$0xff]   ;;  %v5151_v1 = vld [vmem:[#allocation8 + $0x344] ss:$16 sps:$4 sm:$0xff]  }
 0x387   :  { %v4567_v40 = vadd.f32 %v2195_v4, %v1465_v39  ;;  %v4569_v6 = vadd.f32 %v2277_v5, %v1473_v62  ;;  %v2197_v7 = vpop.f32.mrb[10].mxu0  ;;  %v2279_v8 = vpop.f32.mrb[10].mxu1  ;;  %v5143_v39 = vld [vmem:[#allocation8 + $0x320] ss:$16 sps:$4 sm:$0xff]   ;;  %v5146_v62 = vld [vmem:[#allocation8 + $0x328] ss:$16 sps:$4 sm:$0xff]  }
 0x388   :  { %vm2282_vm8 = vcmp.ge.f32.partialorder %v4566_v3, 0.0  ;;  %v2286_v9 = vmul.f32 0.2, %v4566_v3  ;;  %v2198_v12 = vpop.f32.mrb[11].mxu0  ;;  %v2280_v13 = vpop.f32.mrb[11].mxu1 }
 0x389   :  { %vm2283_vm9 = vcmp.ge.f32.partialorder %v4567_v40, 0.0  ;;  %v2287_v63 = vmul.f32 0.2, %v4567_v40  ;;  %vm2285_vm10 = vcmp.ge.f32.partialorder %v4569_v6, 0.0  ;;  %v2289_v10 = vmul.f32 0.2, %v4569_v6 }
 0x38a   :  { %v2290_v11 = vsel %vm2282_vm8, %v4566_v3, %v2286_v9  ;;  %v5154_v3 = vld [vmem:[#allocation8 + $0x34c] ss:$16 sps:$4 sm:$0xff]   ;;  %v5149_v4 = vld [vmem:[#allocation8 + $0x340] ss:$16 sps:$4 sm:$0xff]   ;;  %v5152_v5 = vld [vmem:[#allocation8 + $0x348] ss:$16 sps:$4 sm:$0xff]  }
 0x38b   :  { %v2291_v14 = vsel %vm2283_vm9, %v4567_v40, %v2287_v63  ;;  %v2293_v19 = vsel %vm2285_vm10, %v4569_v6, %v2289_v10  ;;  %v2423_v21 = vpack.c.bf16 %v2290_v11, %v2290_v11  ;;  %v5157_v40 = vld [vmem:[#allocation8 + $0x364] ss:$16 sps:$4 sm:$0xff]   ;;  %v5160_v6 = vld [vmem:[#allocation8 + $0x36c] ss:$16 sps:$4 sm:$0xff]   ;;  %v5155_v7 = vld [vmem:[#allocation8 + $0x360] ss:$16 sps:$4 sm:$0xff]  }
 0x38c   :  { %v2424_v16 = vpack.c.bf16 %v2291_v14, %v2291_v14  ;;  %v2426_v24 = vpack.c.bf16 %v2293_v19, %v2293_v19  ;;  %v5158_v8 = vld [vmem:[#allocation8 + $0x368] ss:$16 sps:$4 sm:$0xff]   ;;  %v5163_v9 = vld [vmem:[#allocation8 + $0x384] ss:$16 sps:$4 sm:$0xff]   ;;  %v5166_v63 = vld [vmem:[#allocation8 + $0x38c] ss:$16 sps:$4 sm:$0xff]   ;;  %v1469_v14 = vrot.slane %v5581_v60, %v5557_v53 }
 0x38d   :  { %v5161_v10 = vld [vmem:[#allocation8 + $0x380] ss:$16 sps:$4 sm:$0xff]   ;;  %v5164_v11 = vld [vmem:[#allocation8 + $0x388] ss:$16 sps:$4 sm:$0xff]   ;;  %v5169_v12 = vld [vmem:[#allocation8 + $0x3a4] ss:$16 sps:$4 sm:$0xff]  }
 0x38e   :  { %3120 = vmatprep.mubr.bf16.mxu0 %v2424_v16  ;;  %3202 = vmatprep.mubr.bf16.mxu1 %v2424_v16  ;;  %v5172_v13 = vld [vmem:[#allocation8 + $0x3ac] ss:$16 sps:$4 sm:$0xff]   ;;  %v5167_v16 = vld [vmem:[#allocation8 + $0x3a0] ss:$16 sps:$4 sm:$0xff]  }
 0x38f   :  { %3121 = vmatmul.mubr.bf16.vlgmr.msra.gmra.mrb[12].mxu0 %v2423_v21  ;;  %3203 = vmatmul.mubr.bf16.vlgmr.msra.gmra.mrb[12].mxu1 %v2423_v21  ;;  %v5178_v19 = vld [vmem:[#allocation8 + $0x3cc] ss:$16 sps:$4 sm:$0xff]   ;;  %v4568_v21 = vadd.f32 %v5589_v2, %v1469_v14  ;;  %v5179_v60 = vld [vmem:[#allocation8 + $0x3e0] ss:$16 sps:$4 sm:$0xff]  }
 0x390   :  { %3130 = vmatpush1.bf16.msra.mxu0 %v5089_v17  ;;  %3212 = vmatpush1.bf16.msra.mxu1 %v5092_v18  ;;  %v5170_v17 = vld [vmem:[#allocation8 + $0x3a8] ss:$16 sps:$4 sm:$0xff]   ;;  %v5175_v18 = vld [vmem:[#allocation8 + $0x3c4] ss:$16 sps:$4 sm:$0xff]  }
 0x391   :  { %3161 = vmatprep.mubr.bf16.mxu0 %v2426_v24  ;;  %3243 = vmatprep.mubr.bf16.mxu1 %v2426_v24  ;;  %v5181_v24 = vld [vmem:[#allocation8 + $0x3e4] ss:$16 sps:$4 sm:$0xff]   ;;  %vm2284_vm11 = vcmp.ge.f32.partialorder %v4568_v21, 0.0 }
 0x392   :  { %3131 = vmatprep.subr.bf16.mxu0 %v5097_v22  ;;  %3213 = vmatprep.subr.bf16.mxu1 %v5100_v23  ;;  %v5173_v22 = vld [vmem:[#allocation8 + $0x3c0] ss:$16 sps:$4 sm:$0xff]   ;;  %v5176_v23 = vld [vmem:[#allocation8 + $0x3c8] ss:$16 sps:$4 sm:$0xff]  }
 0x393   :  { %v5185_v2 = vld [vmem:[%s5815_s9 + $0x40] sm:$0xff]  }
 0x394   :  { %3132 = vmatpush1.bf16.msra.mxu0 %v5095_v25  ;;  %3214 = vmatpush1.bf16.msra.mxu1 %v5098_v26  ;;  %v5184_v25 = vld [vmem:[#allocation8 + $0x3ec] ss:$16 sps:$4 sm:$0xff]   ;;  %v2288_v26 = vmul.f32 0.2, %v4568_v21 }
 0x395   :  { %3133 = vmatprep.subr.bf16.mxu0 %v5103_v27  ;;  %3215 = vmatprep.subr.bf16.mxu1 %v5106_v28  ;;  %v5182_v27 = vld [vmem:[#allocation8 + $0x3e8] ss:$16 sps:$4 sm:$0xff]   ;;  %v5186_v28 = vld [vmem:[%s5815_s9 + $0xc0] sm:$0xff]  }
 0x398   :  { %3134 = vmatpush1.bf16.msra.mxu0 %v5101_v29  ;;  %3216 = vmatpush1.bf16.msra.mxu1 %v5104_v30  ;;  %v2292_v29 = vsel %vm2284_vm11, %v4568_v21, %v2288_v26  ;;  %v5187_v30 = vld [vmem:[%s5815_s9] sm:$0xff]  }
 0x399   :  { %3135 = vmatprep.subr.bf16.mxu0 %v5109_v31  ;;  %3217 = vmatprep.subr.bf16.mxu1 %v5112_v32  ;;  %v5188_v31 = vld [vmem:[%s5815_s9 + $0x80] sm:$0xff]   ;;  %v2425_v32 = vpack.c.bf16 %v2292_v29, %v2292_v29 }
 0x39a   :  { %v5219_v29 = vld [vmem:[%s5819_s13] sm:$0xff]  }
 0x39c   :  { %3136 = vmatpush1.bf16.msra.mxu0 %v5107_v33  ;;  %3218 = vmatpush1.bf16.msra.mxu1 %v5110_v34  ;;  %v5189_v33 = vld [vmem:[%s5815_s9 + $0x48] sm:$0xff]  }
 0x39d   :  { %3137 = vmatprep.subr.bf16.mxu0 %v5115_v35  ;;  %3219 = vmatprep.subr.bf16.mxu1 %v5118_v36  ;;  %v5190_v34 = vld [vmem:[%s5815_s9 + $0xc8] sm:$0xff]  }
 0x39e   :  { %v5191_v35 = vld [vmem:[%s5815_s9 + $0x8] sm:$0xff]  }
 0x39f   :  { %v5192_v36 = vld [vmem:[%s5815_s9 + $0x88] sm:$0xff]  }
 0x3a0   :  { %3138 = vmatpush1.bf16.msra.mxu0 %v5113_v37  ;;  %3220 = vmatpush1.bf16.msra.mxu1 %v5116_v38  ;;  %v5193_v37 = vld [vmem:[%s5815_s9 + $0x50] sm:$0xff]  }
 0x3a1   :  { %3139 = vmatprep.subr.bf16.mxu0 %v5121_v43  ;;  %3221 = vmatprep.subr.bf16.mxu1 %v5124_v44  ;;  %v5194_v38 = vld [vmem:[%s5815_s9 + $0xd0] sm:$0xff]  }
 0x3a2   :  { %v5195_v43 = vld [vmem:[%s5815_s9 + $0x10] sm:$0xff]  }
 0x3a3   :  { %v5196_v44 = vld [vmem:[%s5815_s9 + $0x90] sm:$0xff]  }
 0x3a4   :  { %3140 = vmatpush1.bf16.msra.mxu0 %v5119_v45  ;;  %3222 = vmatpush1.bf16.msra.mxu1 %v5122_v46  ;;  %v5197_v45 = vld [vmem:[%s5815_s9 + $0x58] sm:$0xff]  }
 0x3a5   :  { %3141 = vmatprep.subr.bf16.mxu0 %v5127_v47  ;;  %3223 = vmatprep.subr.bf16.mxu1 %v5130_v48  ;;  %v5198_v46 = vld [vmem:[%s5815_s9 + $0xd8] sm:$0xff]  }
 0x3a6   :  { %v5199_v47 = vld [vmem:[%s5815_s9 + $0x18] sm:$0xff]  }
 0x3a7   :  { %v5200_v48 = vld [vmem:[%s5815_s9 + $0x98] sm:$0xff]  }
 0x3a8   :  { %3142 = vmatpush1.bf16.msra.mxu0 %v5125_v15  ;;  %3224 = vmatpush1.bf16.msra.mxu1 %v5128_v49  ;;  %v5201_v15 = vld [vmem:[%s5815_s9 + $0x60] sm:$0xff]  }
 0x3a9   :  { %3143 = vmatprep.subr.bf16.mxu0 %v5133_v50  ;;  %3225 = vmatprep.subr.bf16.mxu1 %v5136_v51  ;;  %v5202_v49 = vld [vmem:[%s5815_s9 + $0xe0] sm:$0xff]  }
 0x3aa   :  { %v5203_v50 = vld [vmem:[%s5815_s9 + $0x20] sm:$0xff]  }
 0x3ab   :  { %v5204_v51 = vld [vmem:[%s5815_s9 + $0xa0] sm:$0xff]  }
 0x3ac   :  { %3144 = vmatpush1.bf16.msra.mxu0 %v5131_v54  ;;  %3226 = vmatpush1.bf16.msra.mxu1 %v5134_v20  ;;  %v5205_v54 = vld [vmem:[%s5815_s9 + $0x68] sm:$0xff]  }
 0x3ad   :  { %3145 = vmatprep.subr.bf16.mxu0 %v5139_v55  ;;  %3227 = vmatprep.subr.bf16.mxu1 %v5142_v56  ;;  %v5206_v20 = vld [vmem:[%s5815_s9 + $0xe8] sm:$0xff]  }
 0x3ae   :  { %v5207_v55 = vld [vmem:[%s5815_s9 + $0x28] sm:$0xff]  }
 0x3af   :  { %v5208_v56 = vld [vmem:[%s5815_s9 + $0xa8] sm:$0xff]  }
 0x3b0   :  { %3146 = vmatpush1.bf16.msra.mxu0 %v5137_v57  ;;  %3228 = vmatpush1.bf16.msra.mxu1 %v5140_v58  ;;  %v5209_v57 = vld [vmem:[%s5815_s9 + $0x70] sm:$0xff]  }
 0x3b1   :  { %3147 = vmatprep.subr.bf16.mxu0 %v5145_v59  ;;  %3229 = vmatprep.subr.bf16.mxu1 %v5148_v61  ;;  %v5210_v58 = vld [vmem:[%s5815_s9 + $0xf0] sm:$0xff]  }
 0x3b2   :  { %v5211_v59 = vld [vmem:[%s5815_s9 + $0x30] sm:$0xff]  }
 0x3b3   :  { %v5212_v61 = vld [vmem:[%s5815_s9 + $0xb0] sm:$0xff]  }
 0x3b4   :  { %3148 = vmatpush1.bf16.msra.mxu0 %v5143_v39  ;;  %3230 = vmatpush1.bf16.msra.mxu1 %v5146_v62  ;;  %v5213_v39 = vld [vmem:[%s5815_s9 + $0x78] sm:$0xff]  }
 0x3b5   :  { %3149 = vmatprep.subr.bf16.mxu0 %v5151_v1  ;;  %3231 = vmatprep.subr.bf16.mxu1 %v5154_v3  ;;  %v5214_v62 = vld [vmem:[%s5815_s9 + $0xf8] sm:$0xff]  }
 0x3b6   :  { %v5215_v1 = vld [vmem:[%s5815_s9 + $0x38] sm:$0xff]  }
 0x3b7   :  { %v5216_v3 = vld [vmem:[%s5815_s9 + $0xb8] sm:$0xff]  }
 0x3b8   :  { %3150 = vmatpush1.bf16.msra.mxu0 %v5149_v4  ;;  %3232 = vmatpush1.bf16.msra.mxu1 %v5152_v5  ;;  %v2422_v4 = vld [vmem:[%s5814_s8] sm:$0xf] }
 0x3b9   :  { %3151 = vmatprep.subr.bf16.mxu0 %v5157_v40  ;;  %3233 = vmatprep.subr.bf16.mxu1 %v5160_v6  ;;  %v2431_v5 = vrot.slane %v2422_v4, %v5540_v41  ;;  %v2439_v40 = vrot.slane %v2422_v4, %v5557_v53  ;;  %v2435_v6 = vrot.slane %v2422_v4, %v5543_v42 }
 0x3bc   :  { %3152 = vmatpush1.bf16.msra.mxu0 %v5155_v7  ;;  %3234 = vmatpush1.bf16.msra.mxu1 %v5158_v8  ;;  %v2443_v7 = vrot.slane %v2422_v4, %v5550_v52  ;;  %v4362_v4 = vld [vmem:[%s5818_s12] ss:$0 sm:$0xff] }
 0x3bd   :  { %3153 = vmatprep.subr.bf16.mxu0 %v5163_v9  ;;  %3235 = vmatprep.subr.bf16.mxu1 %v5166_v63 }
 0x3c0   :  { %3154 = vmatpush1.bf16.msra.mxu0 %v5161_v10  ;;  %3236 = vmatpush1.bf16.msra.mxu1 %v5164_v11 }
 0x3c1   :  { %3155 = vmatprep.subr.bf16.mxu0 %v5169_v12  ;;  %3237 = vmatprep.subr.bf16.mxu1 %v5172_v13 }
 0x3c4   :  { %3156 = vmatpush1.bf16.msra.mxu0 %v5167_v16  ;;  %3238 = vmatpush1.bf16.msra.mxu1 %v5170_v17 }
 0x3c5   :  { %3157 = vmatprep.subr.bf16.mxu0 %v5175_v18  ;;  %3239 = vmatprep.subr.bf16.mxu1 %v5178_v19 }
 0x3c8   :  { %3158 = vmatpush1.bf16.msra.mxu0 %v5173_v22  ;;  %3240 = vmatpush1.bf16.msra.mxu1 %v5176_v23 }
 0x3c9   :  { %3159 = vmatprep.subr.bf16.mxu0 %v5181_v24  ;;  %3241 = vmatprep.subr.bf16.mxu1 %v5184_v25 }
 0x3cc   :  { %3160 = vmatpush1.bf16.msra.mxu0 %v5179_v60  ;;  %3242 = vmatpush1.bf16.msra.mxu1 %v5182_v27 }
 0x3cd   :  { %4385 = vmatprep.subr.bf16.mxu0 %v5185_v2  ;;  %4407 = vmatprep.subr.bf16.mxu1 %v5186_v28  ;;  %v5217_v2 = vld [vmem:[%s5817_s11] sm:$0xff]   ;;  %v5218_v28 = vld [vmem:[%s5817_s11 + $0x8] sm:$0xff]  }
 0x3cf   :  { %3162 = vmatmul.mubr.bf16.vlgmr.msra.gmra.mrb[12].mxu0 %v2425_v32  ;;  %3244 = vmatmul.mubr.bf16.vlgmr.msra.gmra.mrb[12].mxu1 %v2425_v32  ;;  %v5222_v32 = vld [vmem:[%s5819_s13 + $0x18] sm:$0xff]  }
 0x3d0   :  { %4386 = vmatpush3.bf16.msra.mxu0 %v5187_v30  ;;  %4408 = vmatpush3.bf16.msra.mxu1 %v5188_v31  ;;  %v5220_v30 = vld [vmem:[%s5819_s13 + $0x8] sm:$0xff]   ;;  %v5221_v31 = vld [vmem:[%s5819_s13 + $0x10] sm:$0xff]  }
 0x3d1   :  { %4387 = vmatprep.subr.bf16.mxu0 %v5189_v33  ;;  %4409 = vmatprep.subr.bf16.mxu1 %v5190_v34  ;;  %v5223_v33 = vld [vmem:[%s5819_s13 + $0x20] sm:$0xff]   ;;  %v5224_v34 = vld [vmem:[%s5819_s13 + $0x28] sm:$0xff]  }
 0x3d4   :  { %4388 = vmatpush3.bf16.msra.mxu0 %v5191_v35  ;;  %4410 = vmatpush3.bf16.msra.mxu1 %v5192_v36 }
 0x3d5   :  { %4389 = vmatprep.subr.bf16.mxu0 %v5193_v37  ;;  %4411 = vmatprep.subr.bf16.mxu1 %v5194_v38  ;;  %v4328_v37 = vld [vmem:[%s5816_s10] ss:$0 sm:$0xff] }
 0x3d8   :  { %4390 = vmatpush3.bf16.msra.mxu0 %v5195_v43  ;;  %4412 = vmatpush3.bf16.msra.mxu1 %v5196_v44 }
 0x3d9   :  { %4391 = vmatprep.subr.bf16.mxu0 %v5197_v45  ;;  %4413 = vmatprep.subr.bf16.mxu1 %v5198_v46 }
 0x3dc   :  { %4392 = vmatpush3.bf16.msra.mxu0 %v5199_v47  ;;  %4414 = vmatpush3.bf16.msra.mxu1 %v5200_v48 }
 0x3dd   :  { %4393 = vmatprep.subr.bf16.mxu0 %v5201_v15  ;;  %4415 = vmatprep.subr.bf16.mxu1 %v5202_v49 }
 0x3e0   :  { %4394 = vmatpush3.bf16.msra.mxu0 %v5203_v50  ;;  %4416 = vmatpush3.bf16.msra.mxu1 %v5204_v51 }
 0x3e1   :  { %4395 = vmatprep.subr.bf16.mxu0 %v5205_v54  ;;  %4417 = vmatprep.subr.bf16.mxu1 %v5206_v20 }
 0x3e4   :  { %4396 = vmatpush3.bf16.msra.mxu0 %v5207_v55  ;;  %4418 = vmatpush3.bf16.msra.mxu1 %v5208_v56 }
 0x3e5   :  { %4397 = vmatprep.subr.bf16.mxu0 %v5209_v57  ;;  %4419 = vmatprep.subr.bf16.mxu1 %v5210_v58  ;;  %v5225_v57 = vld [vmem:[%s5819_s13 + $0x30] sm:$0xff]   ;;  %v5226_v58 = vld [vmem:[%s5819_s13 + $0x38] sm:$0xff]  }
 0x3e8   :  { %4398 = vmatpush3.bf16.msra.mxu0 %v5211_v59  ;;  %4420 = vmatpush3.bf16.msra.mxu1 %v5212_v61  ;;  %v5227_v59 = vld [vmem:[%s5821_s15] sm:$0xff]   ;;  %v5228_v61 = vld [vmem:[%s5821_s15 + $0x8] sm:$0xff]  }
 0x3e9   :  { %4399 = vmatprep.subr.bf16.mxu0 %v5213_v39  ;;  %4421 = vmatprep.subr.bf16.mxu1 %v5214_v62  ;;  %v5229_v39 = vld [vmem:[%s5821_s15 + $0x10] sm:$0xff]   ;;  %v5230_v62 = vld [vmem:[%s5821_s15 + $0x18] sm:$0xff]  }
 0x3ec   :  { %4400 = vmatpush3.bf16.msra.mxu0 %v5215_v1  ;;  %4422 = vmatpush3.bf16.msra.mxu1 %v5216_v3  ;;  %v5231_v1 = vld [vmem:[%s5821_s15 + $0x20] sm:$0xff]   ;;  %v5232_v3 = vld [vmem:[%s5821_s15 + $0x28] sm:$0xff]  }
 0x3ed   :  { %4450 = vmatprep.subr.bf16.mxu0 %v5369_v0  ;;  %4458 = vmatprep.subr.bf16.mxu1 %v5369_v0 }
 0x4a2   :  { %v3163_v8 = vpop.f32.mrb[12].mxu0  ;;  %v3245_v9 = vpop.f32.mrb[12].mxu1 }
 0x4a3   :  { %v4570_v63 = vadd.f32 %v3163_v8, %v2431_v5  ;;  %v4572_v10 = vadd.f32 %v3245_v9, %v2439_v40  ;;  %v3165_v11 = vpop.f32.mrb[13].mxu0  ;;  %v3247_v12 = vpop.f32.mrb[13].mxu1 }
 0x4a4   :  { %v4571_v13 = vadd.f32 %v3165_v11, %v2435_v6  ;;  %v4573_v14 = vadd.f32 %v3247_v12, %v2443_v7  ;;  %v3167_v16 = vpop.f32.mrb[14].mxu0  ;;  %v3249_v17 = vpop.f32.mrb[14].mxu1  ;;  %v5233_v11 = vld [vmem:[%s5821_s15 + $0x30] sm:$0xff]   ;;  %v5234_v12 = vld [vmem:[%s5821_s15 + $0x38] sm:$0xff]  }
 0x4a5   :  { %vm3252_vm12 = vcmp.ge.f32.partialorder %v4570_v63, 0.0  ;;  %v3256_v18 = vmul.f32 0.2, %v4570_v63  ;;  %vm3254_vm13 = vcmp.ge.f32.partialorder %v4572_v10, 0.0  ;;  %v3258_v41 = vmul.f32 0.2, %v4572_v10 }
 0x4a6   :  { %vm3253_vm14 = vcmp.ge.f32.partialorder %v4571_v13, 0.0  ;;  %v3257_v53 = vmul.f32 0.2, %v4571_v13  ;;  %vm3255_vm15 = vcmp.ge.f32.partialorder %v4573_v14, 0.0  ;;  %v3259_v42 = vmul.f32 0.2, %v4573_v14 }
 0x4a7   :  { %v3260_v19 = vsel %vm3252_vm12, %v4570_v63, %v3256_v18  ;;  %v3262_v52 = vsel %vm3254_vm13, %v4572_v10, %v3258_v41  ;;  %v3168_v21 = vpop.f32.mrb[15].mxu0  ;;  %v3250_v22 = vpop.f32.mrb[15].mxu1 }
 0x4a8   :  { %v3261_v23 = vsel %vm3253_vm14, %v4571_v13, %v3257_v53  ;;  %v3263_v24 = vsel %vm3255_vm15, %v4573_v14, %v3259_v42  ;;  %v3329_v60 = vpack.c.bf16 %v3260_v19, %v3260_v19  ;;  %v3331_v27 = vpack.c.bf16 %v3262_v52, %v3262_v52  ;;  %v4366_v13 = vld [vmem:[%s5820_s14] ss:$0 sm:$0xff]  ;;  %s5371_s14 = smov [#allocation10]  }
 0x4a9   :  { %v3330_v25 = vpack.c.bf16 %v3261_v23, %v3261_v23  ;;  %v3332_v26 = vpack.c.bf16 %v3263_v24, %v3263_v24  ;;  %s3933_s15 = sshll.u32 %s5371_s14, 4  ;;  %s3934_s15 = int_to_ptr.vmem [resolvable:$true] %s3933_s15 }
 0x4aa   :  { %p5336_p5 = scmp.lt.s32.totalorder %s3934_s15, %s3934_s15 }
 0x4ab   :  { %3563 = vmatprep.mubr.bf16.mxu0 %v3330_v25  ;;  %3603 = vmatprep.mubr.bf16.mxu1 %v3332_v26 }
 0x4ac   :  { %3564 = vmatmul.mubr.bf16.vlgmr.msra.gmra.mrb[16].mxu0 %v3329_v60  ;;  %3604 = vmatmul.mubr.bf16.vlgmr.msra.gmra.mrb[16].mxu1 %v3331_v27 }
 0x4ad   :  { %4451 = vmatpush3.bf16.msra.mxu0 %v5217_v2  ;;  %4454 = vmatprep.mubr.msk.bf16.mxu0 %vm5370_vm0, %v5369_v0 }
 0x4ae   :  { %4452 = vmatprep.subr.bf16.mxu0 %v5369_v0  ;;  %4474 = vmatprep.mubr.msk.bf16.mxu1 %vm5370_vm0, %v5369_v0 }
 0x4af   :  { %4459 = vmatpush3.bf16.msra.mxu1 %v5219_v29 }
 0x4b0   :  { %4460 = vmatprep.subr.bf16.mxu1 %v5369_v0 }
 0x4b1   :  { %4453 = vmatpush3.bf16.msra.mxu0 %v5218_v28 }
 0x4b2   :  { %4478 = vmatprep.subr.bf16.mxu0 %v5369_v0 }
 0x4b3   :  { %4461 = vmatpush3.bf16.msra.mxu1 %v5220_v30 }
 0x4b4   :  { %4462 = vmatprep.subr.bf16.mxu1 %v5369_v0 }
 0x4b7   :  { %4463 = vmatpush3.bf16.msra.mxu1 %v5221_v31 }
 0x4b8   :  { %4464 = vmatprep.subr.bf16.mxu1 %v5369_v0 }
 0x4bb   :  { %4465 = vmatpush3.bf16.msra.mxu1 %v5222_v32 }
 0x4bc   :  { %4466 = vmatprep.subr.bf16.mxu1 %v5369_v0 }
 0x4bf   :  { %4467 = vmatpush3.bf16.msra.mxu1 %v5223_v33 }
 0x4c0   :  { %4468 = vmatprep.subr.bf16.mxu1 %v5369_v0 }
 0x4c3   :  { %4469 = vmatpush3.bf16.msra.mxu1 %v5224_v34 }
 0x4c4   :  { %4470 = vmatprep.subr.bf16.mxu1 %v5369_v0 }
 0x4c7   :  { %4471 = vmatpush3.bf16.msra.mxu1 %v5225_v57 }
 0x4c8   :  { %4472 = vmatprep.subr.bf16.mxu1 %v5369_v0 }
 0x4cb   :  { %4473 = vmatpush3.bf16.msra.mxu1 %v5226_v58 }
 0x57f   :  { %v4401_v35 = vpop.f32.mrb[16].mxu0  ;;  %v4423_v36 = vpop.f32.mrb[16].mxu1 }
 0x580   :  { %v4402_v38 = vpop.f32.mrb[17].mxu0  ;;  %v4424_v43 = vpop.f32.mrb[17].mxu1 }
 0x581   :  { %v4403_v44 = vadd.f32 %v4402_v38, %v4401_v35  ;;  %v4425_v45 = vadd.f32 %v4424_v43, %v4423_v36  ;;  %v4404_v46 = vpop.f32.mrb[18].mxu0  ;;  %v4426_v47 = vpop.f32.mrb[18].mxu1 }
 0x582   :  { %v4405_v48 = vpop.f32.mrb[19].mxu0  ;;  %v4427_v15 = vpop.f32.mrb[19].mxu1 }
 0x583   :  { %v3566_v49 = vadd.f32 %v4403_v44, %v4328_v37 }
 0x585   :  { %v5738_v50 = vadd.f32 %v4425_v45, %v3566_v49 }
 0x587   :  { %v4361_v51 = vmul.f32 -1.442695, %v5738_v50 }
 0x589   :  { %5235 = vpow2.f32 %v4361_v51 }
 0x593   :  { %v5236_v54 = vpop.eup %5235 }
 0x594   :  { %v3614_v20 = vadd.f32 1.0, %v5236_v54 }
 0x596   :  { %5237 = vrcp.f32 %v3614_v20 }
 0x5a0   :  { %v5238_v55 = vpop.eup %5237 }
 0x5a1   :  { %v3622_v56 = vpack.c.bf16 %v5238_v55, %v5238_v55 }
 0x5a3   :  { %4455 = vmatmul.mubr.msk.bf16.vlgmr.msra.gmra.mrb[20].mxu0 %vm3641_vm1, %v3622_v56 }
 0x5a4   :  { %4494 = vmatprep.mubr.msk.bf16.mxu0 %vm5370_vm0, %v5369_v0  ;;  %4479 = vmatpush3.bf16.msra.mxu0 %v5227_v59 }
 0x5a5   :  { %4480 = vmatprep.subr.bf16.mxu0 %v5369_v0 }
 0x5a8   :  { %4481 = vmatpush3.bf16.msra.mxu0 %v5228_v61 }
 0x5a9   :  { %4482 = vmatprep.subr.bf16.mxu0 %v5369_v0 }
 0x5ac   :  { %4483 = vmatpush3.bf16.msra.mxu0 %v5229_v39 }
 0x5ad   :  { %4484 = vmatprep.subr.bf16.mxu0 %v5369_v0 }
 0x5b0   :  { %4485 = vmatpush3.bf16.msra.mxu0 %v5230_v62 }
 0x5b1   :  { %4486 = vmatprep.subr.bf16.mxu0 %v5369_v0 }
 0x5b4   :  { %4487 = vmatpush3.bf16.msra.mxu0 %v5231_v1 }
 0x5b5   :  { %4488 = vmatprep.subr.bf16.mxu0 %v5369_v0 }
 0x5b8   :  { %4489 = vmatpush3.bf16.msra.mxu0 %v5232_v3 }
 0x5b9   :  { %4490 = vmatprep.subr.bf16.mxu0 %v5369_v0 }
 0x5bc   :  { %4491 = vmatpush3.bf16.msra.mxu0 %v5233_v11 }
 0x5bd   :  { %4492 = vmatprep.subr.bf16.mxu0 %v5369_v0  ;;  %v4375_v0 = vld [vmem:[%s5822_s16] ss:$0 sm:$0xff]  ;;  %s5331_s16 = scalar_lea.vmem %s3934_s15, 128 }
 0x5be   :  { %p5332_p4 = scmp.ne.s32.totalorder %s3934_s15, %s5331_s16  ;;  %p5337_p6 = scmp.lt.s32.totalorder %s5331_s16, %s5331_s16 }
 0x5c0   :  { %4493 = vmatpush3.bf16.msra.mxu0 %v5234_v12  ;;  %p5338_p7 = por %p5337_p6, %p5336_p5 }
 0x5c2   :  { %p5339_p8 = pnand %p5338_p7, %p5332_p4 }
 0x676   :  { %v3679_v5 = vpop.f32.mrb[20].mxu0 }
 0x677   :  { %v3680_v40 = vadd.f32 %v4362_v4, %v3679_v5  ;;  %v4456_v6 = vpop.f32.mrb[21].mxu0 }
 0x678   :  { %v3682_v7 = vpop.f32.mrb[22].mxu0 }
 0x679   :  { %vm3685_vm2 = vcmp.ge.f32.partialorder %v3680_v40, 0.0  ;;  %v3686_v8 = vmul.f32 0.2, %v3680_v40  ;;  %v4457_v9 = vpop.f32.mrb[23].mxu0 }
 0x67b   :  { %v3687_v63 = vsel %vm3685_vm2, %v3680_v40, %v3686_v8 }
 0x67c   :  { %v3705_v10 = vpack.c.bf16 %v3687_v63, %v3687_v63 }
 0x67e   :  { %4475 = vmatmul.mubr.bf16.vlgmr.msra.gmra.mrb[20].mxu1 %v3705_v10 }
 0x751   :  { %v3794_v14 = vpop.f32.mrb[20].mxu1 }
 0x752   :  { %v3795_v16 = vadd.f32 %v4366_v13, %v3794_v14  ;;  %v4476_v17 = vpop.f32.mrb[21].mxu1 }
 0x753   :  { %v3797_v18 = vpop.f32.mrb[22].mxu1 }
 0x754   :  { %vm3800_vm3 = vcmp.ge.f32.partialorder %v3795_v16, 0.0  ;;  %v3801_v41 = vmul.f32 0.2, %v3795_v16  ;;  %v4477_v53 = vpop.f32.mrb[23].mxu1 }
 0x756   :  { %v3802_v42 = vsel %vm3800_vm3, %v3795_v16, %v3801_v41 }
 0x757   :  { %v3820_v19 = vpack.c.bf16 %v3802_v42, %v3802_v42 }
 0x759   :  { %4495 = vmatmul.mubr.bf16.vlgmr.msra.gmra.mrb[24].mxu0 %v3820_v19 }
 0x82c   :  { %v3909_v52 = vpop.f32.mrb[24].mxu0 }
 0x82d   :  { %v3910_v21 = vadd.f32 %v4375_v0, %v3909_v52  ;;  %v4496_v22 = vpop.f32.mrb[25].mxu0 }
 0x82e   :  { %v3912_v23 = vpop.f32.mrb[26].mxu0 }
 0x82f   :  { %v4384_v24 = vmul.f32 -1.442695, %v3910_v21  ;;  %v4497_v25 = vpop.f32.mrb[27].mxu0 }
 0x831   :  { %5239 = vpow2.f32 %v4384_v24 }
 0x83b   :  { %v5240_v26 = vpop.eup %5239 }
 0x83c   :  { %v3918_v60 = vadd.f32 1.0, %v5240_v26 }
 0x83e   :  { %5241 = vrcp.f32 %v3918_v60 }
 0x848   :  { %v5242_v27 = vpop.eup %5241 }
 0x849   :  { %3922 = vrot.lane.b32.xlu0 %v5242_v27, %s5366_s25 }
 0x8bb   :  { %v3923_v2 = vpop.permute.xlu0 %3922 }
 0x8bc   :  { %v3925_v28 = vsel %vm3641_vm1, %v5738_v50, %v3923_v2 }
 0x8bd   :  { %3926 = vst [vmem:[#allocation10] sm:$0xff] %v3925_v28 }
 0x8be   :  { %5342 = shalt.err (!%p5339_p8)
}
 0x8bf   :  { %s5837_s3 = sld [smem:[#allocation17_spill]] }
 0x8c5   :  { %s5343_s4 = scalar_lea.hbm %s5837_s3, 128 }
 0x8c6   :  { %p5344_p9 = scmp.ne.s32.totalorder %s5837_s3, %s5343_s4  ;;  %p5347_p10 = scmp.lt.u32.totalorder %s5343_s4, %s5837_s3 }
 0x8c8   :  { %p5349_p11 = pnand %p5347_p10, %p5344_p9 }
 0x8ca   :  { %5352 = shalt.err (!%p5349_p11)
}
 0x8cb   :  { %3936 = dma.vmem_to_hbm [thread:$0]  %s3934_s15, 128, %s5837_s3, [#allocation4]  }
 0x8cc   :  { %5359 = dma.done.wait [#allocation4], 128  }
 0x8cd   :  { %5360 = vsyncadd [#allocation4], 4294967168 }
 0x8ce   :  { %3940 = vsyncpa [#allocation3], 1 }
 0x8cf   :  { %3941 = vsyncpa [#allocation6], 1 }
 0x8d0   :  { %3942 = vsyncpa [#allocation9], 1 }
 0x8d1   :  { %3943 = vsyncpa [#allocation4], 1 }

</bundles_post_ra>
